<compile_context>
chip_gen: v7x
topology: tpu7x:2x2x1
jax: 0.10.0
libtpu: 0.0.40
codegen_flags: <defaults>
</compile_context>

<pallas_src>
import functools

import jax
import jax.numpy as jnp
import numpy as np
from jax.experimental import pallas as pl
from jax.experimental.pallas import tpu as pltpu


def _round_up(n, m):
    return ((n + m - 1) // m) * m


# ------------------------------ Pallas kernel -------------------------------
def bilstm_kernel(x_ref,          # (T, Bt, nInp)     bf16
                  w_in_f_ref,     # (nInp, 4*Hp)      bf16
                  w_in_r_ref,     # (nInp, 4*Hp)      bf16
                  b_in_f_ref,     # (1, 4*Hp)         f32
                  b_in_r_ref,     # (1, 4*Hp)         f32
                  whh_f_ref,      # (Hp, 4*Hp)        bf16
                  whh_r_ref,      # (Hp, 4*Hp)        bf16
                  w_emb_f_ref,    # (Hp, nOutp)       bf16
                  w_emb_r_ref,    # (Hp, nOutp)       bf16
                  b_emb_ref,      # (1, nOutp)        f32
                  out_ref,        # (T, Bt, nOutp)    f32 or bf16
                  xproj_f_ref,    # scratch (T, Bt, 4*Hp) bf16
                  xproj_r_ref,    # scratch (T, Bt, 4*Hp) bf16
                  h_fwd_ref,      # scratch (T, Bt, Hp)   bf16
                  h_bwd_ref,      # scratch (T, Bt, Hp)   bf16
                  *, unroll, act_dtype):
    T, Bt, nInp = x_ref.shape
    Hp = whh_f_ref.shape[0]

    # ---- per-direction input projection, written straight to scratch -------
    x_flat = x_ref[...].reshape(T * Bt, nInp)                    # bf16
    xproj_f_ref[...] = (
        jnp.dot(x_flat, w_in_f_ref[...], preferred_element_type=jnp.float32)
        + b_in_f_ref[...]).reshape(T, Bt, 4 * Hp).astype(jnp.bfloat16)
    xproj_r_ref[...] = (
        jnp.dot(x_flat, w_in_r_ref[...], preferred_element_type=jnp.float32)
        + b_in_r_ref[...]).reshape(T, Bt, 4 * Hp).astype(jnp.bfloat16)

    # ---- recurrences: forward + reverse advanced together (2x ILP) ---------
    whh_f = whh_f_ref[...]        # hoisted: loaded once, live across the loop
    whh_r = whh_r_ref[...]

    def cell(gx, h, c, whh):
        # PyTorch LSTM gate order: i, f, g, o (lane-aligned Hp blocks).
        gates = gx.astype(jnp.float32) + jnp.dot(
            h.astype(jnp.bfloat16), whh, preferred_element_type=jnp.float32)
        ga = gates.astype(act_dtype)
        i = jax.nn.sigmoid(ga[:, 0:Hp]).astype(jnp.float32)
        f = jax.nn.sigmoid(ga[:, Hp:2 * Hp]).astype(jnp.float32)
        g = jnp.tanh(ga[:, 2 * Hp:3 * Hp]).astype(jnp.float32)
        o = jax.nn.sigmoid(ga[:, 3 * Hp:4 * Hp]).astype(jnp.float32)
        c_new = f * c + i * g
        h_new = o * jnp.tanh(c_new)
        return h_new, c_new

    zeros = jnp.zeros((Bt, Hp), jnp.float32)

    def body(t, carry):
        h_f, c_f, h_b, c_b = carry
        tr = T - 1 - t
        h_f, c_f = cell(xproj_f_ref[t], h_f, c_f, whh_f)
        h_b, c_b = cell(xproj_r_ref[tr], h_b, c_b, whh_r)
        h_fwd_ref[t] = h_f.astype(jnp.bfloat16)
        h_bwd_ref[tr] = h_b.astype(jnp.bfloat16)
        return (h_f, c_f, h_b, c_b)

    jax.lax.fori_loop(0, T, body, (zeros, zeros, zeros, zeros), unroll=unroll)

    # ---- final Linear as split-K over the two directions (no concat) -------
    hf = h_fwd_ref[...].reshape(T * Bt, Hp)                      # bf16
    hb = h_bwd_ref[...].reshape(T * Bt, Hp)                      # bf16
    y = (jnp.dot(hf, w_emb_f_ref[...], preferred_element_type=jnp.float32)
         + jnp.dot(hb, w_emb_r_ref[...], preferred_element_type=jnp.float32)
         + b_emb_ref[...])
    out_ref[...] = y.reshape(T, Bt, out_ref.shape[-1]).astype(out_ref.dtype)


# ------------------------ weight packing helpers ------------------------------
def _pack_gate_weight(w, in_dim, H, in_dim_p, Hp):
    """(4H, in_dim) PyTorch layout -> (in_dim_p, 4*Hp) with per-gate lane pad."""
    w4 = w.reshape(4, H, in_dim)
    w4 = jnp.pad(w4, ((0, 0), (0, Hp - H), (0, in_dim_p - in_dim)))
    return jnp.transpose(w4, (2, 0, 1)).reshape(in_dim_p, 4 * Hp)


def _pack_gate_bias(b, H, Hp):
    return jnp.pad(b.reshape(4, H), ((0, 0), (0, Hp - H))).reshape(1, 4 * Hp)


def _pack_bilstm_params(p, nIn, H, nOut):
    Hp = _round_up(H, 128)
    nInp = _round_up(nIn, 128)
    nOutp = _round_up(nOut, 128)
    w_emb = p["w_emb"]                                             # (nOut, 2H)
    packed = dict(
        w_in_f=_pack_gate_weight(p["wih_f"], nIn, H, nInp, Hp).astype(jnp.bfloat16),
        w_in_r=_pack_gate_weight(p["wih_r"], nIn, H, nInp, Hp).astype(jnp.bfloat16),
        b_in_f=_pack_gate_bias(p["bih_f"] + p["bhh_f"], H, Hp).astype(jnp.float32),
        b_in_r=_pack_gate_bias(p["bih_r"] + p["bhh_r"], H, Hp).astype(jnp.float32),
        whh_f=_pack_gate_weight(p["whh_f"], H, H, Hp, Hp).astype(jnp.bfloat16),
        whh_r=_pack_gate_weight(p["whh_r"], H, H, Hp, Hp).astype(jnp.bfloat16),
        w_emb_f=jnp.pad(w_emb[:, :H].T,
                        ((0, Hp - H), (0, nOutp - nOut))).astype(jnp.bfloat16),
        w_emb_r=jnp.pad(w_emb[:, H:].T,
                        ((0, Hp - H), (0, nOutp - nOut))).astype(jnp.bfloat16),
        b_emb=jnp.pad(p["b_emb"], (0, nOutp - nOut)).reshape(1, nOutp)
              .astype(jnp.float32),
    )
    return packed, (nInp, Hp, nOutp)


# ------------------------ hardware-aware static config ------------------------
def _device_kind():
    try:
        return jax.devices()[0].device_kind.lower()
    except Exception:
        return ""


def _physical_vmem_bytes():
    try:
        v = int(getattr(pltpu.get_tpu_info(), "vmem_capacity_bytes", 0) or 0)
        if v > 0:
            return v
    except Exception:
        pass
    kind = _device_kind()
    if "v7" in kind:
        return 64 << 20
    return 128 << 20


def _activation_dtype():
    # v5 and older have no bf16 EUP/VPU -> keep gate activations in f32 there.
    kind = _device_kind()
    if any(tag in kind for tag in ("v2", "v3", "v4", "v5")):
        return jnp.float32
    return jnp.bfloat16


def _block_bytes(bt, T, nInp, Hp, nOutp, out_itemsize):
    weight_bytes = 2 * 2 * ((2 * nInp + 2 * Hp) * 4 * Hp + 2 * Hp * nOutp)  # bf16, 2-buf
    weight_bytes += 2 * 4 * (2 * 4 * Hp + nOutp)                            # f32 biases
    per_block = T * bt * (2 * nInp * 2                 # x block, double-buffered bf16
                          + 2 * nOutp * out_itemsize   # out block, double-buffered
                          + 2 * 4 * Hp * 2             # xproj scratch bf16 (fwd+rev)
                          + 2 * Hp * 2)                # h scratch bf16 (fwd+rev)
    return weight_bytes + per_block


def _pick_batch_block(Bp, T, nInp, Hp, nOutp, out_itemsize, budget):
    for bt in (128, 64, 32, 16, 8):
        if bt > Bp or Bp % bt:
            continue
        est = _block_bytes(bt, T, nInp, Hp, nOutp, out_itemsize)
        if est <= budget:
            return bt, est
    return 8, _block_bytes(8, T, nInp, Hp, nOutp, out_itemsize)


# ------------------------------- pallas wrapper --------------------------------
def _bilstm_padded(x_tb, packed, dims, *, out_dtype):
    """x_tb: (T, Bp, nInp) bf16, lane/sublane padded -> (T, Bp, nOutp) out_dtype."""
    T, Bp, nInp = x_tb.shape
    nInp_w, Hp, nOutp = dims
    assert nInp == nInp_w
    out_itemsize = jnp.dtype(out_dtype).itemsize

    phys = _physical_vmem_bytes()
    Bt, est = _pick_batch_block(Bp, T, nInp, Hp, nOutp, out_itemsize,
                                int(0.70 * phys))
    nb = Bp // Bt
    vmem_limit = int(min(int(0.85 * phys), max(32 << 20, est + (8 << 20))))

    flops = (2 * T * Bp * nInp * 8 * Hp            # two input projections
             + 2 * 2 * T * Bp * Hp * 4 * Hp        # fwd + rev recurrence matmuls
             + 2 * 2 * T * Bp * Hp * nOutp)        # split-K output projection
    transcendentals = 2 * T * Bp * 5 * Hp          # 3 sigmoid + 2 tanh / dir / step
    weight_hbm = 2 * ((2 * nInp + 2 * Hp) * 4 * Hp + 2 * Hp * nOutp)
    cost = pl.CostEstimate(
        flops=int(flops), transcendentals=int(transcendentals),
        bytes_accessed=int(T * Bp * nInp * 2 + T * Bp * nOutp * out_itemsize
                           + nb * weight_hbm))

    unroll = True if T <= 16 else 4
    act_dtype = _activation_dtype()

    def full_spec(a):
        nd = a.ndim
        return pl.BlockSpec(a.shape, lambda i, _nd=nd: (0,) * _nd)

    grid_spec = pltpu.PrefetchScalarGridSpec(
        num_scalar_prefetch=0,
        grid=(nb,),
        in_specs=[
            pl.BlockSpec((T, Bt, nInp), lambda i: (0, i, 0)),
            full_spec(packed["w_in_f"]), full_spec(packed["w_in_r"]),
            full_spec(packed["b_in_f"]), full_spec(packed["b_in_r"]),
            full_spec(packed["whh_f"]), full_spec(packed["whh_r"]),
            full_spec(packed["w_emb_f"]), full_spec(packed["w_emb_r"]),
            full_spec(packed["b_emb"]),
        ],
        out_specs=pl.BlockSpec((T, Bt, nOutp), lambda i: (0, i, 0)),
        scratch_shapes=[
            pltpu.VMEM((T, Bt, 4 * Hp), jnp.bfloat16),
            pltpu.VMEM((T, Bt, 4 * Hp), jnp.bfloat16),
            pltpu.VMEM((T, Bt, Hp), jnp.bfloat16),
            pltpu.VMEM((T, Bt, Hp), jnp.bfloat16),
        ],
    )

    return pl.pallas_call(
        functools.partial(bilstm_kernel, unroll=unroll, act_dtype=act_dtype),
        out_shape=jax.ShapeDtypeStruct((T, Bp, nOutp), out_dtype),
        grid_spec=grid_spec,
        compiler_params=pltpu.CompilerParams(
            dimension_semantics=("parallel",),
            vmem_limit_bytes=vmem_limit),
        cost_estimate=cost,
    )(x_tb,
      packed["w_in_f"], packed["w_in_r"], packed["b_in_f"], packed["b_in_r"],
      packed["whh_f"], packed["whh_r"],
      packed["w_emb_f"], packed["w_emb_r"], packed["b_emb"])


def bidirectional_lstm(x, params):
    """x: (B, T, nIn) f32 -> (B, T, nOut) f32.  Matches PyTorch BidirectionalLSTM."""
    B, T, nIn = x.shape
    H = params["whh_f"].shape[1]
    nOut = params["w_emb"].shape[0]
    packed, dims = _pack_bilstm_params(params, nIn, H, nOut)
    nInp, _, _ = dims
    Bp = _round_up(max(B, 8), 8)
    x_tb = jnp.transpose(x, (1, 0, 2))
    x_tb = jnp.pad(x_tb, ((0, 0), (0, Bp - B), (0, nInp - nIn))).astype(jnp.bfloat16)
    out_tb = _bilstm_padded(x_tb, packed, dims, out_dtype=jnp.float32)
    return jnp.transpose(out_tb[:, :B, :nOut], (1, 0, 2))


def crnn_rnn_head(x, p1, p2):
    """CRNN.rnn = Sequential(BiLSTM(nIn, nh, nh), BiLSTM(nh, nh, nclass)).

    Stage 1 emits a bf16 (T, Bp, padded) block that stage 2 consumes directly:
    padded output lanes of stage 1 are exactly zero, so no re-pad / transpose /
    f32 HBM round trip is needed between the two pallas_calls.
    """
    B, T, nIn = x.shape
    H1, nOut1 = p1["whh_f"].shape[1], p1["w_emb"].shape[0]
    H2, nOut2 = p2["whh_f"].shape[1], p2["w_emb"].shape[0]
    packed1, dims1 = _pack_bilstm_params(p1, nIn, H1, nOut1)
    packed2, dims2 = _pack_bilstm_params(p2, nOut1, H2, nOut2)
    assert dims1[2] == dims2[0]  # stage-1 padded out width == stage-2 padded in
    Bp = _round_up(max(B, 8), 8)
    x_tb = jnp.transpose(x, (1, 0, 2))
    x_tb = jnp.pad(x_tb, ((0, 0), (0, Bp - B), (0, dims1[0] - nIn))).astype(jnp.bfloat16)
    mid_tb = _bilstm_padded(x_tb, packed1, dims1, out_dtype=jnp.bfloat16)
    out_tb = _bilstm_padded(mid_tb, packed2, dims2, out_dtype=jnp.float32)
    return jnp.transpose(out_tb[:, :B, :nOut2], (1, 0, 2))


# --------------------- pure-JAX f32 reference (PyTorch math) ------------------
def _lstm_dir_ref(x, wih, whh, bih, bhh, reverse):
    B, T, nIn = x.shape
    H = whh.shape[1]
    bias = (bih + bhh).astype(jnp.float32)

    def step(carry, xt):
        h, c = carry
        gates = xt @ wih.T + bias + h @ whh.T
        i, f, g, o = jnp.split(gates, 4, axis=-1)
        i, f, o = jax.nn.sigmoid(i), jax.nn.sigmoid(f), jax.nn.sigmoid(o)
        g = jnp.tanh(g)
        c = f * c + i * g
        h = o * jnp.tanh(c)
        return (h, c), h

    xs = jnp.transpose(x, (1, 0, 2))
    if reverse:
        xs = xs[::-1]
    init = (jnp.zeros((B, H), jnp.float32), jnp.zeros((B, H), jnp.float32))
    _, hs = jax.lax.scan(step, init, xs)
    if reverse:
        hs = hs[::-1]
    return jnp.transpose(hs, (1, 0, 2))


def bidirectional_lstm_ref(x, p):
    h_f = _lstm_dir_ref(x, p["wih_f"], p["whh_f"], p["bih_f"], p["bhh_f"], False)
    h_r = _lstm_dir_ref(x, p["wih_r"], p["whh_r"], p["bih_r"], p["bhh_r"], True)
    rec = jnp.concatenate([h_f, h_r], axis=-1)
    return rec @ p["w_emb"].T + p["b_emb"]


def crnn_rnn_head_ref(x, p1, p2):
    return bidirectional_lstm_ref(bidirectional_lstm_ref(x, p1), p2)


# ----------------------------------- main ------------------------------------
def init_params(key, nIn, nHidden, nOut):
    k = 1.0 / np.sqrt(nHidden)
    keys = jax.random.split(key, 10)
    u = lambda kk, shape: jax.random.uniform(kk, shape, jnp.float32, -k, k)
    return {
        "wih_f": u(keys[0], (4 * nHidden, nIn)),
        "whh_f": u(keys[1], (4 * nHidden, nHidden)),
        "bih_f": u(keys[2], (4 * nHidden,)),
        "bhh_f": u(keys[3], (4 * nHidden,)),
        "wih_r": u(keys[4], (4 * nHidden, nIn)),
        "whh_r": u(keys[5], (4 * nHidden, nHidden)),
        "bih_r": u(keys[6], (4 * nHidden,)),
        "bhh_r": u(keys[7], (4 * nHidden,)),
        "w_emb": u(keys[8], (nOut, 2 * nHidden)),
        "b_emb": u(keys[9], (nOut,)),
    }


if __name__ == "__main__":
    # Small stand-ins for CRNN's rnn head (real model: nIn=512, nh, nclass).
    B, T, nIn, nh, nclass = 2, 8, 32, 32, 16

    key = jax.random.PRNGKey(0)
    kx, kp1, kp2 = jax.random.split(key, 3)
    x = jax.random.normal(kx, (B, T, nIn), jnp.float32)
    p1 = init_params(kp1, nIn, nh, nh)        # BidirectionalLSTM(nIn, nh, nh)
    p2 = init_params(kp2, nh, nh, nclass)     # BidirectionalLSTM(nh, nh, nclass)

    # Single BiLSTM stage vs. pure f32 reference (bf16 kernel error budget).
    out1 = jax.block_until_ready(jax.jit(bidirectional_lstm)(x, p1))
    ref1 = jax.block_until_ready(jax.jit(bidirectional_lstm_ref)(x, p1))
    np.testing.assert_allclose(np.asarray(out1), np.asarray(ref1),
                               rtol=2.5e-2, atol=2.5e-2)

    # Full CRNN rnn head (two stacked BiLSTMs, fused padded bf16 hand-off).
    out = jax.block_until_ready(jax.jit(crnn_rnn_head)(x, p1, p2))
    ref = jax.block_until_ready(jax.jit(crnn_rnn_head_ref)(x, p1, p2))
    assert out.shape == (B, T, nclass)
    np.testing.assert_allclose(np.asarray(out), np.asarray(ref),
                               rtol=5e-2, atol=5e-2)
    print("KERNEL_OK")
</pallas_src>

<mosaic_0001>
module attributes {stable_mosaic.version = 11 : i64} {
  func.func @bilstm_kernel(%arg0: i32, %arg1: memref<8x8x128xbf16, #tpu.memory_space<vmem>>, %arg2: memref<128x512xbf16, #tpu.memory_space<vmem>>, %arg3: memref<128x512xbf16, #tpu.memory_space<vmem>>, %arg4: memref<1x512xf32, #tpu.memory_space<vmem>>, %arg5: memref<1x512xf32, #tpu.memory_space<vmem>>, %arg6: memref<128x512xbf16, #tpu.memory_space<vmem>>, %arg7: memref<128x512xbf16, #tpu.memory_space<vmem>>, %arg8: memref<128x128xbf16, #tpu.memory_space<vmem>>, %arg9: memref<128x128xbf16, #tpu.memory_space<vmem>>, %arg10: memref<1x128xf32, #tpu.memory_space<vmem>>, %arg11: memref<8x8x128xf32, #tpu.memory_space<vmem>>, %arg12: memref<8x8x512xbf16, #tpu.memory_space<vmem>>, %arg13: memref<8x8x512xbf16, #tpu.memory_space<vmem>>, %arg14: memref<8x8x128xbf16, #tpu.memory_space<vmem>>, %arg15: memref<8x8x128xbf16, #tpu.memory_space<vmem>>) attributes {dimension_semantics = [#tpu.dimension_semantics<parallel>], iteration_bounds = array<i64: 1>, scalar_prefetch = 0 : i64, scratch_operands = 4 : i64, tpu.core_type = #tpu.core_type<tc>, window_params = [{transform_indices = @transform_0, window_bounds = array<i64: 8, 8, 128>}, {pipeline_mode = #tpu.pipeline_mode<synchronous>, transform_indices = @transform_1, window_bounds = array<i64: 128, 512>}, {pipeline_mode = #tpu.pipeline_mode<synchronous>, transform_indices = @transform_2, window_bounds = array<i64: 128, 512>}, {pipeline_mode = #tpu.pipeline_mode<synchronous>, transform_indices = @transform_3, window_bounds = array<i64: 1, 512>}, {pipeline_mode = #tpu.pipeline_mode<synchronous>, transform_indices = @transform_4, window_bounds = array<i64: 1, 512>}, {pipeline_mode = #tpu.pipeline_mode<synchronous>, transform_indices = @transform_5, window_bounds = array<i64: 128, 512>}, {pipeline_mode = #tpu.pipeline_mode<synchronous>, transform_indices = @transform_6, window_bounds = array<i64: 128, 512>}, {pipeline_mode = #tpu.pipeline_mode<synchronous>, transform_indices = @transform_7, window_bounds = array<i64: 128, 128>}, {pipeline_mode = #tpu.pipeline_mode<synchronous>, transform_indices = @transform_8, window_bounds = array<i64: 128, 128>}, {pipeline_mode = #tpu.pipeline_mode<synchronous>, transform_indices = @transform_9, window_bounds = array<i64: 1, 128>}, {transform_indices = @transform_10, window_bounds = array<i64: 8, 8, 128>}]} {
    %c0 = arith.constant 0 : index
    %c0_0 = arith.constant 0 : index
    %c0_1 = arith.constant 0 : index
    %0 = vector.load %arg1[%c0, %c0_0, %c0_1] : memref<8x8x128xbf16, #tpu.memory_space<vmem>>, vector<8x8x128xbf16>
    %1 = vector.shape_cast %0 : vector<8x8x128xbf16> to vector<64x128xbf16>
    %c0_2 = arith.constant 0 : index
    %c0_3 = arith.constant 0 : index
    %2 = vector.load %arg2[%c0_2, %c0_3] : memref<128x512xbf16, #tpu.memory_space<vmem>>, vector<128x512xbf16>
    %cst = arith.constant dense<0.000000e+00> : vector<64x512xf32>
    %3 = tpu.matmul %1, %2, %cst {dimension_numbers = #tpu.dot_dimension_numbers<[1], [0], [0], [1], [0, 0, 1, 1], [], []>} : vector<64x128xbf16>, vector<128x512xbf16>, vector<64x512xf32> -> vector<64x512xf32>
    %c0_4 = arith.constant 0 : index
    %c0_5 = arith.constant 0 : index
    %4 = vector.load %arg4[%c0_4, %c0_5] : memref<1x512xf32, #tpu.memory_space<vmem>>, vector<1x512xf32>
    %5 = vector.broadcast %4 : vector<1x512xf32> to vector<64x512xf32>
    %6 = arith.addf %3, %5 : vector<64x512xf32>
    %7 = vector.shape_cast %6 : vector<64x512xf32> to vector<8x8x512xf32>
    %8 = arith.truncf %7 : vector<8x8x512xf32> to vector<8x8x512xbf16>
    %c0_6 = arith.constant 0 : index
    %c0_7 = arith.constant 0 : index
    %c0_8 = arith.constant 0 : index
    %9 = vector.load %arg12[%c0_6, %c0_7, %c0_8] : memref<8x8x512xbf16, #tpu.memory_space<vmem>>, vector<8x8x512xbf16>
    tpu.vector_store %arg12[%c0_6, %c0_7, %c0_8], %8 {strides = array<i32>} : memref<8x8x512xbf16, #tpu.memory_space<vmem>>, vector<8x8x512xbf16>,
    %c0_9 = arith.constant 0 : index
    %c0_10 = arith.constant 0 : index
    %10 = vector.load %arg3[%c0_9, %c0_10] : memref<128x512xbf16, #tpu.memory_space<vmem>>, vector<128x512xbf16>
    %cst_11 = arith.constant dense<0.000000e+00> : vector<64x512xf32>
    %11 = tpu.matmul %1, %10, %cst_11 {dimension_numbers = #tpu.dot_dimension_numbers<[1], [0], [0], [1], [0, 0, 1, 1], [], []>} : vector<64x128xbf16>, vector<128x512xbf16>, vector<64x512xf32> -> vector<64x512xf32>
    %c0_12 = arith.constant 0 : index
    %c0_13 = arith.constant 0 : index
    %12 = vector.load %arg5[%c0_12, %c0_13] : memref<1x512xf32, #tpu.memory_space<vmem>>, vector<1x512xf32>
    %13 = vector.broadcast %12 : vector<1x512xf32> to vector<64x512xf32>
    %14 = arith.addf %11, %13 : vector<64x512xf32>
    %15 = vector.shape_cast %14 : vector<64x512xf32> to vector<8x8x512xf32>
    %16 = arith.truncf %15 : vector<8x8x512xf32> to vector<8x8x512xbf16>
    %c0_14 = arith.constant 0 : index
    %c0_15 = arith.constant 0 : index
    %c0_16 = arith.constant 0 : index
    %17 = vector.load %arg13[%c0_14, %c0_15, %c0_16] : memref<8x8x512xbf16, #tpu.memory_space<vmem>>, vector<8x8x512xbf16>
    tpu.vector_store %arg13[%c0_14, %c0_15, %c0_16], %16 {strides = array<i32>} : memref<8x8x512xbf16, #tpu.memory_space<vmem>>, vector<8x8x512xbf16>,
    %c0_17 = arith.constant 0 : index
    %c0_18 = arith.constant 0 : index
    %18 = vector.load %arg6[%c0_17, %c0_18] : memref<128x512xbf16, #tpu.memory_space<vmem>>, vector<128x512xbf16>
    %c0_19 = arith.constant 0 : index
    %c0_20 = arith.constant 0 : index
    %19 = vector.load %arg7[%c0_19, %c0_20] : memref<128x512xbf16, #tpu.memory_space<vmem>>, vector<128x512xbf16>
    %cst_21 = arith.constant 0.000000e+00 : f32
    %20 = vector.broadcast %cst_21 : f32 to vector<8x128xf32>
    %c0_i32 = arith.constant 0 : i32
    %c7_i32 = arith.constant 7 : i32
    %21 = arith.subi %c7_i32, %c0_i32 : i32
    %22 = arith.index_cast %c0_i32 : i32 to index
    %c0_22 = arith.constant 0 : index
    %c0_23 = arith.constant 0 : index
    %23 = vector.load %arg12[%22, %c0_22, %c0_23] : memref<8x8x512xbf16, #tpu.memory_space<vmem>>, vector<1x8x512xbf16>
    %24 = vector.shape_cast %23 : vector<1x8x512xbf16> to vector<8x512xbf16>
    %25 = arith.extf %24 : vector<8x512xbf16> to vector<8x512xf32>
    %26 = arith.truncf %20 : vector<8x128xf32> to vector<8x128xbf16>
    %cst_24 = arith.constant dense<0.000000e+00> : vector<8x512xf32>
    %27 = tpu.matmul %26, %18, %cst_24 {dimension_numbers = #tpu.dot_dimension_numbers<[1], [0], [0], [1], [0, 0, 1, 1], [], []>} : vector<8x128xbf16>, vector<128x512xbf16>, vector<8x512xf32> -> vector<8x512xf32>
    %28 = arith.addf %25, %27 : vector<8x512xf32>
    %29 = arith.truncf %28 : vector<8x512xf32> to vector<8x512xbf16>
    %30 = vector.extract_strided_slice %29 {offsets = [0, 0], sizes = [8, 128], strides = [1, 1]} : vector<8x512xbf16> to vector<8x128xbf16>
    %31 = arith.negf %30 : vector<8x128xbf16>
    %32 = math.exp %31 : vector<8x128xbf16>
    %cst_25 = arith.constant 1.000000e+00 : bf16
    %33 = vector.broadcast %cst_25 : bf16 to vector<8x128xbf16>
    %34 = arith.addf %33, %32 : vector<8x128xbf16>
    %35 = arith.divf %33, %34 : vector<8x128xbf16>
    %36 = arith.extf %35 : vector<8x128xbf16> to vector<8x128xf32>
    %37 = vector.extract_strided_slice %29 {offsets = [0, 128], sizes = [8, 128], strides = [1, 1]} : vector<8x512xbf16> to vector<8x128xbf16>
    %38 = arith.negf %37 : vector<8x128xbf16>
    %39 = math.exp %38 : vector<8x128xbf16>
    %cst_26 = arith.constant 1.000000e+00 : bf16
    %40 = vector.broadcast %cst_26 : bf16 to vector<8x128xbf16>
    %41 = arith.addf %40, %39 : vector<8x128xbf16>
    %42 = arith.divf %40, %41 : vector<8x128xbf16>
    %43 = arith.extf %42 : vector<8x128xbf16> to vector<8x128xf32>
    %44 = vector.extract_strided_slice %29 {offsets = [0, 256], sizes = [8, 128], strides = [1, 1]} : vector<8x512xbf16> to vector<8x128xbf16>
    %45 = math.tanh %44 : vector<8x128xbf16>
    %46 = arith.extf %45 : vector<8x128xbf16> to vector<8x128xf32>
    %47 = vector.extract_strided_slice %29 {offsets = [0, 384], sizes = [8, 128], strides = [1, 1]} : vector<8x512xbf16> to vector<8x128xbf16>
    %48 = arith.negf %47 : vector<8x128xbf16>
    %49 = math.exp %48 : vector<8x128xbf16>
    %cst_27 = arith.constant 1.000000e+00 : bf16
    %50 = vector.broadcast %cst_27 : bf16 to vector<8x128xbf16>
    %51 = arith.addf %50, %49 : vector<8x128xbf16>
    %52 = arith.divf %50, %51 : vector<8x128xbf16>
    %53 = arith.extf %52 : vector<8x128xbf16> to vector<8x128xf32>
    %54 = arith.mulf %43, %20 : vector<8x128xf32>
    %55 = arith.mulf %36, %46 : vector<8x128xf32>
    %56 = arith.addf %54, %55 : vector<8x128xf32>
    %57 = math.tanh %56 : vector<8x128xf32>
    %58 = arith.mulf %53, %57 : vector<8x128xf32>
    %59 = arith.index_cast %21 : i32 to index
    %c0_28 = arith.constant 0 : index
    %c0_29 = arith.constant 0 : index
    %60 = vector.load %arg13[%59, %c0_28, %c0_29] : memref<8x8x512xbf16, #tpu.memory_space<vmem>>, vector<1x8x512xbf16>
    %61 = vector.shape_cast %60 : vector<1x8x512xbf16> to vector<8x512xbf16>
    %62 = arith.extf %61 : vector<8x512xbf16> to vector<8x512xf32>
    %63 = arith.truncf %20 : vector<8x128xf32> to vector<8x128xbf16>
    %cst_30 = arith.constant dense<0.000000e+00> : vector<8x512xf32>
    %64 = tpu.matmul %63, %19, %cst_30 {dimension_numbers = #tpu.dot_dimension_numbers<[1], [0], [0], [1], [0, 0, 1, 1], [], []>} : vector<8x128xbf16>, vector<128x512xbf16>, vector<8x512xf32> -> vector<8x512xf32>
    %65 = arith.addf %62, %64 : vector<8x512xf32>
    %66 = arith.truncf %65 : vector<8x512xf32> to vector<8x512xbf16>
    %67 = vector.extract_strided_slice %66 {offsets = [0, 0], sizes = [8, 128], strides = [1, 1]} : vector<8x512xbf16> to vector<8x128xbf16>
    %68 = arith.negf %67 : vector<8x128xbf16>
    %69 = math.exp %68 : vector<8x128xbf16>
    %cst_31 = arith.constant 1.000000e+00 : bf16
    %70 = vector.broadcast %cst_31 : bf16 to vector<8x128xbf16>
    %71 = arith.addf %70, %69 : vector<8x128xbf16>
    %72 = arith.divf %70, %71 : vector<8x128xbf16>
    %73 = arith.extf %72 : vector<8x128xbf16> to vector<8x128xf32>
    %74 = vector.extract_strided_slice %66 {offsets = [0, 128], sizes = [8, 128], strides = [1, 1]} : vector<8x512xbf16> to vector<8x128xbf16>
    %75 = arith.negf %74 : vector<8x128xbf16>
    %76 = math.exp %75 : vector<8x128xbf16>
    %cst_32 = arith.constant 1.000000e+00 : bf16
    %77 = vector.broadcast %cst_32 : bf16 to vector<8x128xbf16>
    %78 = arith.addf %77, %76 : vector<8x128xbf16>
    %79 = arith.divf %77, %78 : vector<8x128xbf16>
    %80 = arith.extf %79 : vector<8x128xbf16> to vector<8x128xf32>
    %81 = vector.extract_strided_slice %66 {offsets = [0, 256], sizes = [8, 128], strides = [1, 1]} : vector<8x512xbf16> to vector<8x128xbf16>
    %82 = math.tanh %81 : vector<8x128xbf16>
    %83 = arith.extf %82 : vector<8x128xbf16> to vector<8x128xf32>
    %84 = vector.extract_strided_slice %66 {offsets = [0, 384], sizes = [8, 128], strides = [1, 1]} : vector<8x512xbf16> to vector<8x128xbf16>
    %85 = arith.negf %84 : vector<8x128xbf16>
    %86 = math.exp %85 : vector<8x128xbf16>
    %cst_33 = arith.constant 1.000000e+00 : bf16
    %87 = vector.broadcast %cst_33 : bf16 to vector<8x128xbf16>
    %88 = arith.addf %87, %86 : vector<8x128xbf16>
    %89 = arith.divf %87, %88 : vector<8x128xbf16>
    %90 = arith.extf %89 : vector<8x128xbf16> to vector<8x128xf32>
    %91 = arith.mulf %80, %20 : vector<8x128xf32>
    %92 = arith.mulf %73, %83 : vector<8x128xf32>
    %93 = arith.addf %91, %92 : vector<8x128xf32>
    %94 = math.tanh %93 : vector<8x128xf32>
    %95 = arith.mulf %90, %94 : vector<8x128xf32>
    %96 = arith.truncf %58 : vector<8x128xf32> to vector<8x128xbf16>
    %97 = arith.index_cast %c0_i32 : i32 to index
    %c0_34 = arith.constant 0 : index
    %c0_35 = arith.constant 0 : index
    %98 = vector.load %arg14[%97, %c0_34, %c0_35] : memref<8x8x128xbf16, #tpu.memory_space<vmem>>, vector<1x8x128xbf16>
    %99 = vector.shape_cast %98 : vector<1x8x128xbf16> to vector<8x128xbf16>
    %100 = vector.shape_cast %96 : vector<8x128xbf16> to vector<1x8x128xbf16>
    tpu.vector_store %arg14[%97, %c0_34, %c0_35], %100 {strides = array<i32>} : memref<8x8x128xbf16, #tpu.memory_space<vmem>>, vector<1x8x128xbf16>,
    %101 = arith.truncf %95 : vector<8x128xf32> to vector<8x128xbf16>
    %102 = arith.index_cast %21 : i32 to index
    %c0_36 = arith.constant 0 : index
    %c0_37 = arith.constant 0 : index
    %103 = vector.load %arg15[%102, %c0_36, %c0_37] : memref<8x8x128xbf16, #tpu.memory_space<vmem>>, vector<1x8x128xbf16>
    %104 = vector.shape_cast %103 : vector<1x8x128xbf16> to vector<8x128xbf16>
    %105 = vector.shape_cast %101 : vector<8x128xbf16> to vector<1x8x128xbf16>
    tpu.vector_store %arg15[%102, %c0_36, %c0_37], %105 {strides = array<i32>} : memref<8x8x128xbf16, #tpu.memory_space<vmem>>, vector<1x8x128xbf16>,
    %c1_i32 = arith.constant 1 : i32
    %c7_i32_38 = arith.constant 7 : i32
    %106 = arith.subi %c7_i32_38, %c1_i32 : i32
    %107 = arith.index_cast %c1_i32 : i32 to index
    %c0_39 = arith.constant 0 : index
    %c0_40 = arith.constant 0 : index
    %108 = vector.load %arg12[%107, %c0_39, %c0_40] : memref<8x8x512xbf16, #tpu.memory_space<vmem>>, vector<1x8x512xbf16>
    %109 = vector.shape_cast %108 : vector<1x8x512xbf16> to vector<8x512xbf16>
    %110 = arith.extf %109 : vector<8x512xbf16> to vector<8x512xf32>
    %111 = arith.truncf %58 : vector<8x128xf32> to vector<8x128xbf16>
    %cst_41 = arith.constant dense<0.000000e+00> : vector<8x512xf32>
    %112 = tpu.matmul %111, %18, %cst_41 {dimension_numbers = #tpu.dot_dimension_numbers<[1], [0], [0], [1], [0, 0, 1, 1], [], []>} : vector<8x128xbf16>, vector<128x512xbf16>, vector<8x512xf32> -> vector<8x512xf32>
    %113 = arith.addf %110, %112 : vector<8x512xf32>
    %114 = arith.truncf %113 : vector<8x512xf32> to vector<8x512xbf16>
    %115 = vector.extract_strided_slice %114 {offsets = [0, 0], sizes = [8, 128], strides = [1, 1]} : vector<8x512xbf16> to vector<8x128xbf16>
    %116 = arith.negf %115 : vector<8x128xbf16>
    %117 = math.exp %116 : vector<8x128xbf16>
    %cst_42 = arith.constant 1.000000e+00 : bf16
    %118 = vector.broadcast %cst_42 : bf16 to vector<8x128xbf16>
    %119 = arith.addf %118, %117 : vector<8x128xbf16>
    %120 = arith.divf %118, %119 : vector<8x128xbf16>
    %121 = arith.extf %120 : vector<8x128xbf16> to vector<8x128xf32>
    %122 = vector.extract_strided_slice %114 {offsets = [0, 128], sizes = [8, 128], strides = [1, 1]} : vector<8x512xbf16> to vector<8x128xbf16>
    %123 = arith.negf %122 : vector<8x128xbf16>
    %124 = math.exp %123 : vector<8x128xbf16>
    %cst_43 = arith.constant 1.000000e+00 : bf16
    %125 = vector.broadcast %cst_43 : bf16 to vector<8x128xbf16>
    %126 = arith.addf %125, %124 : vector<8x128xbf16>
    %127 = arith.divf %125, %126 : vector<8x128xbf16>
    %128 = arith.extf %127 : vector<8x128xbf16> to vector<8x128xf32>
    %129 = vector.extract_strided_slice %114 {offsets = [0, 256], sizes = [8, 128], strides = [1, 1]} : vector<8x512xbf16> to vector<8x128xbf16>
    %130 = math.tanh %129 : vector<8x128xbf16>
    %131 = arith.extf %130 : vector<8x128xbf16> to vector<8x128xf32>
    %132 = vector.extract_strided_slice %114 {offsets = [0, 384], sizes = [8, 128], strides = [1, 1]} : vector<8x512xbf16> to vector<8x128xbf16>
    %133 = arith.negf %132 : vector<8x128xbf16>
    %134 = math.exp %133 : vector<8x128xbf16>
    %cst_44 = arith.constant 1.000000e+00 : bf16
    %135 = vector.broadcast %cst_44 : bf16 to vector<8x128xbf16>
    %136 = arith.addf %135, %134 : vector<8x128xbf16>
    %137 = arith.divf %135, %136 : vector<8x128xbf16>
    %138 = arith.extf %137 : vector<8x128xbf16> to vector<8x128xf32>
    %139 = arith.mulf %128, %56 : vector<8x128xf32>
    %140 = arith.mulf %121, %131 : vector<8x128xf32>
    %141 = arith.addf %139, %140 : vector<8x128xf32>
    %142 = math.tanh %141 : vector<8x128xf32>
    %143 = arith.mulf %138, %142 : vector<8x128xf32>
    %144 = arith.index_cast %106 : i32 to index
    %c0_45 = arith.constant 0 : index
    %c0_46 = arith.constant 0 : index
    %145 = vector.load %arg13[%144, %c0_45, %c0_46] : memref<8x8x512xbf16, #tpu.memory_space<vmem>>, vector<1x8x512xbf16>
    %146 = vector.shape_cast %145 : vector<1x8x512xbf16> to vector<8x512xbf16>
    %147 = arith.extf %146 : vector<8x512xbf16> to vector<8x512xf32>
    %148 = arith.truncf %95 : vector<8x128xf32> to vector<8x128xbf16>
    %cst_47 = arith.constant dense<0.000000e+00> : vector<8x512xf32>
    %149 = tpu.matmul %148, %19, %cst_47 {dimension_numbers = #tpu.dot_dimension_numbers<[1], [0], [0], [1], [0, 0, 1, 1], [], []>} : vector<8x128xbf16>, vector<128x512xbf16>, vector<8x512xf32> -> vector<8x512xf32>
    %150 = arith.addf %147, %149 : vector<8x512xf32>
    %151 = arith.truncf %150 : vector<8x512xf32> to vector<8x512xbf16>
    %152 = vector.extract_strided_slice %151 {offsets = [0, 0], sizes = [8, 128], strides = [1, 1]} : vector<8x512xbf16> to vector<8x128xbf16>
    %153 = arith.negf %152 : vector<8x128xbf16>
    %154 = math.exp %153 : vector<8x128xbf16>
    %cst_48 = arith.constant 1.000000e+00 : bf16
    %155 = vector.broadcast %cst_48 : bf16 to vector<8x128xbf16>
    %156 = arith.addf %155, %154 : vector<8x128xbf16>
    %157 = arith.divf %155, %156 : vector<8x128xbf16>
    %158 = arith.extf %157 : vector<8x128xbf16> to vector<8x128xf32>
    %159 = vector.extract_strided_slice %151 {offsets = [0, 128], sizes = [8, 128], strides = [1, 1]} : vector<8x512xbf16> to vector<8x128xbf16>
    %160 = arith.negf %159 : vector<8x128xbf16>
    %161 = math.exp %160 : vector<8x128xbf16>
    %cst_49 = arith.constant 1.000000e+00 : bf16
    %162 = vector.broadcast %cst_49 : bf16 to vector<8x128xbf16>
    %163 = arith.addf %162, %161 : vector<8x128xbf16>
    %164 = arith.divf %162, %163 : vector<8x128xbf16>
    %165 = arith.extf %164 : vector<8x128xbf16> to vector<8x128xf32>
    %166 = vector.extract_strided_slice %151 {offsets = [0, 256], sizes = [8, 128], strides = [1, 1]} : vector<8x512xbf16> to vector<8x128xbf16>
    %167 = math.tanh %166 : vector<8x128xbf16>
    %168 = arith.extf %167 : vector<8x128xbf16> to vector<8x128xf32>
    %169 = vector.extract_strided_slice %151 {offsets = [0, 384], sizes = [8, 128], strides = [1, 1]} : vector<8x512xbf16> to vector<8x128xbf16>
    %170 = arith.negf %169 : vector<8x128xbf16>
    %171 = math.exp %170 : vector<8x128xbf16>
    %cst_50 = arith.constant 1.000000e+00 : bf16
    %172 = vector.broadcast %cst_50 : bf16 to vector<8x128xbf16>
    %173 = arith.addf %172, %171 : vector<8x128xbf16>
    %174 = arith.divf %172, %173 : vector<8x128xbf16>
    %175 = arith.extf %174 : vector<8x128xbf16> to vector<8x128xf32>
    %176 = arith.mulf %165, %93 : vector<8x128xf32>
    %177 = arith.mulf %158, %168 : vector<8x128xf32>
    %178 = arith.addf %176, %177 : vector<8x128xf32>
    %179 = math.tanh %178 : vector<8x128xf32>
    %180 = arith.mulf %175, %179 : vector<8x128xf32>
    %181 = arith.truncf %143 : vector<8x128xf32> to vector<8x128xbf16>
    %182 = arith.index_cast %c1_i32 : i32 to index
    %c0_51 = arith.constant 0 : index
    %c0_52 = arith.constant 0 : index
    %183 = vector.load %arg14[%182, %c0_51, %c0_52] : memref<8x8x128xbf16, #tpu.memory_space<vmem>>, vector<1x8x128xbf16>
    %184 = vector.shape_cast %183 : vector<1x8x128xbf16> to vector<8x128xbf16>
    %185 = vector.shape_cast %181 : vector<8x128xbf16> to vector<1x8x128xbf16>
    tpu.vector_store %arg14[%182, %c0_51, %c0_52], %185 {strides = array<i32>} : memref<8x8x128xbf16, #tpu.memory_space<vmem>>, vector<1x8x128xbf16>,
    %186 = arith.truncf %180 : vector<8x128xf32> to vector<8x128xbf16>
    %187 = arith.index_cast %106 : i32 to index
    %c0_53 = arith.constant 0 : index
    %c0_54 = arith.constant 0 : index
    %188 = vector.load %arg15[%187, %c0_53, %c0_54] : memref<8x8x128xbf16, #tpu.memory_space<vmem>>, vector<1x8x128xbf16>
    %189 = vector.shape_cast %188 : vector<1x8x128xbf16> to vector<8x128xbf16>
    %190 = vector.shape_cast %186 : vector<8x128xbf16> to vector<1x8x128xbf16>
    tpu.vector_store %arg15[%187, %c0_53, %c0_54], %190 {strides = array<i32>} : memref<8x8x128xbf16, #tpu.memory_space<vmem>>, vector<1x8x128xbf16>,
    %c2_i32 = arith.constant 2 : i32
    %c7_i32_55 = arith.constant 7 : i32
    %191 = arith.subi %c7_i32_55, %c2_i32 : i32
    %192 = arith.index_cast %c2_i32 : i32 to index
    %c0_56 = arith.constant 0 : index
    %c0_57 = arith.constant 0 : index
    %193 = vector.load %arg12[%192, %c0_56, %c0_57] : memref<8x8x512xbf16, #tpu.memory_space<vmem>>, vector<1x8x512xbf16>
    %194 = vector.shape_cast %193 : vector<1x8x512xbf16> to vector<8x512xbf16>
    %195 = arith.extf %194 : vector<8x512xbf16> to vector<8x512xf32>
    %196 = arith.truncf %143 : vector<8x128xf32> to vector<8x128xbf16>
    %cst_58 = arith.constant dense<0.000000e+00> : vector<8x512xf32>
    %197 = tpu.matmul %196, %18, %cst_58 {dimension_numbers = #tpu.dot_dimension_numbers<[1], [0], [0], [1], [0, 0, 1, 1], [], []>} : vector<8x128xbf16>, vector<128x512xbf16>, vector<8x512xf32> -> vector<8x512xf32>
    %198 = arith.addf %195, %197 : vector<8x512xf32>
    %199 = arith.truncf %198 : vector<8x512xf32> to vector<8x512xbf16>
    %200 = vector.extract_strided_slice %199 {offsets = [0, 0], sizes = [8, 128], strides = [1, 1]} : vector<8x512xbf16> to vector<8x128xbf16>
    %201 = arith.negf %200 : vector<8x128xbf16>
    %202 = math.exp %201 : vector<8x128xbf16>
    %cst_59 = arith.constant 1.000000e+00 : bf16
    %203 = vector.broadcast %cst_59 : bf16 to vector<8x128xbf16>
    %204 = arith.addf %203, %202 : vector<8x128xbf16>
    %205 = arith.divf %203, %204 : vector<8x128xbf16>
    %206 = arith.extf %205 : vector<8x128xbf16> to vector<8x128xf32>
    %207 = vector.extract_strided_slice %199 {offsets = [0, 128], sizes = [8, 128], strides = [1, 1]} : vector<8x512xbf16> to vector<8x128xbf16>
    %208 = arith.negf %207 : vector<8x128xbf16>
    %209 = math.exp %208 : vector<8x128xbf16>
    %cst_60 = arith.constant 1.000000e+00 : bf16
    %210 = vector.broadcast %cst_60 : bf16 to vector<8x128xbf16>
    %211 = arith.addf %210, %209 : vector<8x128xbf16>
    %212 = arith.divf %210, %211 : vector<8x128xbf16>
    %213 = arith.extf %212 : vector<8x128xbf16> to vector<8x128xf32>
    %214 = vector.extract_strided_slice %199 {offsets = [0, 256], sizes = [8, 128], strides = [1, 1]} : vector<8x512xbf16> to vector<8x128xbf16>
    %215 = math.tanh %214 : vector<8x128xbf16>
    %216 = arith.extf %215 : vector<8x128xbf16> to vector<8x128xf32>
    %217 = vector.extract_strided_slice %199 {offsets = [0, 384], sizes = [8, 128], strides = [1, 1]} : vector<8x512xbf16> to vector<8x128xbf16>
    %218 = arith.negf %217 : vector<8x128xbf16>
    %219 = math.exp %218 : vector<8x128xbf16>
    %cst_61 = arith.constant 1.000000e+00 : bf16
    %220 = vector.broadcast %cst_61 : bf16 to vector<8x128xbf16>
    %221 = arith.addf %220, %219 : vector<8x128xbf16>
    %222 = arith.divf %220, %221 : vector<8x128xbf16>
    %223 = arith.extf %222 : vector<8x128xbf16> to vector<8x128xf32>
    %224 = arith.mulf %213, %141 : vector<8x128xf32>
    %225 = arith.mulf %206, %216 : vector<8x128xf32>
    %226 = arith.addf %224, %225 : vector<8x128xf32>
    %227 = math.tanh %226 : vector<8x128xf32>
    %228 = arith.mulf %223, %227 : vector<8x128xf32>
    %229 = arith.index_cast %191 : i32 to index
    %c0_62 = arith.constant 0 : index
    %c0_63 = arith.constant 0 : index
    %230 = vector.load %arg13[%229, %c0_62, %c0_63] : memref<8x8x512xbf16, #tpu.memory_space<vmem>>, vector<1x8x512xbf16>
    %231 = vector.shape_cast %230 : vector<1x8x512xbf16> to vector<8x512xbf16>
    %232 = arith.extf %231 : vector<8x512xbf16> to vector<8x512xf32>
    %233 = arith.truncf %180 : vector<8x128xf32> to vector<8x128xbf16>
    %cst_64 = arith.constant dense<0.000000e+00> : vector<8x512xf32>
    %234 = tpu.matmul %233, %19, %cst_64 {dimension_numbers = #tpu.dot_dimension_numbers<[1], [0], [0], [1], [0, 0, 1, 1], [], []>} : vector<8x128xbf16>, vector<128x512xbf16>, vector<8x512xf32> -> vector<8x512xf32>
    %235 = arith.addf %232, %234 : vector<8x512xf32>
    %236 = arith.truncf %235 : vector<8x512xf32> to vector<8x512xbf16>
    %237 = vector.extract_strided_slice %236 {offsets = [0, 0], sizes = [8, 128], strides = [1, 1]} : vector<8x512xbf16> to vector<8x128xbf16>
    %238 = arith.negf %237 : vector<8x128xbf16>
    %239 = math.exp %238 : vector<8x128xbf16>
    %cst_65 = arith.constant 1.000000e+00 : bf16
    %240 = vector.broadcast %cst_65 : bf16 to vector<8x128xbf16>
    %241 = arith.addf %240, %239 : vector<8x128xbf16>
    %242 = arith.divf %240, %241 : vector<8x128xbf16>
    %243 = arith.extf %242 : vector<8x128xbf16> to vector<8x128xf32>
    %244 = vector.extract_strided_slice %236 {offsets = [0, 128], sizes = [8, 128], strides = [1, 1]} : vector<8x512xbf16> to vector<8x128xbf16>
    %245 = arith.negf %244 : vector<8x128xbf16>
    %246 = math.exp %245 : vector<8x128xbf16>
    %cst_66 = arith.constant 1.000000e+00 : bf16
    %247 = vector.broadcast %cst_66 : bf16 to vector<8x128xbf16>
    %248 = arith.addf %247, %246 : vector<8x128xbf16>
    %249 = arith.divf %247, %248 : vector<8x128xbf16>
    %250 = arith.extf %249 : vector<8x128xbf16> to vector<8x128xf32>
    %251 = vector.extract_strided_slice %236 {offsets = [0, 256], sizes = [8, 128], strides = [1, 1]} : vector<8x512xbf16> to vector<8x128xbf16>
    %252 = math.tanh %251 : vector<8x128xbf16>
    %253 = arith.extf %252 : vector<8x128xbf16> to vector<8x128xf32>
    %254 = vector.extract_strided_slice %236 {offsets = [0, 384], sizes = [8, 128], strides = [1, 1]} : vector<8x512xbf16> to vector<8x128xbf16>
    %255 = arith.negf %254 : vector<8x128xbf16>
    %256 = math.exp %255 : vector<8x128xbf16>
    %cst_67 = arith.constant 1.000000e+00 : bf16
    %257 = vector.broadcast %cst_67 : bf16 to vector<8x128xbf16>
    %258 = arith.addf %257, %256 : vector<8x128xbf16>
    %259 = arith.divf %257, %258 : vector<8x128xbf16>
    %260 = arith.extf %259 : vector<8x128xbf16> to vector<8x128xf32>
    %261 = arith.mulf %250, %178 : vector<8x128xf32>
    %262 = arith.mulf %243, %253 : vector<8x128xf32>
    %263 = arith.addf %261, %262 : vector<8x128xf32>
    %264 = math.tanh %263 : vector<8x128xf32>
    %265 = arith.mulf %260, %264 : vector<8x128xf32>
    %266 = arith.truncf %228 : vector<8x128xf32> to vector<8x128xbf16>
    %267 = arith.index_cast %c2_i32 : i32 to index
    %c0_68 = arith.constant 0 : index
    %c0_69 = arith.constant 0 : index
    %268 = vector.load %arg14[%267, %c0_68, %c0_69] : memref<8x8x128xbf16, #tpu.memory_space<vmem>>, vector<1x8x128xbf16>
    %269 = vector.shape_cast %268 : vector<1x8x128xbf16> to vector<8x128xbf16>
    %270 = vector.shape_cast %266 : vector<8x128xbf16> to vector<1x8x128xbf16>
    tpu.vector_store %arg14[%267, %c0_68, %c0_69], %270 {strides = array<i32>} : memref<8x8x128xbf16, #tpu.memory_space<vmem>>, vector<1x8x128xbf16>,
    %271 = arith.truncf %265 : vector<8x128xf32> to vector<8x128xbf16>
    %272 = arith.index_cast %191 : i32 to index
    %c0_70 = arith.constant 0 : index
    %c0_71 = arith.constant 0 : index
    %273 = vector.load %arg15[%272, %c0_70, %c0_71] : memref<8x8x128xbf16, #tpu.memory_space<vmem>>, vector<1x8x128xbf16>
    %274 = vector.shape_cast %273 : vector<1x8x128xbf16> to vector<8x128xbf16>
    %275 = vector.shape_cast %271 : vector<8x128xbf16> to vector<1x8x128xbf16>
    tpu.vector_store %arg15[%272, %c0_70, %c0_71], %275 {strides = array<i32>} : memref<8x8x128xbf16, #tpu.memory_space<vmem>>, vector<1x8x128xbf16>,
    %c3_i32 = arith.constant 3 : i32
    %c7_i32_72 = arith.constant 7 : i32
    %276 = arith.subi %c7_i32_72, %c3_i32 : i32
    %277 = arith.index_cast %c3_i32 : i32 to index
    %c0_73 = arith.constant 0 : index
    %c0_74 = arith.constant 0 : index
    %278 = vector.load %arg12[%277, %c0_73, %c0_74] : memref<8x8x512xbf16, #tpu.memory_space<vmem>>, vector<1x8x512xbf16>
    %279 = vector.shape_cast %278 : vector<1x8x512xbf16> to vector<8x512xbf16>
    %280 = arith.extf %279 : vector<8x512xbf16> to vector<8x512xf32>
    %281 = arith.truncf %228 : vector<8x128xf32> to vector<8x128xbf16>
    %cst_75 = arith.constant dense<0.000000e+00> : vector<8x512xf32>
    %282 = tpu.matmul %281, %18, %cst_75 {dimension_numbers = #tpu.dot_dimension_numbers<[1], [0], [0], [1], [0, 0, 1, 1], [], []>} : vector<8x128xbf16>, vector<128x512xbf16>, vector<8x512xf32> -> vector<8x512xf32>
    %283 = arith.addf %280, %282 : vector<8x512xf32>
    %284 = arith.truncf %283 : vector<8x512xf32> to vector<8x512xbf16>
    %285 = vector.extract_strided_slice %284 {offsets = [0, 0], sizes = [8, 128], strides = [1, 1]} : vector<8x512xbf16> to vector<8x128xbf16>
    %286 = arith.negf %285 : vector<8x128xbf16>
    %287 = math.exp %286 : vector<8x128xbf16>
    %cst_76 = arith.constant 1.000000e+00 : bf16
    %288 = vector.broadcast %cst_76 : bf16 to vector<8x128xbf16>
    %289 = arith.addf %288, %287 : vector<8x128xbf16>
    %290 = arith.divf %288, %289 : vector<8x128xbf16>
    %291 = arith.extf %290 : vector<8x128xbf16> to vector<8x128xf32>
    %292 = vector.extract_strided_slice %284 {offsets = [0, 128], sizes = [8, 128], strides = [1, 1]} : vector<8x512xbf16> to vector<8x128xbf16>
    %293 = arith.negf %292 : vector<8x128xbf16>
    %294 = math.exp %293 : vector<8x128xbf16>
    %cst_77 = arith.constant 1.000000e+00 : bf16
    %295 = vector.broadcast %cst_77 : bf16 to vector<8x128xbf16>
    %296 = arith.addf %295, %294 : vector<8x128xbf16>
    %297 = arith.divf %295, %296 : vector<8x128xbf16>
    %298 = arith.extf %297 : vector<8x128xbf16> to vector<8x128xf32>
    %299 = vector.extract_strided_slice %284 {offsets = [0, 256], sizes = [8, 128], strides = [1, 1]} : vector<8x512xbf16> to vector<8x128xbf16>
    %300 = math.tanh %299 : vector<8x128xbf16>
    %301 = arith.extf %300 : vector<8x128xbf16> to vector<8x128xf32>
    %302 = vector.extract_strided_slice %284 {offsets = [0, 384], sizes = [8, 128], strides = [1, 1]} : vector<8x512xbf16> to vector<8x128xbf16>
    %303 = arith.negf %302 : vector<8x128xbf16>
    %304 = math.exp %303 : vector<8x128xbf16>
    %cst_78 = arith.constant 1.000000e+00 : bf16
    %305 = vector.broadcast %cst_78 : bf16 to vector<8x128xbf16>
    %306 = arith.addf %305, %304 : vector<8x128xbf16>
    %307 = arith.divf %305, %306 : vector<8x128xbf16>
    %308 = arith.extf %307 : vector<8x128xbf16> to vector<8x128xf32>
    %309 = arith.mulf %298, %226 : vector<8x128xf32>
    %310 = arith.mulf %291, %301 : vector<8x128xf32>
    %311 = arith.addf %309, %310 : vector<8x128xf32>
    %312 = math.tanh %311 : vector<8x128xf32>
    %313 = arith.mulf %308, %312 : vector<8x128xf32>
    %314 = arith.index_cast %276 : i32 to index
    %c0_79 = arith.constant 0 : index
    %c0_80 = arith.constant 0 : index
    %315 = vector.load %arg13[%314, %c0_79, %c0_80] : memref<8x8x512xbf16, #tpu.memory_space<vmem>>, vector<1x8x512xbf16>
    %316 = vector.shape_cast %315 : vector<1x8x512xbf16> to vector<8x512xbf16>
    %317 = arith.extf %316 : vector<8x512xbf16> to vector<8x512xf32>
    %318 = arith.truncf %265 : vector<8x128xf32> to vector<8x128xbf16>
    %cst_81 = arith.constant dense<0.000000e+00> : vector<8x512xf32>
    %319 = tpu.matmul %318, %19, %cst_81 {dimension_numbers = #tpu.dot_dimension_numbers<[1], [0], [0], [1], [0, 0, 1, 1], [], []>} : vector<8x128xbf16>, vector<128x512xbf16>, vector<8x512xf32> -> vector<8x512xf32>
    %320 = arith.addf %317, %319 : vector<8x512xf32>
    %321 = arith.truncf %320 : vector<8x512xf32> to vector<8x512xbf16>
    %322 = vector.extract_strided_slice %321 {offsets = [0, 0], sizes = [8, 128], strides = [1, 1]} : vector<8x512xbf16> to vector<8x128xbf16>
    %323 = arith.negf %322 : vector<8x128xbf16>
    %324 = math.exp %323 : vector<8x128xbf16>
    %cst_82 = arith.constant 1.000000e+00 : bf16
    %325 = vector.broadcast %cst_82 : bf16 to vector<8x128xbf16>
    %326 = arith.addf %325, %324 : vector<8x128xbf16>
    %327 = arith.divf %325, %326 : vector<8x128xbf16>
    %328 = arith.extf %327 : vector<8x128xbf16> to vector<8x128xf32>
    %329 = vector.extract_strided_slice %321 {offsets = [0, 128], sizes = [8, 128], strides = [1, 1]} : vector<8x512xbf16> to vector<8x128xbf16>
    %330 = arith.negf %329 : vector<8x128xbf16>
    %331 = math.exp %330 : vector<8x128xbf16>
    %cst_83 = arith.constant 1.000000e+00 : bf16
    %332 = vector.broadcast %cst_83 : bf16 to vector<8x128xbf16>
    %333 = arith.addf %332, %331 : vector<8x128xbf16>
    %334 = arith.divf %332, %333 : vector<8x128xbf16>
    %335 = arith.extf %334 : vector<8x128xbf16> to vector<8x128xf32>
    %336 = vector.extract_strided_slice %321 {offsets = [0, 256], sizes = [8, 128], strides = [1, 1]} : vector<8x512xbf16> to vector<8x128xbf16>
    %337 = math.tanh %336 : vector<8x128xbf16>
    %338 = arith.extf %337 : vector<8x128xbf16> to vector<8x128xf32>
    %339 = vector.extract_strided_slice %321 {offsets = [0, 384], sizes = [8, 128], strides = [1, 1]} : vector<8x512xbf16> to vector<8x128xbf16>
    %340 = arith.negf %339 : vector<8x128xbf16>
    %341 = math.exp %340 : vector<8x128xbf16>
    %cst_84 = arith.constant 1.000000e+00 : bf16
    %342 = vector.broadcast %cst_84 : bf16 to vector<8x128xbf16>
    %343 = arith.addf %342, %341 : vector<8x128xbf16>
    %344 = arith.divf %342, %343 : vector<8x128xbf16>
    %345 = arith.extf %344 : vector<8x128xbf16> to vector<8x128xf32>
    %346 = arith.mulf %335, %263 : vector<8x128xf32>
    %347 = arith.mulf %328, %338 : vector<8x128xf32>
    %348 = arith.addf %346, %347 : vector<8x128xf32>
    %349 = math.tanh %348 : vector<8x128xf32>
    %350 = arith.mulf %345, %349 : vector<8x128xf32>
    %351 = arith.truncf %313 : vector<8x128xf32> to vector<8x128xbf16>
    %352 = arith.index_cast %c3_i32 : i32 to index
    %c0_85 = arith.constant 0 : index
    %c0_86 = arith.constant 0 : index
    %353 = vector.load %arg14[%352, %c0_85, %c0_86] : memref<8x8x128xbf16, #tpu.memory_space<vmem>>, vector<1x8x128xbf16>
    %354 = vector.shape_cast %353 : vector<1x8x128xbf16> to vector<8x128xbf16>
    %355 = vector.shape_cast %351 : vector<8x128xbf16> to vector<1x8x128xbf16>
    tpu.vector_store %arg14[%352, %c0_85, %c0_86], %355 {strides = array<i32>} : memref<8x8x128xbf16, #tpu.memory_space<vmem>>, vector<1x8x128xbf16>,
    %356 = arith.truncf %350 : vector<8x128xf32> to vector<8x128xbf16>
    %357 = arith.index_cast %276 : i32 to index
    %c0_87 = arith.constant 0 : index
    %c0_88 = arith.constant 0 : index
    %358 = vector.load %arg15[%357, %c0_87, %c0_88] : memref<8x8x128xbf16, #tpu.memory_space<vmem>>, vector<1x8x128xbf16>
    %359 = vector.shape_cast %358 : vector<1x8x128xbf16> to vector<8x128xbf16>
    %360 = vector.shape_cast %356 : vector<8x128xbf16> to vector<1x8x128xbf16>
    tpu.vector_store %arg15[%357, %c0_87, %c0_88], %360 {strides = array<i32>} : memref<8x8x128xbf16, #tpu.memory_space<vmem>>, vector<1x8x128xbf16>,
    %c4_i32 = arith.constant 4 : i32
    %c7_i32_89 = arith.constant 7 : i32
    %361 = arith.subi %c7_i32_89, %c4_i32 : i32
    %362 = arith.index_cast %c4_i32 : i32 to index
    %c0_90 = arith.constant 0 : index
    %c0_91 = arith.constant 0 : index
    %363 = vector.load %arg12[%362, %c0_90, %c0_91] : memref<8x8x512xbf16, #tpu.memory_space<vmem>>, vector<1x8x512xbf16>
    %364 = vector.shape_cast %363 : vector<1x8x512xbf16> to vector<8x512xbf16>
    %365 = arith.extf %364 : vector<8x512xbf16> to vector<8x512xf32>
    %366 = arith.truncf %313 : vector<8x128xf32> to vector<8x128xbf16>
    %cst_92 = arith.constant dense<0.000000e+00> : vector<8x512xf32>
    %367 = tpu.matmul %366, %18, %cst_92 {dimension_numbers = #tpu.dot_dimension_numbers<[1], [0], [0], [1], [0, 0, 1, 1], [], []>} : vector<8x128xbf16>, vector<128x512xbf16>, vector<8x512xf32> -> vector<8x512xf32>
    %368 = arith.addf %365, %367 : vector<8x512xf32>
    %369 = arith.truncf %368 : vector<8x512xf32> to vector<8x512xbf16>
    %370 = vector.extract_strided_slice %369 {offsets = [0, 0], sizes = [8, 128], strides = [1, 1]} : vector<8x512xbf16> to vector<8x128xbf16>
    %371 = arith.negf %370 : vector<8x128xbf16>
    %372 = math.exp %371 : vector<8x128xbf16>
    %cst_93 = arith.constant 1.000000e+00 : bf16
    %373 = vector.broadcast %cst_93 : bf16 to vector<8x128xbf16>
    %374 = arith.addf %373, %372 : vector<8x128xbf16>
    %375 = arith.divf %373, %374 : vector<8x128xbf16>
    %376 = arith.extf %375 : vector<8x128xbf16> to vector<8x128xf32>
    %377 = vector.extract_strided_slice %369 {offsets = [0, 128], sizes = [8, 128], strides = [1, 1]} : vector<8x512xbf16> to vector<8x128xbf16>
    %378 = arith.negf %377 : vector<8x128xbf16>
    %379 = math.exp %378 : vector<8x128xbf16>
    %cst_94 = arith.constant 1.000000e+00 : bf16
    %380 = vector.broadcast %cst_94 : bf16 to vector<8x128xbf16>
    %381 = arith.addf %380, %379 : vector<8x128xbf16>
    %382 = arith.divf %380, %381 : vector<8x128xbf16>
    %383 = arith.extf %382 : vector<8x128xbf16> to vector<8x128xf32>
    %384 = vector.extract_strided_slice %369 {offsets = [0, 256], sizes = [8, 128], strides = [1, 1]} : vector<8x512xbf16> to vector<8x128xbf16>
    %385 = math.tanh %384 : vector<8x128xbf16>
    %386 = arith.extf %385 : vector<8x128xbf16> to vector<8x128xf32>
    %387 = vector.extract_strided_slice %369 {offsets = [0, 384], sizes = [8, 128], strides = [1, 1]} : vector<8x512xbf16> to vector<8x128xbf16>
    %388 = arith.negf %387 : vector<8x128xbf16>
    %389 = math.exp %388 : vector<8x128xbf16>
    %cst_95 = arith.constant 1.000000e+00 : bf16
    %390 = vector.broadcast %cst_95 : bf16 to vector<8x128xbf16>
    %391 = arith.addf %390, %389 : vector<8x128xbf16>
    %392 = arith.divf %390, %391 : vector<8x128xbf16>
    %393 = arith.extf %392 : vector<8x128xbf16> to vector<8x128xf32>
    %394 = arith.mulf %383, %311 : vector<8x128xf32>
    %395 = arith.mulf %376, %386 : vector<8x128xf32>
    %396 = arith.addf %394, %395 : vector<8x128xf32>
    %397 = math.tanh %396 : vector<8x128xf32>
    %398 = arith.mulf %393, %397 : vector<8x128xf32>
    %399 = arith.index_cast %361 : i32 to index
    %c0_96 = arith.constant 0 : index
    %c0_97 = arith.constant 0 : index
    %400 = vector.load %arg13[%399, %c0_96, %c0_97] : memref<8x8x512xbf16, #tpu.memory_space<vmem>>, vector<1x8x512xbf16>
    %401 = vector.shape_cast %400 : vector<1x8x512xbf16> to vector<8x512xbf16>
    %402 = arith.extf %401 : vector<8x512xbf16> to vector<8x512xf32>
    %403 = arith.truncf %350 : vector<8x128xf32> to vector<8x128xbf16>
    %cst_98 = arith.constant dense<0.000000e+00> : vector<8x512xf32>
    %404 = tpu.matmul %403, %19, %cst_98 {dimension_numbers = #tpu.dot_dimension_numbers<[1], [0], [0], [1], [0, 0, 1, 1], [], []>} : vector<8x128xbf16>, vector<128x512xbf16>, vector<8x512xf32> -> vector<8x512xf32>
    %405 = arith.addf %402, %404 : vector<8x512xf32>
    %406 = arith.truncf %405 : vector<8x512xf32> to vector<8x512xbf16>
    %407 = vector.extract_strided_slice %406 {offsets = [0, 0], sizes = [8, 128], strides = [1, 1]} : vector<8x512xbf16> to vector<8x128xbf16>
    %408 = arith.negf %407 : vector<8x128xbf16>
    %409 = math.exp %408 : vector<8x128xbf16>
    %cst_99 = arith.constant 1.000000e+00 : bf16
    %410 = vector.broadcast %cst_99 : bf16 to vector<8x128xbf16>
    %411 = arith.addf %410, %409 : vector<8x128xbf16>
    %412 = arith.divf %410, %411 : vector<8x128xbf16>
    %413 = arith.extf %412 : vector<8x128xbf16> to vector<8x128xf32>
    %414 = vector.extract_strided_slice %406 {offsets = [0, 128], sizes = [8, 128], strides = [1, 1]} : vector<8x512xbf16> to vector<8x128xbf16>
    %415 = arith.negf %414 : vector<8x128xbf16>
    %416 = math.exp %415 : vector<8x128xbf16>
    %cst_100 = arith.constant 1.000000e+00 : bf16
    %417 = vector.broadcast %cst_100 : bf16 to vector<8x128xbf16>
    %418 = arith.addf %417, %416 : vector<8x128xbf16>
    %419 = arith.divf %417, %418 : vector<8x128xbf16>
    %420 = arith.extf %419 : vector<8x128xbf16> to vector<8x128xf32>
    %421 = vector.extract_strided_slice %406 {offsets = [0, 256], sizes = [8, 128], strides = [1, 1]} : vector<8x512xbf16> to vector<8x128xbf16>
    %422 = math.tanh %421 : vector<8x128xbf16>
    %423 = arith.extf %422 : vector<8x128xbf16> to vector<8x128xf32>
    %424 = vector.extract_strided_slice %406 {offsets = [0, 384], sizes = [8, 128], strides = [1, 1]} : vector<8x512xbf16> to vector<8x128xbf16>
    %425 = arith.negf %424 : vector<8x128xbf16>
    %426 = math.exp %425 : vector<8x128xbf16>
    %cst_101 = arith.constant 1.000000e+00 : bf16
    %427 = vector.broadcast %cst_101 : bf16 to vector<8x128xbf16>
    %428 = arith.addf %427, %426 : vector<8x128xbf16>
    %429 = arith.divf %427, %428 : vector<8x128xbf16>
    %430 = arith.extf %429 : vector<8x128xbf16> to vector<8x128xf32>
    %431 = arith.mulf %420, %348 : vector<8x128xf32>
    %432 = arith.mulf %413, %423 : vector<8x128xf32>
    %433 = arith.addf %431, %432 : vector<8x128xf32>
    %434 = math.tanh %433 : vector<8x128xf32>
    %435 = arith.mulf %430, %434 : vector<8x128xf32>
    %436 = arith.truncf %398 : vector<8x128xf32> to vector<8x128xbf16>
    %437 = arith.index_cast %c4_i32 : i32 to index
    %c0_102 = arith.constant 0 : index
    %c0_103 = arith.constant 0 : index
    %438 = vector.load %arg14[%437, %c0_102, %c0_103] : memref<8x8x128xbf16, #tpu.memory_space<vmem>>, vector<1x8x128xbf16>
    %439 = vector.shape_cast %438 : vector<1x8x128xbf16> to vector<8x128xbf16>
    %440 = vector.shape_cast %436 : vector<8x128xbf16> to vector<1x8x128xbf16>
    tpu.vector_store %arg14[%437, %c0_102, %c0_103], %440 {strides = array<i32>} : memref<8x8x128xbf16, #tpu.memory_space<vmem>>, vector<1x8x128xbf16>,
    %441 = arith.truncf %435 : vector<8x128xf32> to vector<8x128xbf16>
    %442 = arith.index_cast %361 : i32 to index
    %c0_104 = arith.constant 0 : index
    %c0_105 = arith.constant 0 : index
    %443 = vector.load %arg15[%442, %c0_104, %c0_105] : memref<8x8x128xbf16, #tpu.memory_space<vmem>>, vector<1x8x128xbf16>
    %444 = vector.shape_cast %443 : vector<1x8x128xbf16> to vector<8x128xbf16>
    %445 = vector.shape_cast %441 : vector<8x128xbf16> to vector<1x8x128xbf16>
    tpu.vector_store %arg15[%442, %c0_104, %c0_105], %445 {strides = array<i32>} : memref<8x8x128xbf16, #tpu.memory_space<vmem>>, vector<1x8x128xbf16>,
    %c5_i32 = arith.constant 5 : i32
    %c7_i32_106 = arith.constant 7 : i32
    %446 = arith.subi %c7_i32_106, %c5_i32 : i32
    %447 = arith.index_cast %c5_i32 : i32 to index
    %c0_107 = arith.constant 0 : index
    %c0_108 = arith.constant 0 : index
    %448 = vector.load %arg12[%447, %c0_107, %c0_108] : memref<8x8x512xbf16, #tpu.memory_space<vmem>>, vector<1x8x512xbf16>
    %449 = vector.shape_cast %448 : vector<1x8x512xbf16> to vector<8x512xbf16>
    %450 = arith.extf %449 : vector<8x512xbf16> to vector<8x512xf32>
    %451 = arith.truncf %398 : vector<8x128xf32> to vector<8x128xbf16>
    %cst_109 = arith.constant dense<0.000000e+00> : vector<8x512xf32>
    %452 = tpu.matmul %451, %18, %cst_109 {dimension_numbers = #tpu.dot_dimension_numbers<[1], [0], [0], [1], [0, 0, 1, 1], [], []>} : vector<8x128xbf16>, vector<128x512xbf16>, vector<8x512xf32> -> vector<8x512xf32>
    %453 = arith.addf %450, %452 : vector<8x512xf32>
    %454 = arith.truncf %453 : vector<8x512xf32> to vector<8x512xbf16>
    %455 = vector.extract_strided_slice %454 {offsets = [0, 0], sizes = [8, 128], strides = [1, 1]} : vector<8x512xbf16> to vector<8x128xbf16>
    %456 = arith.negf %455 : vector<8x128xbf16>
    %457 = math.exp %456 : vector<8x128xbf16>
    %cst_110 = arith.constant 1.000000e+00 : bf16
    %458 = vector.broadcast %cst_110 : bf16 to vector<8x128xbf16>
    %459 = arith.addf %458, %457 : vector<8x128xbf16>
    %460 = arith.divf %458, %459 : vector<8x128xbf16>
    %461 = arith.extf %460 : vector<8x128xbf16> to vector<8x128xf32>
    %462 = vector.extract_strided_slice %454 {offsets = [0, 128], sizes = [8, 128], strides = [1, 1]} : vector<8x512xbf16> to vector<8x128xbf16>
    %463 = arith.negf %462 : vector<8x128xbf16>
    %464 = math.exp %463 : vector<8x128xbf16>
    %cst_111 = arith.constant 1.000000e+00 : bf16
    %465 = vector.broadcast %cst_111 : bf16 to vector<8x128xbf16>
    %466 = arith.addf %465, %464 : vector<8x128xbf16>
    %467 = arith.divf %465, %466 : vector<8x128xbf16>
    %468 = arith.extf %467 : vector<8x128xbf16> to vector<8x128xf32>
    %469 = vector.extract_strided_slice %454 {offsets = [0, 256], sizes = [8, 128], strides = [1, 1]} : vector<8x512xbf16> to vector<8x128xbf16>
    %470 = math.tanh %469 : vector<8x128xbf16>
    %471 = arith.extf %470 : vector<8x128xbf16> to vector<8x128xf32>
    %472 = vector.extract_strided_slice %454 {offsets = [0, 384], sizes = [8, 128], strides = [1, 1]} : vector<8x512xbf16> to vector<8x128xbf16>
    %473 = arith.negf %472 : vector<8x128xbf16>
    %474 = math.exp %473 : vector<8x128xbf16>
    %cst_112 = arith.constant 1.000000e+00 : bf16
    %475 = vector.broadcast %cst_112 : bf16 to vector<8x128xbf16>
    %476 = arith.addf %475, %474 : vector<8x128xbf16>
    %477 = arith.divf %475, %476 : vector<8x128xbf16>
    %478 = arith.extf %477 : vector<8x128xbf16> to vector<8x128xf32>
    %479 = arith.mulf %468, %396 : vector<8x128xf32>
    %480 = arith.mulf %461, %471 : vector<8x128xf32>
    %481 = arith.addf %479, %480 : vector<8x128xf32>
    %482 = math.tanh %481 : vector<8x128xf32>
    %483 = arith.mulf %478, %482 : vector<8x128xf32>
    %484 = arith.index_cast %446 : i32 to index
    %c0_113 = arith.constant 0 : index
    %c0_114 = arith.constant 0 : index
    %485 = vector.load %arg13[%484, %c0_113, %c0_114] : memref<8x8x512xbf16, #tpu.memory_space<vmem>>, vector<1x8x512xbf16>
    %486 = vector.shape_cast %485 : vector<1x8x512xbf16> to vector<8x512xbf16>
    %487 = arith.extf %486 : vector<8x512xbf16> to vector<8x512xf32>
    %488 = arith.truncf %435 : vector<8x128xf32> to vector<8x128xbf16>
    %cst_115 = arith.constant dense<0.000000e+00> : vector<8x512xf32>
    %489 = tpu.matmul %488, %19, %cst_115 {dimension_numbers = #tpu.dot_dimension_numbers<[1], [0], [0], [1], [0, 0, 1, 1], [], []>} : vector<8x128xbf16>, vector<128x512xbf16>, vector<8x512xf32> -> vector<8x512xf32>
    %490 = arith.addf %487, %489 : vector<8x512xf32>
    %491 = arith.truncf %490 : vector<8x512xf32> to vector<8x512xbf16>
    %492 = vector.extract_strided_slice %491 {offsets = [0, 0], sizes = [8, 128], strides = [1, 1]} : vector<8x512xbf16> to vector<8x128xbf16>
    %493 = arith.negf %492 : vector<8x128xbf16>
    %494 = math.exp %493 : vector<8x128xbf16>
    %cst_116 = arith.constant 1.000000e+00 : bf16
    %495 = vector.broadcast %cst_116 : bf16 to vector<8x128xbf16>
    %496 = arith.addf %495, %494 : vector<8x128xbf16>
    %497 = arith.divf %495, %496 : vector<8x128xbf16>
    %498 = arith.extf %497 : vector<8x128xbf16> to vector<8x128xf32>
    %499 = vector.extract_strided_slice %491 {offsets = [0, 128], sizes = [8, 128], strides = [1, 1]} : vector<8x512xbf16> to vector<8x128xbf16>
    %500 = arith.negf %499 : vector<8x128xbf16>
    %501 = math.exp %500 : vector<8x128xbf16>
    %cst_117 = arith.constant 1.000000e+00 : bf16
    %502 = vector.broadcast %cst_117 : bf16 to vector<8x128xbf16>
    %503 = arith.addf %502, %501 : vector<8x128xbf16>
    %504 = arith.divf %502, %503 : vector<8x128xbf16>
    %505 = arith.extf %504 : vector<8x128xbf16> to vector<8x128xf32>
    %506 = vector.extract_strided_slice %491 {offsets = [0, 256], sizes = [8, 128], strides = [1, 1]} : vector<8x512xbf16> to vector<8x128xbf16>
    %507 = math.tanh %506 : vector<8x128xbf16>
    %508 = arith.extf %507 : vector<8x128xbf16> to vector<8x128xf32>
    %509 = vector.extract_strided_slice %491 {offsets = [0, 384], sizes = [8, 128], strides = [1, 1]} : vector<8x512xbf16> to vector<8x128xbf16>
    %510 = arith.negf %509 : vector<8x128xbf16>
    %511 = math.exp %510 : vector<8x128xbf16>
    %cst_118 = arith.constant 1.000000e+00 : bf16
    %512 = vector.broadcast %cst_118 : bf16 to vector<8x128xbf16>
    %513 = arith.addf %512, %511 : vector<8x128xbf16>
    %514 = arith.divf %512, %513 : vector<8x128xbf16>
    %515 = arith.extf %514 : vector<8x128xbf16> to vector<8x128xf32>
    %516 = arith.mulf %505, %433 : vector<8x128xf32>
    %517 = arith.mulf %498, %508 : vector<8x128xf32>
    %518 = arith.addf %516, %517 : vector<8x128xf32>
    %519 = math.tanh %518 : vector<8x128xf32>
    %520 = arith.mulf %515, %519 : vector<8x128xf32>
    %521 = arith.truncf %483 : vector<8x128xf32> to vector<8x128xbf16>
    %522 = arith.index_cast %c5_i32 : i32 to index
    %c0_119 = arith.constant 0 : index
    %c0_120 = arith.constant 0 : index
    %523 = vector.load %arg14[%522, %c0_119, %c0_120] : memref<8x8x128xbf16, #tpu.memory_space<vmem>>, vector<1x8x128xbf16>
    %524 = vector.shape_cast %523 : vector<1x8x128xbf16> to vector<8x128xbf16>
    %525 = vector.shape_cast %521 : vector<8x128xbf16> to vector<1x8x128xbf16>
    tpu.vector_store %arg14[%522, %c0_119, %c0_120], %525 {strides = array<i32>} : memref<8x8x128xbf16, #tpu.memory_space<vmem>>, vector<1x8x128xbf16>,
    %526 = arith.truncf %520 : vector<8x128xf32> to vector<8x128xbf16>
    %527 = arith.index_cast %446 : i32 to index
    %c0_121 = arith.constant 0 : index
    %c0_122 = arith.constant 0 : index
    %528 = vector.load %arg15[%527, %c0_121, %c0_122] : memref<8x8x128xbf16, #tpu.memory_space<vmem>>, vector<1x8x128xbf16>
    %529 = vector.shape_cast %528 : vector<1x8x128xbf16> to vector<8x128xbf16>
    %530 = vector.shape_cast %526 : vector<8x128xbf16> to vector<1x8x128xbf16>
    tpu.vector_store %arg15[%527, %c0_121, %c0_122], %530 {strides = array<i32>} : memref<8x8x128xbf16, #tpu.memory_space<vmem>>, vector<1x8x128xbf16>,
    %c6_i32 = arith.constant 6 : i32
    %c7_i32_123 = arith.constant 7 : i32
    %531 = arith.subi %c7_i32_123, %c6_i32 : i32
    %532 = arith.index_cast %c6_i32 : i32 to index
    %c0_124 = arith.constant 0 : index
    %c0_125 = arith.constant 0 : index
    %533 = vector.load %arg12[%532, %c0_124, %c0_125] : memref<8x8x512xbf16, #tpu.memory_space<vmem>>, vector<1x8x512xbf16>
    %534 = vector.shape_cast %533 : vector<1x8x512xbf16> to vector<8x512xbf16>
    %535 = arith.extf %534 : vector<8x512xbf16> to vector<8x512xf32>
    %536 = arith.truncf %483 : vector<8x128xf32> to vector<8x128xbf16>
    %cst_126 = arith.constant dense<0.000000e+00> : vector<8x512xf32>
    %537 = tpu.matmul %536, %18, %cst_126 {dimension_numbers = #tpu.dot_dimension_numbers<[1], [0], [0], [1], [0, 0, 1, 1], [], []>} : vector<8x128xbf16>, vector<128x512xbf16>, vector<8x512xf32> -> vector<8x512xf32>
    %538 = arith.addf %535, %537 : vector<8x512xf32>
    %539 = arith.truncf %538 : vector<8x512xf32> to vector<8x512xbf16>
    %540 = vector.extract_strided_slice %539 {offsets = [0, 0], sizes = [8, 128], strides = [1, 1]} : vector<8x512xbf16> to vector<8x128xbf16>
    %541 = arith.negf %540 : vector<8x128xbf16>
    %542 = math.exp %541 : vector<8x128xbf16>
    %cst_127 = arith.constant 1.000000e+00 : bf16
    %543 = vector.broadcast %cst_127 : bf16 to vector<8x128xbf16>
    %544 = arith.addf %543, %542 : vector<8x128xbf16>
    %545 = arith.divf %543, %544 : vector<8x128xbf16>
    %546 = arith.extf %545 : vector<8x128xbf16> to vector<8x128xf32>
    %547 = vector.extract_strided_slice %539 {offsets = [0, 128], sizes = [8, 128], strides = [1, 1]} : vector<8x512xbf16> to vector<8x128xbf16>
    %548 = arith.negf %547 : vector<8x128xbf16>
    %549 = math.exp %548 : vector<8x128xbf16>
    %cst_128 = arith.constant 1.000000e+00 : bf16
    %550 = vector.broadcast %cst_128 : bf16 to vector<8x128xbf16>
    %551 = arith.addf %550, %549 : vector<8x128xbf16>
    %552 = arith.divf %550, %551 : vector<8x128xbf16>
    %553 = arith.extf %552 : vector<8x128xbf16> to vector<8x128xf32>
    %554 = vector.extract_strided_slice %539 {offsets = [0, 256], sizes = [8, 128], strides = [1, 1]} : vector<8x512xbf16> to vector<8x128xbf16>
    %555 = math.tanh %554 : vector<8x128xbf16>
    %556 = arith.extf %555 : vector<8x128xbf16> to vector<8x128xf32>
    %557 = vector.extract_strided_slice %539 {offsets = [0, 384], sizes = [8, 128], strides = [1, 1]} : vector<8x512xbf16> to vector<8x128xbf16>
    %558 = arith.negf %557 : vector<8x128xbf16>
    %559 = math.exp %558 : vector<8x128xbf16>
    %cst_129 = arith.constant 1.000000e+00 : bf16
    %560 = vector.broadcast %cst_129 : bf16 to vector<8x128xbf16>
    %561 = arith.addf %560, %559 : vector<8x128xbf16>
    %562 = arith.divf %560, %561 : vector<8x128xbf16>
    %563 = arith.extf %562 : vector<8x128xbf16> to vector<8x128xf32>
    %564 = arith.mulf %553, %481 : vector<8x128xf32>
    %565 = arith.mulf %546, %556 : vector<8x128xf32>
    %566 = arith.addf %564, %565 : vector<8x128xf32>
    %567 = math.tanh %566 : vector<8x128xf32>
    %568 = arith.mulf %563, %567 : vector<8x128xf32>
    %569 = arith.index_cast %531 : i32 to index
    %c0_130 = arith.constant 0 : index
    %c0_131 = arith.constant 0 : index
    %570 = vector.load %arg13[%569, %c0_130, %c0_131] : memref<8x8x512xbf16, #tpu.memory_space<vmem>>, vector<1x8x512xbf16>
    %571 = vector.shape_cast %570 : vector<1x8x512xbf16> to vector<8x512xbf16>
    %572 = arith.extf %571 : vector<8x512xbf16> to vector<8x512xf32>
    %573 = arith.truncf %520 : vector<8x128xf32> to vector<8x128xbf16>
    %cst_132 = arith.constant dense<0.000000e+00> : vector<8x512xf32>
    %574 = tpu.matmul %573, %19, %cst_132 {dimension_numbers = #tpu.dot_dimension_numbers<[1], [0], [0], [1], [0, 0, 1, 1], [], []>} : vector<8x128xbf16>, vector<128x512xbf16>, vector<8x512xf32> -> vector<8x512xf32>
    %575 = arith.addf %572, %574 : vector<8x512xf32>
    %576 = arith.truncf %575 : vector<8x512xf32> to vector<8x512xbf16>
    %577 = vector.extract_strided_slice %576 {offsets = [0, 0], sizes = [8, 128], strides = [1, 1]} : vector<8x512xbf16> to vector<8x128xbf16>
    %578 = arith.negf %577 : vector<8x128xbf16>
    %579 = math.exp %578 : vector<8x128xbf16>
    %cst_133 = arith.constant 1.000000e+00 : bf16
    %580 = vector.broadcast %cst_133 : bf16 to vector<8x128xbf16>
    %581 = arith.addf %580, %579 : vector<8x128xbf16>
    %582 = arith.divf %580, %581 : vector<8x128xbf16>
    %583 = arith.extf %582 : vector<8x128xbf16> to vector<8x128xf32>
    %584 = vector.extract_strided_slice %576 {offsets = [0, 128], sizes = [8, 128], strides = [1, 1]} : vector<8x512xbf16> to vector<8x128xbf16>
    %585 = arith.negf %584 : vector<8x128xbf16>
    %586 = math.exp %585 : vector<8x128xbf16>
    %cst_134 = arith.constant 1.000000e+00 : bf16
    %587 = vector.broadcast %cst_134 : bf16 to vector<8x128xbf16>
    %588 = arith.addf %587, %586 : vector<8x128xbf16>
    %589 = arith.divf %587, %588 : vector<8x128xbf16>
    %590 = arith.extf %589 : vector<8x128xbf16> to vector<8x128xf32>
    %591 = vector.extract_strided_slice %576 {offsets = [0, 256], sizes = [8, 128], strides = [1, 1]} : vector<8x512xbf16> to vector<8x128xbf16>
    %592 = math.tanh %591 : vector<8x128xbf16>
    %593 = arith.extf %592 : vector<8x128xbf16> to vector<8x128xf32>
    %594 = vector.extract_strided_slice %576 {offsets = [0, 384], sizes = [8, 128], strides = [1, 1]} : vector<8x512xbf16> to vector<8x128xbf16>
    %595 = arith.negf %594 : vector<8x128xbf16>
    %596 = math.exp %595 : vector<8x128xbf16>
    %cst_135 = arith.constant 1.000000e+00 : bf16
    %597 = vector.broadcast %cst_135 : bf16 to vector<8x128xbf16>
    %598 = arith.addf %597, %596 : vector<8x128xbf16>
    %599 = arith.divf %597, %598 : vector<8x128xbf16>
    %600 = arith.extf %599 : vector<8x128xbf16> to vector<8x128xf32>
    %601 = arith.mulf %590, %518 : vector<8x128xf32>
    %602 = arith.mulf %583, %593 : vector<8x128xf32>
    %603 = arith.addf %601, %602 : vector<8x128xf32>
    %604 = math.tanh %603 : vector<8x128xf32>
    %605 = arith.mulf %600, %604 : vector<8x128xf32>
    %606 = arith.truncf %568 : vector<8x128xf32> to vector<8x128xbf16>
    %607 = arith.index_cast %c6_i32 : i32 to index
    %c0_136 = arith.constant 0 : index
    %c0_137 = arith.constant 0 : index
    %608 = vector.load %arg14[%607, %c0_136, %c0_137] : memref<8x8x128xbf16, #tpu.memory_space<vmem>>, vector<1x8x128xbf16>
    %609 = vector.shape_cast %608 : vector<1x8x128xbf16> to vector<8x128xbf16>
    %610 = vector.shape_cast %606 : vector<8x128xbf16> to vector<1x8x128xbf16>
    tpu.vector_store %arg14[%607, %c0_136, %c0_137], %610 {strides = array<i32>} : memref<8x8x128xbf16, #tpu.memory_space<vmem>>, vector<1x8x128xbf16>,
    %611 = arith.truncf %605 : vector<8x128xf32> to vector<8x128xbf16>
    %612 = arith.index_cast %531 : i32 to index
    %c0_138 = arith.constant 0 : index
    %c0_139 = arith.constant 0 : index
    %613 = vector.load %arg15[%612, %c0_138, %c0_139] : memref<8x8x128xbf16, #tpu.memory_space<vmem>>, vector<1x8x128xbf16>
    %614 = vector.shape_cast %613 : vector<1x8x128xbf16> to vector<8x128xbf16>
    %615 = vector.shape_cast %611 : vector<8x128xbf16> to vector<1x8x128xbf16>
    tpu.vector_store %arg15[%612, %c0_138, %c0_139], %615 {strides = array<i32>} : memref<8x8x128xbf16, #tpu.memory_space<vmem>>, vector<1x8x128xbf16>,
    %c7_i32_140 = arith.constant 7 : i32
    %c7_i32_141 = arith.constant 7 : i32
    %616 = arith.subi %c7_i32_141, %c7_i32_140 : i32
    %617 = arith.index_cast %c7_i32_140 : i32 to index
    %c0_142 = arith.constant 0 : index
    %c0_143 = arith.constant 0 : index
    %618 = vector.load %arg12[%617, %c0_142, %c0_143] : memref<8x8x512xbf16, #tpu.memory_space<vmem>>, vector<1x8x512xbf16>
    %619 = vector.shape_cast %618 : vector<1x8x512xbf16> to vector<8x512xbf16>
    %620 = arith.extf %619 : vector<8x512xbf16> to vector<8x512xf32>
    %621 = arith.truncf %568 : vector<8x128xf32> to vector<8x128xbf16>
    %cst_144 = arith.constant dense<0.000000e+00> : vector<8x512xf32>
    %622 = tpu.matmul %621, %18, %cst_144 {dimension_numbers = #tpu.dot_dimension_numbers<[1], [0], [0], [1], [0, 0, 1, 1], [], []>} : vector<8x128xbf16>, vector<128x512xbf16>, vector<8x512xf32> -> vector<8x512xf32>
    %623 = arith.addf %620, %622 : vector<8x512xf32>
    %624 = arith.truncf %623 : vector<8x512xf32> to vector<8x512xbf16>
    %625 = vector.extract_strided_slice %624 {offsets = [0, 0], sizes = [8, 128], strides = [1, 1]} : vector<8x512xbf16> to vector<8x128xbf16>
    %626 = arith.negf %625 : vector<8x128xbf16>
    %627 = math.exp %626 : vector<8x128xbf16>
    %cst_145 = arith.constant 1.000000e+00 : bf16
    %628 = vector.broadcast %cst_145 : bf16 to vector<8x128xbf16>
    %629 = arith.addf %628, %627 : vector<8x128xbf16>
    %630 = arith.divf %628, %629 : vector<8x128xbf16>
    %631 = arith.extf %630 : vector<8x128xbf16> to vector<8x128xf32>
    %632 = vector.extract_strided_slice %624 {offsets = [0, 128], sizes = [8, 128], strides = [1, 1]} : vector<8x512xbf16> to vector<8x128xbf16>
    %633 = arith.negf %632 : vector<8x128xbf16>
    %634 = math.exp %633 : vector<8x128xbf16>
    %cst_146 = arith.constant 1.000000e+00 : bf16
    %635 = vector.broadcast %cst_146 : bf16 to vector<8x128xbf16>
    %636 = arith.addf %635, %634 : vector<8x128xbf16>
    %637 = arith.divf %635, %636 : vector<8x128xbf16>
    %638 = arith.extf %637 : vector<8x128xbf16> to vector<8x128xf32>
    %639 = vector.extract_strided_slice %624 {offsets = [0, 256], sizes = [8, 128], strides = [1, 1]} : vector<8x512xbf16> to vector<8x128xbf16>
    %640 = math.tanh %639 : vector<8x128xbf16>
    %641 = arith.extf %640 : vector<8x128xbf16> to vector<8x128xf32>
    %642 = vector.extract_strided_slice %624 {offsets = [0, 384], sizes = [8, 128], strides = [1, 1]} : vector<8x512xbf16> to vector<8x128xbf16>
    %643 = arith.negf %642 : vector<8x128xbf16>
    %644 = math.exp %643 : vector<8x128xbf16>
    %cst_147 = arith.constant 1.000000e+00 : bf16
    %645 = vector.broadcast %cst_147 : bf16 to vector<8x128xbf16>
    %646 = arith.addf %645, %644 : vector<8x128xbf16>
    %647 = arith.divf %645, %646 : vector<8x128xbf16>
    %648 = arith.extf %647 : vector<8x128xbf16> to vector<8x128xf32>
    %649 = arith.mulf %638, %566 : vector<8x128xf32>
    %650 = arith.mulf %631, %641 : vector<8x128xf32>
    %651 = arith.addf %649, %650 : vector<8x128xf32>
    %652 = math.tanh %651 : vector<8x128xf32>
    %653 = arith.mulf %648, %652 : vector<8x128xf32>
    %654 = arith.index_cast %616 : i32 to index
    %c0_148 = arith.constant 0 : index
    %c0_149 = arith.constant 0 : index
    %655 = vector.load %arg13[%654, %c0_148, %c0_149] : memref<8x8x512xbf16, #tpu.memory_space<vmem>>, vector<1x8x512xbf16>
    %656 = vector.shape_cast %655 : vector<1x8x512xbf16> to vector<8x512xbf16>
    %657 = arith.extf %656 : vector<8x512xbf16> to vector<8x512xf32>
    %658 = arith.truncf %605 : vector<8x128xf32> to vector<8x128xbf16>
    %cst_150 = arith.constant dense<0.000000e+00> : vector<8x512xf32>
    %659 = tpu.matmul %658, %19, %cst_150 {dimension_numbers = #tpu.dot_dimension_numbers<[1], [0], [0], [1], [0, 0, 1, 1], [], []>} : vector<8x128xbf16>, vector<128x512xbf16>, vector<8x512xf32> -> vector<8x512xf32>
    %660 = arith.addf %657, %659 : vector<8x512xf32>
    %661 = arith.truncf %660 : vector<8x512xf32> to vector<8x512xbf16>
    %662 = vector.extract_strided_slice %661 {offsets = [0, 0], sizes = [8, 128], strides = [1, 1]} : vector<8x512xbf16> to vector<8x128xbf16>
    %663 = arith.negf %662 : vector<8x128xbf16>
    %664 = math.exp %663 : vector<8x128xbf16>
    %cst_151 = arith.constant 1.000000e+00 : bf16
    %665 = vector.broadcast %cst_151 : bf16 to vector<8x128xbf16>
    %666 = arith.addf %665, %664 : vector<8x128xbf16>
    %667 = arith.divf %665, %666 : vector<8x128xbf16>
    %668 = arith.extf %667 : vector<8x128xbf16> to vector<8x128xf32>
    %669 = vector.extract_strided_slice %661 {offsets = [0, 128], sizes = [8, 128], strides = [1, 1]} : vector<8x512xbf16> to vector<8x128xbf16>
    %670 = arith.negf %669 : vector<8x128xbf16>
    %671 = math.exp %670 : vector<8x128xbf16>
    %cst_152 = arith.constant 1.000000e+00 : bf16
    %672 = vector.broadcast %cst_152 : bf16 to vector<8x128xbf16>
    %673 = arith.addf %672, %671 : vector<8x128xbf16>
    %674 = arith.divf %672, %673 : vector<8x128xbf16>
    %675 = arith.extf %674 : vector<8x128xbf16> to vector<8x128xf32>
    %676 = vector.extract_strided_slice %661 {offsets = [0, 256], sizes = [8, 128], strides = [1, 1]} : vector<8x512xbf16> to vector<8x128xbf16>
    %677 = math.tanh %676 : vector<8x128xbf16>
    %678 = arith.extf %677 : vector<8x128xbf16> to vector<8x128xf32>
    %679 = vector.extract_strided_slice %661 {offsets = [0, 384], sizes = [8, 128], strides = [1, 1]} : vector<8x512xbf16> to vector<8x128xbf16>
    %680 = arith.negf %679 : vector<8x128xbf16>
    %681 = math.exp %680 : vector<8x128xbf16>
    %cst_153 = arith.constant 1.000000e+00 : bf16
    %682 = vector.broadcast %cst_153 : bf16 to vector<8x128xbf16>
    %683 = arith.addf %682, %681 : vector<8x128xbf16>
    %684 = arith.divf %682, %683 : vector<8x128xbf16>
    %685 = arith.extf %684 : vector<8x128xbf16> to vector<8x128xf32>
    %686 = arith.mulf %675, %603 : vector<8x128xf32>
    %687 = arith.mulf %668, %678 : vector<8x128xf32>
    %688 = arith.addf %686, %687 : vector<8x128xf32>
    %689 = math.tanh %688 : vector<8x128xf32>
    %690 = arith.mulf %685, %689 : vector<8x128xf32>
    %691 = arith.truncf %653 : vector<8x128xf32> to vector<8x128xbf16>
    %692 = arith.index_cast %c7_i32_140 : i32 to index
    %c0_154 = arith.constant 0 : index
    %c0_155 = arith.constant 0 : index
    %693 = vector.load %arg14[%692, %c0_154, %c0_155] : memref<8x8x128xbf16, #tpu.memory_space<vmem>>, vector<1x8x128xbf16>
    %694 = vector.shape_cast %693 : vector<1x8x128xbf16> to vector<8x128xbf16>
    %695 = vector.shape_cast %691 : vector<8x128xbf16> to vector<1x8x128xbf16>
    tpu.vector_store %arg14[%692, %c0_154, %c0_155], %695 {strides = array<i32>} : memref<8x8x128xbf16, #tpu.memory_space<vmem>>, vector<1x8x128xbf16>,
    %696 = arith.truncf %690 : vector<8x128xf32> to vector<8x128xbf16>
    %697 = arith.index_cast %616 : i32 to index
    %c0_156 = arith.constant 0 : index
    %c0_157 = arith.constant 0 : index
    %698 = vector.load %arg15[%697, %c0_156, %c0_157] : memref<8x8x128xbf16, #tpu.memory_space<vmem>>, vector<1x8x128xbf16>
    %699 = vector.shape_cast %698 : vector<1x8x128xbf16> to vector<8x128xbf16>
    %700 = vector.shape_cast %696 : vector<8x128xbf16> to vector<1x8x128xbf16>
    tpu.vector_store %arg15[%697, %c0_156, %c0_157], %700 {strides = array<i32>} : memref<8x8x128xbf16, #tpu.memory_space<vmem>>, vector<1x8x128xbf16>,
    %c8_i32 = arith.constant 8 : i32
    %c0_158 = arith.constant 0 : index
    %c0_159 = arith.constant 0 : index
    %c0_160 = arith.constant 0 : index
    %701 = vector.load %arg14[%c0_158, %c0_159, %c0_160] : memref<8x8x128xbf16, #tpu.memory_space<vmem>>, vector<8x8x128xbf16>
    %702 = vector.shape_cast %701 : vector<8x8x128xbf16> to vector<64x128xbf16>
    %c0_161 = arith.constant 0 : index
    %c0_162 = arith.constant 0 : index
    %c0_163 = arith.constant 0 : index
    %703 = vector.load %arg15[%c0_161, %c0_162, %c0_163] : memref<8x8x128xbf16, #tpu.memory_space<vmem>>, vector<8x8x128xbf16>
    %704 = vector.shape_cast %703 : vector<8x8x128xbf16> to vector<64x128xbf16>
    %c0_164 = arith.constant 0 : index
    %c0_165 = arith.constant 0 : index
    %705 = vector.load %arg8[%c0_164, %c0_165] : memref<128x128xbf16, #tpu.memory_space<vmem>>, vector<128x128xbf16>
    %cst_166 = arith.constant dense<0.000000e+00> : vector<64x128xf32>
    %706 = tpu.matmul %702, %705, %cst_166 {dimension_numbers = #tpu.dot_dimension_numbers<[1], [0], [0], [1], [0, 0, 1, 1], [], []>} : vector<64x128xbf16>, vector<128x128xbf16>, vector<64x128xf32> -> vector<64x128xf32>
    %c0_167 = arith.constant 0 : index
    %c0_168 = arith.constant 0 : index
    %707 = vector.load %arg9[%c0_167, %c0_168] : memref<128x128xbf16, #tpu.memory_space<vmem>>, vector<128x128xbf16>
    %cst_169 = arith.constant dense<0.000000e+00> : vector<64x128xf32>
    %708 = tpu.matmul %704, %707, %cst_169 {dimension_numbers = #tpu.dot_dimension_numbers<[1], [0], [0], [1], [0, 0, 1, 1], [], []>} : vector<64x128xbf16>, vector<128x128xbf16>, vector<64x128xf32> -> vector<64x128xf32>
    %709 = arith.addf %706, %708 : vector<64x128xf32>
    %c0_170 = arith.constant 0 : index
    %c0_171 = arith.constant 0 : index
    %710 = vector.load %arg10[%c0_170, %c0_171] : memref<1x128xf32, #tpu.memory_space<vmem>>, vector<1x128xf32>
    %711 = vector.broadcast %710 : vector<1x128xf32> to vector<64x128xf32>
    %712 = arith.addf %709, %711 : vector<64x128xf32>
    %713 = vector.shape_cast %712 : vector<64x128xf32> to vector<8x8x128xf32>
    %c0_172 = arith.constant 0 : index
    %c0_173 = arith.constant 0 : index
    %c0_174 = arith.constant 0 : index
    %714 = vector.load %arg11[%c0_172, %c0_173, %c0_174] : memref<8x8x128xf32, #tpu.memory_space<vmem>>, vector<8x8x128xf32>
    tpu.vector_store %arg11[%c0_172, %c0_173, %c0_174], %713 {strides = array<i32>} : memref<8x8x128xf32, #tpu.memory_space<vmem>>, vector<8x8x128xf32>,
    return
  }
  func.func @transform_0(%arg0: i32) -> (i32, i32, i32) {
    %c0_i32 = arith.constant 0 : i32
    %c0_i32_0 = arith.constant 0 : i32
    %c0_i32_1 = arith.constant 0 : i32
    return %c0_i32, %arg0, %c0_i32_0 : i32, i32, i32
  }
  func.func @transform_1(%arg0: i32) -> (i32, i32) {
    %c0_i32 = arith.constant 0 : i32
    %c0_i32_0 = arith.constant 0 : i32
    %c0_i32_1 = arith.constant 0 : i32
    return %c0_i32, %c0_i32_0 : i32, i32
  }
  func.func @transform_2(%arg0: i32) -> (i32, i32) {
    %c0_i32 = arith.constant 0 : i32
    %c0_i32_0 = arith.constant 0 : i32
    %c0_i32_1 = arith.constant 0 : i32
    return %c0_i32, %c0_i32_0 : i32, i32
  }
  func.func @transform_3(%arg0: i32) -> (i32, i32) {
    %c0_i32 = arith.constant 0 : i32
    %c0_i32_0 = arith.constant 0 : i32
    %c0_i32_1 = arith.constant 0 : i32
    return %c0_i32, %c0_i32_0 : i32, i32
  }
  func.func @transform_4(%arg0: i32) -> (i32, i32) {
    %c0_i32 = arith.constant 0 : i32
    %c0_i32_0 = arith.constant 0 : i32
    %c0_i32_1 = arith.constant 0 : i32
    return %c0_i32, %c0_i32_0 : i32, i32
  }
  func.func @transform_5(%arg0: i32) -> (i32, i32) {
    %c0_i32 = arith.constant 0 : i32
    %c0_i32_0 = arith.constant 0 : i32
    %c0_i32_1 = arith.constant 0 : i32
    return %c0_i32, %c0_i32_0 : i32, i32
  }
  func.func @transform_6(%arg0: i32) -> (i32, i32) {
    %c0_i32 = arith.constant 0 : i32
    %c0_i32_0 = arith.constant 0 : i32
    %c0_i32_1 = arith.constant 0 : i32
    return %c0_i32, %c0_i32_0 : i32, i32
  }
  func.func @transform_7(%arg0: i32) -> (i32, i32) {
    %c0_i32 = arith.constant 0 : i32
    %c0_i32_0 = arith.constant 0 : i32
    %c0_i32_1 = arith.constant 0 : i32
    return %c0_i32, %c0_i32_0 : i32, i32
  }
  func.func @transform_8(%arg0: i32) -> (i32, i32) {
    %c0_i32 = arith.constant 0 : i32
    %c0_i32_0 = arith.constant 0 : i32
    %c0_i32_1 = arith.constant 0 : i32
    return %c0_i32, %c0_i32_0 : i32, i32
  }
  func.func @transform_9(%arg0: i32) -> (i32, i32) {
    %c0_i32 = arith.constant 0 : i32
    %c0_i32_0 = arith.constant 0 : i32
    %c0_i32_1 = arith.constant 0 : i32
    return %c0_i32, %c0_i32_0 : i32, i32
  }
  func.func @transform_10(%arg0: i32) -> (i32, i32, i32) {
    %c0_i32 = arith.constant 0 : i32
    %c0_i32_0 = arith.constant 0 : i32
    %c0_i32_1 = arith.constant 0 : i32
    return %c0_i32, %arg0, %c0_i32_0 : i32, i32, i32
  }
}

</mosaic_0001>

<bundles_post_ra>
// kernel: bidirectional_lstm.1
= control target key start
LH: loop header
LB: loop body
LE: loop exit
PB: predicated region body
PF: predicated region fallthrough
CT: control target
= control target key end

     0   :  { %v7010_v1 = vmov 0   ;;  %s6999_s1 = inlined_call_operand.vmem [shape: bf16[128,512], index: 1, kind: input, shape index: {}]   ;;  %s7000_s2 = inlined_call_operand.vmem [shape: bf16[128,512], index: 2, kind: input, shape index: {}]   ;;  %s7001_s0 = inlined_call_operand.vmem [shape: bf16[8,8,128], index: 0, kind: input, shape index: {}]   ;;  %s7002_s5 = inlined_call_operand.vmem [shape: bf16[128,512], index: 5, kind: input, shape index: {}]   ;;  %s7003_s6 = inlined_call_operand.vmem [shape: bf16[128,512], index: 6, kind: input, shape index: {}]   ;;  %s7004_s3 = inlined_call_operand.vmem [shape: f32[1,512], index: 3, kind: input, shape index: {}]   ;;  %s7005_s4 = inlined_call_operand.vmem [shape: f32[1,512], index: 4, kind: input, shape index: {}]   ;;  %s7006_s8 = inlined_call_operand.vmem [shape: bf16[128,128], index: 8, kind: input, shape index: {}]   ;;  %s7007_s7 = inlined_call_operand.vmem [shape: bf16[128,128], index: 7, kind: input, shape index: {}]   ;;  %s7008_s9 = inlined_call_operand.vmem [shape: f32[1,128], index: 9, kind: input, shape index: {}]   ;;  %s7009_s10 = inlined_call_operand.vmem [shape: f32[8,8,128], index: 10, kind: output, shape index: {}]  }
   0x1   :  { %v4252_v0 = vld [vmem:[%s6999_s1 + $0x4] ss:$16 sps:$4 sm:$0xff]   ;;  %315 = vmatprep.mubr.bf16.mxu1 %v7010_v1  ;;  %819 = vmatprep.mubr.bf16.mxu0 %v7010_v1  ;;  %v4256_v3 = vld [vmem:[%s6999_s1] ss:$16 sps:$4 sm:$0xff]   ;;  %v4303_v33 = vld [vmem:[%s6999_s1 + $0xc] ss:$16 sps:$4 sm:$0xff]  }
   0x2   :  { %v4254_v2 = vld [vmem:[%s7000_s2 + $0x4] ss:$16 sps:$4 sm:$0xff]   ;;  %283 = vmatprep.subr.bf16.mxu1 %v4252_v0  ;;  %v4257_v4 = vld [vmem:[%s7000_s2] ss:$16 sps:$4 sm:$0xff]   ;;  %v4301_v36 = vld [vmem:[%s6999_s1 + $0x8] ss:$16 sps:$4 sm:$0xff]  }
   0x3   :  { %787 = vmatprep.subr.bf16.mxu0 %v4254_v2  ;;  %v4258_v5 = vld [vmem:[%s6999_s1 + $0x24] ss:$16 sps:$4 sm:$0xff]   ;;  %284 = vmatpush1.bf16.msra.mxu1 %v4256_v3  ;;  %v4262_v7 = vld [vmem:[%s6999_s1 + $0x20] ss:$16 sps:$4 sm:$0xff]   ;;  %v4309_v38 = vld [vmem:[%s6999_s1 + $0x2c] ss:$16 sps:$4 sm:$0xff]  }
   0x4   :  { %788 = vmatpush1.bf16.msra.mxu0 %v4257_v4  ;;  %v4260_v6 = vld [vmem:[%s7000_s2 + $0x24] ss:$16 sps:$4 sm:$0xff]   ;;  %285 = vmatprep.subr.bf16.mxu1 %v4258_v5  ;;  %v4263_v8 = vld [vmem:[%s7000_s2 + $0x20] ss:$16 sps:$4 sm:$0xff]   ;;  %v4307_v40 = vld [vmem:[%s6999_s1 + $0x28] ss:$16 sps:$4 sm:$0xff]  }
   0x5   :  { %789 = vmatprep.subr.bf16.mxu0 %v4260_v6  ;;  %v4264_v9 = vld [vmem:[%s6999_s1 + $0x44] ss:$16 sps:$4 sm:$0xff]   ;;  %v4268_v11 = vld [vmem:[%s6999_s1 + $0x40] ss:$16 sps:$4 sm:$0xff]   ;;  %v4316_v42 = vld [vmem:[%s6999_s1 + $0x4c] ss:$16 sps:$4 sm:$0xff]  }
   0x6   :  { %v4266_v10 = vld [vmem:[%s7000_s2 + $0x44] ss:$16 sps:$4 sm:$0xff]   ;;  %v4269_v12 = vld [vmem:[%s7000_s2 + $0x40] ss:$16 sps:$4 sm:$0xff]   ;;  %v5065_v44 = vld [vmem:[%s7001_s0 + $0x8] sm:$0xff]  }
   0x7   :  { %286 = vmatpush1.bf16.msra.mxu1 %v4262_v7  ;;  %v4270_v13 = vld [vmem:[%s6999_s1 + $0x64] ss:$16 sps:$4 sm:$0xff]   ;;  %v4274_v15 = vld [vmem:[%s6999_s1 + $0x60] ss:$16 sps:$4 sm:$0xff]   ;;  %v4314_v45 = vld [vmem:[%s6999_s1 + $0x48] ss:$16 sps:$4 sm:$0xff]  }
   0x8   :  { %790 = vmatpush1.bf16.msra.mxu0 %v4263_v8  ;;  %287 = vmatprep.subr.bf16.mxu1 %v4264_v9  ;;  %v4272_v14 = vld [vmem:[%s7000_s2 + $0x64] ss:$16 sps:$4 sm:$0xff]   ;;  %v4275_v16 = vld [vmem:[%s7000_s2 + $0x60] ss:$16 sps:$4 sm:$0xff]   ;;  %v4322_v47 = vld [vmem:[%s6999_s1 + $0x6c] ss:$16 sps:$4 sm:$0xff]  }
   0x9   :  { %791 = vmatprep.subr.bf16.mxu0 %v4266_v10  ;;  %v4276_v17 = vld [vmem:[%s6999_s1 + $0x84] ss:$16 sps:$4 sm:$0xff]   ;;  %v4280_v19 = vld [vmem:[%s6999_s1 + $0x80] ss:$16 sps:$4 sm:$0xff]   ;;  %v4320_v49 = vld [vmem:[%s6999_s1 + $0x68] ss:$16 sps:$4 sm:$0xff]  }
   0xa   :  { %v4278_v18 = vld [vmem:[%s7000_s2 + $0x84] ss:$16 sps:$4 sm:$0xff]   ;;  %v4281_v20 = vld [vmem:[%s7000_s2 + $0x80] ss:$16 sps:$4 sm:$0xff]   ;;  %v4329_v51 = vld [vmem:[%s6999_s1 + $0x8c] ss:$16 sps:$4 sm:$0xff]  }
   0xb   :  { %288 = vmatpush1.bf16.msra.mxu1 %v4268_v11  ;;  %v4282_v21 = vld [vmem:[%s6999_s1 + $0xa4] ss:$16 sps:$4 sm:$0xff]   ;;  %v4286_v23 = vld [vmem:[%s6999_s1 + $0xa0] ss:$16 sps:$4 sm:$0xff]   ;;  %v4327_v54 = vld [vmem:[%s6999_s1 + $0x88] ss:$16 sps:$4 sm:$0xff]  }
   0xc   :  { %792 = vmatpush1.bf16.msra.mxu0 %v4269_v12  ;;  %289 = vmatprep.subr.bf16.mxu1 %v4270_v13  ;;  %v4284_v22 = vld [vmem:[%s7000_s2 + $0xa4] ss:$16 sps:$4 sm:$0xff]   ;;  %v4287_v24 = vld [vmem:[%s7000_s2 + $0xa0] ss:$16 sps:$4 sm:$0xff]   ;;  %v4335_v56 = vld [vmem:[%s6999_s1 + $0xac] ss:$16 sps:$4 sm:$0xff]  }
   0xd   :  { %793 = vmatprep.subr.bf16.mxu0 %v4272_v14  ;;  %v4288_v25 = vld [vmem:[%s6999_s1 + $0xc4] ss:$16 sps:$4 sm:$0xff]   ;;  %v4292_v27 = vld [vmem:[%s6999_s1 + $0xc0] ss:$16 sps:$4 sm:$0xff]   ;;  %v4333_v58 = vld [vmem:[%s6999_s1 + $0xa8] ss:$16 sps:$4 sm:$0xff]  }
   0xe   :  { %v4290_v26 = vld [vmem:[%s7000_s2 + $0xc4] ss:$16 sps:$4 sm:$0xff]   ;;  %v4293_v28 = vld [vmem:[%s7000_s2 + $0xc0] ss:$16 sps:$4 sm:$0xff]   ;;  %v4342_v60 = vld [vmem:[%s6999_s1 + $0xcc] ss:$16 sps:$4 sm:$0xff]  }
   0xf   :  { %290 = vmatpush1.bf16.msra.mxu1 %v4274_v15  ;;  %v4294_v29 = vld [vmem:[%s6999_s1 + $0xe4] ss:$16 sps:$4 sm:$0xff]   ;;  %v4298_v31 = vld [vmem:[%s6999_s1 + $0xe0] ss:$16 sps:$4 sm:$0xff]   ;;  %v5155_v62 = vld [vmem:[%s7001_s0 + $0x18] sm:$0xff]  }
  0x10   :  { %794 = vmatpush1.bf16.msra.mxu0 %v4275_v16  ;;  %291 = vmatprep.subr.bf16.mxu1 %v4276_v17  ;;  %v4296_v30 = vld [vmem:[%s7000_s2 + $0xe4] ss:$16 sps:$4 sm:$0xff]   ;;  %v4299_v32 = vld [vmem:[%s7000_s2 + $0xe0] ss:$16 sps:$4 sm:$0xff]   ;;  %v4340_v63 = vld [vmem:[%s6999_s1 + $0xc8] ss:$16 sps:$4 sm:$0xff]  }
  0x11   :  { %795 = vmatprep.subr.bf16.mxu0 %v4278_v18  ;;  %v5016_v34 = vld [vmem:[%s7002_s5 + $0x4] ss:$16 sps:$4 sm:$0xff]   ;;  %v5029_v37 = vld [vmem:[%s7002_s5] ss:$16 sps:$4 sm:$0xff]   ;;  %v4348_v2 = vld [vmem:[%s6999_s1 + $0xec] ss:$16 sps:$4 sm:$0xff]  }
  0x12   :  { %v5021_v35 = vld [vmem:[%s7001_s0] sm:$0xff]   ;;  %v5110_v53 = vld [vmem:[%s7001_s0 + $0x10] sm:$0xff]   ;;  %v4346_v4 = vld [vmem:[%s6999_s1 + $0xe8] ss:$16 sps:$4 sm:$0xff]  }
  0x13   :  { %292 = vmatpush1.bf16.msra.mxu1 %v4280_v19  ;;  %v5038_v39 = vld [vmem:[%s7002_s5 + $0x24] ss:$16 sps:$4 sm:$0xff]   ;;  %v5049_v41 = vld [vmem:[%s7002_s5 + $0x20] ss:$16 sps:$4 sm:$0xff]   ;;  %v4354_v6 = vld [vmem:[%s7000_s2 + $0xc] ss:$16 sps:$4 sm:$0xff]  }
  0x14   :  { %796 = vmatpush1.bf16.msra.mxu0 %v4281_v20  ;;  %293 = vmatprep.subr.bf16.mxu1 %v4282_v21  ;;  %v5058_v43 = vld [vmem:[%s7002_s5 + $0x44] ss:$16 sps:$4 sm:$0xff]   ;;  %v5073_v46 = vld [vmem:[%s7002_s5 + $0x40] ss:$16 sps:$4 sm:$0xff]   ;;  %v4352_v8 = vld [vmem:[%s7000_s2 + $0x8] ss:$16 sps:$4 sm:$0xff]  }
  0x15   :  { %797 = vmatprep.subr.bf16.mxu0 %v4284_v22  ;;  %v5083_v48 = vld [vmem:[%s7002_s5 + $0x64] ss:$16 sps:$4 sm:$0xff]   ;;  %v5093_v50 = vld [vmem:[%s7002_s5 + $0x60] ss:$16 sps:$4 sm:$0xff]   ;;  %v4357_v9 = vld [vmem:[%s7000_s2 + $0x2c] ss:$16 sps:$4 sm:$0xff]  }
  0x16   :  { %v5103_v52 = vld [vmem:[%s7002_s5 + $0x84] ss:$16 sps:$4 sm:$0xff]   ;;  %v5118_v55 = vld [vmem:[%s7002_s5 + $0x80] ss:$16 sps:$4 sm:$0xff]   ;;  %v4355_v12 = vld [vmem:[%s7000_s2 + $0x28] ss:$16 sps:$4 sm:$0xff]  }
  0x17   :  { %294 = vmatpush1.bf16.msra.mxu1 %v4286_v23  ;;  %v5128_v57 = vld [vmem:[%s7002_s5 + $0xa4] ss:$16 sps:$4 sm:$0xff]   ;;  %v5138_v59 = vld [vmem:[%s7002_s5 + $0xa0] ss:$16 sps:$4 sm:$0xff]   ;;  %v4360_v13 = vld [vmem:[%s7000_s2 + $0x4c] ss:$16 sps:$4 sm:$0xff]  }
  0x18   :  { %798 = vmatpush1.bf16.msra.mxu0 %v4287_v24  ;;  %295 = vmatprep.subr.bf16.mxu1 %v4288_v25  ;;  %v5148_v61 = vld [vmem:[%s7002_s5 + $0xc4] ss:$16 sps:$4 sm:$0xff]   ;;  %v5164_v0 = vld [vmem:[%s7002_s5 + $0xc0] ss:$16 sps:$4 sm:$0xff]   ;;  %v4358_v16 = vld [vmem:[%s7000_s2 + $0x48] ss:$16 sps:$4 sm:$0xff]  }
  0x19   :  { %799 = vmatprep.subr.bf16.mxu0 %v4290_v26  ;;  %v5173_v3 = vld [vmem:[%s7002_s5 + $0xe4] ss:$16 sps:$4 sm:$0xff]   ;;  %v5183_v5 = vld [vmem:[%s7002_s5 + $0xe0] ss:$16 sps:$4 sm:$0xff]   ;;  %v4363_v17 = vld [vmem:[%s7000_s2 + $0x6c] ss:$16 sps:$4 sm:$0xff]  }
  0x1a   :  { %v5193_v7 = vld [vmem:[%s7003_s6 + $0x4] ss:$16 sps:$4 sm:$0xff]   ;;  %v5208_v10 = vld [vmem:[%s7003_s6] ss:$16 sps:$4 sm:$0xff]   ;;  %v4361_v20 = vld [vmem:[%s7000_s2 + $0x68] ss:$16 sps:$4 sm:$0xff]  }
  0x1b   :  { %296 = vmatpush1.bf16.msra.mxu1 %v4292_v27  ;;  %v5213_v11 = vld [vmem:[%s7003_s6 + $0x24] ss:$16 sps:$4 sm:$0xff]   ;;  %v5228_v14 = vld [vmem:[%s7003_s6 + $0x20] ss:$16 sps:$4 sm:$0xff]   ;;  %v4368_v21 = vld [vmem:[%s7000_s2 + $0x8c] ss:$16 sps:$4 sm:$0xff]  }
  0x1c   :  { %800 = vmatpush1.bf16.msra.mxu0 %v4293_v28  ;;  %297 = vmatprep.subr.bf16.mxu1 %v4294_v29  ;;  %v5234_v15 = vld [vmem:[%s7003_s6 + $0x44] ss:$16 sps:$4 sm:$0xff]   ;;  %v5247_v18 = vld [vmem:[%s7003_s6 + $0x40] ss:$16 sps:$4 sm:$0xff]   ;;  %v4366_v24 = vld [vmem:[%s7000_s2 + $0x88] ss:$16 sps:$4 sm:$0xff]  }
  0x1d   :  { %801 = vmatprep.subr.bf16.mxu0 %v4296_v30  ;;  %v5253_v19 = vld [vmem:[%s7003_s6 + $0x64] ss:$16 sps:$4 sm:$0xff]   ;;  %v5267_v22 = vld [vmem:[%s7003_s6 + $0x60] ss:$16 sps:$4 sm:$0xff]   ;;  %v4374_v25 = vld [vmem:[%s7000_s2 + $0xac] ss:$16 sps:$4 sm:$0xff]  }
  0x1e   :  { %v5273_v23 = vld [vmem:[%s7003_s6 + $0x84] ss:$16 sps:$4 sm:$0xff]   ;;  %v5285_v26 = vld [vmem:[%s7003_s6 + $0x80] ss:$16 sps:$4 sm:$0xff]   ;;  %v4372_v28 = vld [vmem:[%s7000_s2 + $0xa8] ss:$16 sps:$4 sm:$0xff]  }
  0x1f   :  { %298 = vmatpush1.bf16.msra.mxu1 %v4298_v31  ;;  %v5291_v27 = vld [vmem:[%s7003_s6 + $0xa4] ss:$16 sps:$4 sm:$0xff]   ;;  %v4380_v29 = vld [vmem:[%s7000_s2 + $0xcc] ss:$16 sps:$4 sm:$0xff]   ;;  %v5305_v30 = vld [vmem:[%s7003_s6 + $0xa0] ss:$16 sps:$4 sm:$0xff]  }
  0x20   :  { %802 = vmatpush1.bf16.msra.mxu0 %v4299_v32  ;;  %356 = vmatprep.subr.bf16.mxu1 %v4303_v33  ;;  %v5311_v31 = vld [vmem:[%s7003_s6 + $0xc4] ss:$16 sps:$4 sm:$0xff]   ;;  %v4378_v32 = vld [vmem:[%s7000_s2 + $0xc8] ss:$16 sps:$4 sm:$0xff]   ;;  %v4386_v33 = vld [vmem:[%s7000_s2 + $0xec] ss:$16 sps:$4 sm:$0xff]  }
  0x21   :  { %1307 = vmatprep.subr.bf16.mxu0 %v5016_v34 }
  0x22   :  { %316 = vmatmul.mubr.bf16.vlgmr.msra.gmra.mrb[0].mxu1 %v5021_v35 }
  0x23   :  { %820 = vmatmul.mubr.bf16.vlgmr.msra.gmra.mrb[0].mxu0 %v5021_v35  ;;  %357 = vmatpush1.bf16.msra.mxu1 %v4301_v36  ;;  %v5323_v36 = vld [vmem:[%s7003_s6 + $0xc0] ss:$16 sps:$4 sm:$0xff]  }
  0x24   :  { %1308 = vmatpush1.bf16.msra.mxu0 %v5029_v37  ;;  %358 = vmatprep.subr.bf16.mxu1 %v4309_v38  ;;  %v5329_v38 = vld [vmem:[%s7003_s6 + $0xe4] ss:$16 sps:$4 sm:$0xff]  }
  0x25   :  { %1309 = vmatprep.subr.bf16.mxu0 %v5038_v39  ;;  %325 = vmatprep.mubr.bf16.mxu1 %v7010_v1 }
  0x26   :  { %829 = vmatprep.mubr.bf16.mxu0 %v7010_v1 }
  0x27   :  { %359 = vmatpush1.bf16.msra.mxu1 %v4307_v40  ;;  %v4384_v40 = vld [vmem:[%s7000_s2 + $0xe8] ss:$16 sps:$4 sm:$0xff]  }
  0x28   :  { %1310 = vmatpush1.bf16.msra.mxu0 %v5049_v41  ;;  %360 = vmatprep.subr.bf16.mxu1 %v4316_v42  ;;  %v5339_v42 = vld [vmem:[%s7002_s5 + $0xc] ss:$16 sps:$4 sm:$0xff]  }
  0x29   :  { %1311 = vmatprep.subr.bf16.mxu0 %v5058_v43 }
  0x2a   :  { %326 = vmatmul.mubr.bf16.gmra.mrb[4].mxu1 %v5065_v44 }
  0x2b   :  { %830 = vmatmul.mubr.bf16.gmra.mrb[4].mxu0 %v5065_v44  ;;  %361 = vmatpush1.bf16.msra.mxu1 %v4314_v45  ;;  %v5345_v45 = vld [vmem:[%s7003_s6 + $0xe0] ss:$16 sps:$4 sm:$0xff]  }
  0x2c   :  { %1312 = vmatpush1.bf16.msra.mxu0 %v5073_v46  ;;  %362 = vmatprep.subr.bf16.mxu1 %v4322_v47  ;;  %v5351_v47 = vld [vmem:[%s7002_s5 + $0x8] ss:$16 sps:$4 sm:$0xff]  }
  0x2d   :  { %1313 = vmatprep.subr.bf16.mxu0 %v5083_v48  ;;  %335 = vmatprep.mubr.bf16.mxu1 %v7010_v1 }
  0x2e   :  { %839 = vmatprep.mubr.bf16.mxu0 %v7010_v1 }
  0x2f   :  { %363 = vmatpush1.bf16.msra.mxu1 %v4320_v49  ;;  %v5357_v49 = vld [vmem:[%s7002_s5 + $0x2c] ss:$16 sps:$4 sm:$0xff]  }
  0x30   :  { %1314 = vmatpush1.bf16.msra.mxu0 %v5093_v50  ;;  %364 = vmatprep.subr.bf16.mxu1 %v4329_v51  ;;  %v5366_v51 = vld [vmem:[%s7002_s5 + $0x28] ss:$16 sps:$4 sm:$0xff]  }
  0x31   :  { %1315 = vmatprep.subr.bf16.mxu0 %v5103_v52 }
  0x32   :  { %336 = vmatmul.mubr.bf16.gmra.mrb[8].mxu1 %v5110_v53 }
  0x33   :  { %840 = vmatmul.mubr.bf16.gmra.mrb[8].mxu0 %v5110_v53  ;;  %365 = vmatpush1.bf16.msra.mxu1 %v4327_v54  ;;  %v5373_v54 = vld [vmem:[%s7002_s5 + $0x4c] ss:$16 sps:$4 sm:$0xff]  }
  0x34   :  { %1316 = vmatpush1.bf16.msra.mxu0 %v5118_v55  ;;  %366 = vmatprep.subr.bf16.mxu1 %v4335_v56  ;;  %v5479_v56 = vld [vmem:[%s7003_s6 + $0x2c] ss:$16 sps:$4 sm:$0xff]  }
  0x35   :  { %1317 = vmatprep.subr.bf16.mxu0 %v5128_v57  ;;  %345 = vmatprep.mubr.bf16.mxu1 %v7010_v1 }
  0x36   :  { %849 = vmatprep.mubr.bf16.mxu0 %v7010_v1 }
  0x37   :  { %367 = vmatpush1.bf16.msra.mxu1 %v4333_v58  ;;  %v5495_v58 = vld [vmem:[%s7003_s6 + $0x4c] ss:$16 sps:$4 sm:$0xff]  }
  0x38   :  { %1318 = vmatpush1.bf16.msra.mxu0 %v5138_v59  ;;  %368 = vmatprep.subr.bf16.mxu1 %v4342_v60  ;;  %v5507_v60 = vld [vmem:[%s7003_s6 + $0x6c] ss:$16 sps:$4 sm:$0xff]  }
  0x39   :  { %1319 = vmatprep.subr.bf16.mxu0 %v5148_v61 }
  0x3a   :  { %346 = vmatmul.mubr.bf16.gmra.mrb[12].mxu1 %v5155_v62 }
  0x3b   :  { %850 = vmatmul.mubr.bf16.gmra.mrb[12].mxu0 %v5155_v62  ;;  %369 = vmatpush1.bf16.msra.mxu1 %v4340_v63  ;;  %v5525_v63 = vld [vmem:[%s7003_s6 + $0x88] ss:$16 sps:$4 sm:$0xff]  }
  0x3c   :  { %1320 = vmatpush1.bf16.msra.mxu0 %v5164_v0  ;;  %370 = vmatprep.subr.bf16.mxu1 %v4348_v2  ;;  %v5537_v2 = vld [vmem:[%s7003_s6 + $0xa8] ss:$16 sps:$4 sm:$0xff]  }
  0x3d   :  { %1321 = vmatprep.subr.bf16.mxu0 %v5173_v3  ;;  %388 = vmatprep.mubr.bf16.mxu1 %v7010_v1 }
  0x3e   :  { %1339 = vmatprep.mubr.bf16.mxu0 %v7010_v1 }
  0x3f   :  { %371 = vmatpush1.bf16.msra.mxu1 %v4346_v4  ;;  %v5549_v4 = vld [vmem:[%s7003_s6 + $0xc8] ss:$16 sps:$4 sm:$0xff]  }
  0x40   :  { %1322 = vmatpush1.bf16.msra.mxu0 %v5183_v5  ;;  %860 = vmatprep.subr.bf16.mxu1 %v4354_v6  ;;  %v5561_v6 = vld [vmem:[%s7003_s6 + $0xe8] ss:$16 sps:$4 sm:$0xff]  }
  0x41   :  { %1595 = vmatprep.subr.bf16.mxu0 %v5193_v7 }
  0x42   :  { %389 = vmatmul.mubr.bf16.vlgmr.msra.gmra.mrb[16].mxu1 %v5021_v35 }
  0x43   :  { %1340 = vmatmul.mubr.bf16.vlgmr.msra.gmra.mrb[16].mxu0 %v7010_v1  ;;  %861 = vmatpush1.bf16.msra.mxu1 %v4352_v8 }
  0x44   :  { %398 = vmatprep.mubr.bf16.mxu1 %v7010_v1  ;;  %862 = vmatprep.subr.bf16.mxu1 %v4357_v9 }
  0x45   :  { %1596 = vmatpush1.bf16.msra.mxu0 %v5208_v10  ;;  %1627 = vmatprep.mubr.bf16.mxu0 %v7010_v1 }
  0x46   :  { %1597 = vmatprep.subr.bf16.mxu0 %v5213_v11 }
  0x47   :  { %863 = vmatpush1.bf16.msra.mxu1 %v4355_v12  ;;  %v5590_v12 = vld [vmem:[%s7004_s3] sm:$0xf] }
  0x48   :  { %864 = vmatprep.subr.bf16.mxu1 %v4360_v13 }
  0x49   :  { %1598 = vmatpush1.bf16.msra.mxu0 %v5228_v14 }
  0x4a   :  { %1599 = vmatprep.subr.bf16.mxu0 %v5234_v15  ;;  %399 = vmatmul.mubr.bf16.gmra.mrb[20].mxu1 %v5065_v44 }
  0x4b   :  { %865 = vmatpush1.bf16.msra.mxu1 %v4358_v16  ;;  %408 = vmatprep.mubr.bf16.mxu1 %v7010_v1  ;;  %v5596_v16 = vld [vmem:[%s7005_s4] sm:$0xf] }
  0x4c   :  { %866 = vmatprep.subr.bf16.mxu1 %v4363_v17 }
  0x4d   :  { %1600 = vmatpush1.bf16.msra.mxu0 %v5247_v18 }
  0x4e   :  { %1601 = vmatprep.subr.bf16.mxu0 %v5253_v19 }
  0x4f   :  { %867 = vmatpush1.bf16.msra.mxu1 %v4361_v20 }
  0x50   :  { %868 = vmatprep.subr.bf16.mxu1 %v4368_v21 }
  0x51   :  { %1602 = vmatpush1.bf16.msra.mxu0 %v5267_v22 }
  0x52   :  { %1603 = vmatprep.subr.bf16.mxu0 %v5273_v23  ;;  %409 = vmatmul.mubr.bf16.gmra.mrb[24].mxu1 %v5110_v53 }
  0x53   :  { %869 = vmatpush1.bf16.msra.mxu1 %v4366_v24  ;;  %418 = vmatprep.mubr.bf16.mxu1 %v7010_v1 }
  0x54   :  { %870 = vmatprep.subr.bf16.mxu1 %v4374_v25 }
  0x55   :  { %1604 = vmatpush1.bf16.msra.mxu0 %v5285_v26 }
  0x56   :  { %1605 = vmatprep.subr.bf16.mxu0 %v5291_v27 }
  0x57   :  { %871 = vmatpush1.bf16.msra.mxu1 %v4372_v28 }
  0x58   :  { %872 = vmatprep.subr.bf16.mxu1 %v4380_v29 }
  0x59   :  { %1606 = vmatpush1.bf16.msra.mxu0 %v5305_v30 }
  0x5a   :  { %1607 = vmatprep.subr.bf16.mxu0 %v5311_v31  ;;  %419 = vmatmul.mubr.bf16.gmra.mrb[28].mxu1 %v5155_v62 }
  0x5b   :  { %873 = vmatpush1.bf16.msra.mxu1 %v4378_v32  ;;  %892 = vmatprep.mubr.bf16.mxu1 %v7010_v1 }
  0x5c   :  { %874 = vmatprep.subr.bf16.mxu1 %v4386_v33 }
  0x5d   :  { %1608 = vmatpush1.bf16.msra.mxu0 %v5323_v36 }
  0x5e   :  { %1609 = vmatprep.subr.bf16.mxu0 %v5329_v38 }
  0x5f   :  { %875 = vmatpush1.bf16.msra.mxu1 %v4384_v40 }
  0x60   :  { %1348 = vmatprep.subr.bf16.mxu1 %v5339_v42 }
  0x61   :  { %1610 = vmatpush1.bf16.msra.mxu0 %v5345_v45 }
  0x62   :  { %1728 = vmatprep.subr.bf16.mxu0 %v5016_v34  ;;  %893 = vmatmul.mubr.bf16.vlgmr.msra.gmra.mrb[32].mxu1 %v5021_v35  ;;  %v5383_v34 = vld [vmem:[%s7002_s5 + $0x48] ss:$16 sps:$4 sm:$0xff]   ;;  %v5389_v35 = vld [vmem:[%s7002_s5 + $0x6c] ss:$16 sps:$4 sm:$0xff]  }
  0x63   :  { %1349 = vmatpush1.bf16.msra.mxu1 %v5351_v47  ;;  %902 = vmatprep.mubr.bf16.mxu1 %v7010_v1  ;;  %7121 = vst [vmem:[#allocation6_spill] sm:$0xff] %v5383_v34  ;;  %7122 = vst [vmem:[#allocation7_spill] sm:$0xff] %v5389_v35 }
  0x64   :  { %1350 = vmatprep.subr.bf16.mxu1 %v5357_v49  ;;  %1628 = vmatmul.mubr.bf16.vlgmr.msra.gmra.mrb[20].mxu0 %v7010_v1 }
  0x65   :  { %1729 = vmatpush1.bf16.msra.mxu0 %v5029_v37  ;;  %1760 = vmatprep.mubr.bf16.mxu0 %v7010_v1  ;;  %v5398_v37 = vld [vmem:[%s7002_s5 + $0x68] ss:$16 sps:$4 sm:$0xff]  }
  0x66   :  { %1730 = vmatprep.subr.bf16.mxu0 %v5038_v39  ;;  %7123 = vst [vmem:[#allocation8_spill] sm:$0xff] %v5398_v37  ;;  %v5405_v39 = vld [vmem:[%s7002_s5 + $0x8c] ss:$16 sps:$4 sm:$0xff]  }
  0x67   :  { %1351 = vmatpush1.bf16.msra.mxu1 %v5366_v51  ;;  %7124 = vst [vmem:[#allocation9_spill] sm:$0xff] %v5405_v39 }
  0x68   :  { %1352 = vmatprep.subr.bf16.mxu1 %v5373_v54 }
  0x69   :  { %1731 = vmatpush1.bf16.msra.mxu0 %v5049_v41  ;;  %v5413_v41 = vld [vmem:[%s7002_s5 + $0x88] ss:$16 sps:$4 sm:$0xff]  }
  0x6a   :  { %903 = vmatmul.mubr.bf16.gmra.mrb[36].mxu1 %v5065_v44  ;;  %1732 = vmatprep.subr.bf16.mxu0 %v5058_v43  ;;  %7125 = vst [vmem:[#allocation10_spill] sm:$0xff] %v5413_v41  ;;  %v5419_v43 = vld [vmem:[%s7002_s5 + $0xac] ss:$16 sps:$4 sm:$0xff]   ;;  %v5428_v44 = vld [vmem:[%s7002_s5 + $0xa8] ss:$16 sps:$4 sm:$0xff]  }
  0x6b   :  { %1353 = vmatpush1.bf16.msra.mxu1 %v5383_v34  ;;  %912 = vmatprep.mubr.bf16.mxu1 %v7010_v1  ;;  %7126 = vst [vmem:[#allocation11_spill] sm:$0xff] %v5419_v43  ;;  %7127 = vst [vmem:[#allocation12_spill] sm:$0xff] %v5428_v44 }
  0x6c   :  { %1354 = vmatprep.subr.bf16.mxu1 %v5389_v35 }
  0x6d   :  { %1733 = vmatpush1.bf16.msra.mxu0 %v5073_v46  ;;  %v5435_v46 = vld [vmem:[%s7002_s5 + $0xcc] ss:$16 sps:$4 sm:$0xff]  }
  0x6e   :  { %1734 = vmatprep.subr.bf16.mxu0 %v5083_v48  ;;  %7128 = vst [vmem:[#allocation13_spill] sm:$0xff] %v5435_v46  ;;  %v5443_v48 = vld [vmem:[%s7002_s5 + $0xc8] ss:$16 sps:$4 sm:$0xff]  }
  0x6f   :  { %1355 = vmatpush1.bf16.msra.mxu1 %v5398_v37  ;;  %7129 = vst [vmem:[#allocation14_spill] sm:$0xff] %v5443_v48 }
  0x70   :  { %1356 = vmatprep.subr.bf16.mxu1 %v5405_v39 }
  0x71   :  { %1735 = vmatpush1.bf16.msra.mxu0 %v5093_v50  ;;  %v5449_v50 = vld [vmem:[%s7002_s5 + $0xec] ss:$16 sps:$4 sm:$0xff]  }
  0x72   :  { %913 = vmatmul.mubr.bf16.gmra.mrb[40].mxu1 %v5110_v53  ;;  %1736 = vmatprep.subr.bf16.mxu0 %v5103_v52  ;;  %7130 = vst [vmem:[#allocation15_spill] sm:$0xff] %v5449_v50  ;;  %v5458_v52 = vld [vmem:[%s7002_s5 + $0xe8] ss:$16 sps:$4 sm:$0xff]   ;;  %v5465_v53 = vld [vmem:[%s7003_s6 + $0xc] ss:$16 sps:$4 sm:$0xff]  }
  0x73   :  { %1357 = vmatpush1.bf16.msra.mxu1 %v5413_v41  ;;  %922 = vmatprep.mubr.bf16.mxu1 %v7010_v1  ;;  %7131 = vst [vmem:[#allocation16_spill] sm:$0xff] %v5458_v52  ;;  %7132 = vst [vmem:[#allocation17_spill] sm:$0xff] %v5465_v53 }
  0x74   :  { %1358 = vmatprep.subr.bf16.mxu1 %v5419_v43 }
  0x75   :  { %1737 = vmatpush1.bf16.msra.mxu0 %v5118_v55  ;;  %v5473_v55 = vld [vmem:[%s7003_s6 + $0x8] ss:$16 sps:$4 sm:$0xff]  }
  0x76   :  { %1738 = vmatprep.subr.bf16.mxu0 %v5128_v57  ;;  %v5488_v57 = vld [vmem:[%s7003_s6 + $0x28] ss:$16 sps:$4 sm:$0xff]  }
  0x77   :  { %1359 = vmatpush1.bf16.msra.mxu1 %v5428_v44 }
  0x78   :  { %1360 = vmatprep.subr.bf16.mxu1 %v5435_v46 }
  0x79   :  { %1739 = vmatpush1.bf16.msra.mxu0 %v5138_v59  ;;  %v5501_v59 = vld [vmem:[%s7003_s6 + $0x48] ss:$16 sps:$4 sm:$0xff]  }
  0x7a   :  { %923 = vmatmul.mubr.bf16.gmra.mrb[44].mxu1 %v5155_v62  ;;  %1740 = vmatprep.subr.bf16.mxu0 %v5148_v61  ;;  %v5513_v61 = vld [vmem:[%s7003_s6 + $0x68] ss:$16 sps:$4 sm:$0xff]   ;;  %v5519_v62 = vld [vmem:[%s7003_s6 + $0x8c] ss:$16 sps:$4 sm:$0xff]  }
  0x7b   :  { %1361 = vmatpush1.bf16.msra.mxu1 %v5443_v48  ;;  %1380 = vmatprep.mubr.bf16.mxu1 %v7010_v1 }
  0x7c   :  { %1362 = vmatprep.subr.bf16.mxu1 %v5449_v50 }
  0x7d   :  { %1741 = vmatpush1.bf16.msra.mxu0 %v5164_v0  ;;  %v5531_v0 = vld [vmem:[%s7003_s6 + $0xac] ss:$16 sps:$4 sm:$0xff]  }
  0x7e   :  { %1742 = vmatprep.subr.bf16.mxu0 %v5173_v3  ;;  %v5543_v3 = vld [vmem:[%s7003_s6 + $0xcc] ss:$16 sps:$4 sm:$0xff]  }
  0x7f   :  { %1363 = vmatpush1.bf16.msra.mxu1 %v5458_v52 }
  0x80   :  { %1636 = vmatprep.subr.bf16.mxu1 %v5465_v53 }
  0x81   :  { %1743 = vmatpush1.bf16.msra.mxu0 %v5183_v5  ;;  %v5555_v5 = vld [vmem:[%s7003_s6 + $0xec] ss:$16 sps:$4 sm:$0xff]  }
  0x82   :  { %1381 = vmatmul.mubr.bf16.vlgmr.msra.gmra.mrb[48].mxu1 %v7010_v1  ;;  %1856 = vmatprep.subr.bf16.mxu0 %v5193_v7  ;;  %v79_v7 = vlaneseq }
  0x83   :  { %1637 = vmatpush1.bf16.msra.mxu1 %v5473_v55  ;;  %1668 = vmatprep.mubr.bf16.mxu1 %v7010_v1 }
  0x84   :  { %1638 = vmatprep.subr.bf16.mxu1 %v5479_v56  ;;  %v5584_v8 = vshrl.u32 %v79_v7, 7 }
  0x86   :  { %v81_v9 = vsub.s32 0, %v5584_v8  ;;  %v85_v13 = vsub.s32 1, %v5584_v8 }
  0x87   :  { %1639 = vmatpush1.bf16.msra.mxu1 %v5488_v57 }
  0x88   :  { %1640 = vmatprep.subr.bf16.mxu1 %v5495_v58  ;;  %v5599_v17 = vrot.slane %v5590_v12, %v81_v9  ;;  %v5602_v20 = vrot.slane %v5596_v16, %v81_v9  ;;  %v5605_v21 = vrot.slane %v5590_v12, %v85_v13  ;;  %v5608_v24 = vrot.slane %v5596_v16, %v85_v13 }
  0x8b   :  { %1641 = vmatpush1.bf16.msra.mxu1 %v5501_v59 }
  0x8c   :  { %1642 = vmatprep.subr.bf16.mxu1 %v5507_v60 }
  0x8f   :  { %1643 = vmatpush1.bf16.msra.mxu1 %v5513_v61 }
  0x90   :  { %1644 = vmatprep.subr.bf16.mxu1 %v5519_v62 }
  0x93   :  { %1645 = vmatpush1.bf16.msra.mxu1 %v5525_v63 }
  0x94   :  { %1646 = vmatprep.subr.bf16.mxu1 %v5531_v0 }
  0x97   :  { %1647 = vmatpush1.bf16.msra.mxu1 %v5537_v2 }
  0x98   :  { %1648 = vmatprep.subr.bf16.mxu1 %v5543_v3 }
  0x9b   :  { %1649 = vmatpush1.bf16.msra.mxu1 %v5549_v4 }
  0x9c   :  { %1650 = vmatprep.subr.bf16.mxu1 %v5555_v5 }
  0x9f   :  { %1651 = vmatpush1.bf16.msra.mxu1 %v5561_v6 }
  0xa0   :  { %1769 = vmatprep.subr.bf16.mxu1 %v5339_v42 }
  0xa2   :  { %1669 = vmatmul.mubr.bf16.vlgmr.msra.gmra.mrb[52].mxu1 %v7010_v1 }
  0xa3   :  { %1770 = vmatpush1.bf16.msra.mxu1 %v5351_v47  ;;  %1801 = vmatprep.mubr.bf16.mxu1 %v7010_v1 }
  0xa4   :  { %1771 = vmatprep.subr.bf16.mxu1 %v5357_v49 }
  0xa7   :  { %1772 = vmatpush1.bf16.msra.mxu1 %v5366_v51 }
  0xa8   :  { %1773 = vmatprep.subr.bf16.mxu1 %v5373_v54 }
  0xab   :  { %1774 = vmatpush1.bf16.msra.mxu1 %v5383_v34 }
  0xac   :  { %1775 = vmatprep.subr.bf16.mxu1 %v5389_v35 }
  0xaf   :  { %1776 = vmatpush1.bf16.msra.mxu1 %v5398_v37 }
  0xb0   :  { %1777 = vmatprep.subr.bf16.mxu1 %v5405_v39 }
  0xb3   :  { %1778 = vmatpush1.bf16.msra.mxu1 %v5413_v41 }
  0xb4   :  { %1779 = vmatprep.subr.bf16.mxu1 %v5419_v43 }
  0xb7   :  { %1780 = vmatpush1.bf16.msra.mxu1 %v5428_v44 }
  0xb8   :  { %1781 = vmatprep.subr.bf16.mxu1 %v5435_v46 }
  0xbb   :  { %1782 = vmatpush1.bf16.msra.mxu1 %v5443_v48 }
  0xbc   :  { %1783 = vmatprep.subr.bf16.mxu1 %v5449_v50 }
  0xbf   :  { %1784 = vmatpush1.bf16.msra.mxu1 %v5458_v52 }
  0xc0   :  { %1897 = vmatprep.subr.bf16.mxu1 %v5465_v53 }
  0xf5   :  { %v317_v25 = vpop.f32.mrb[0].mxu1 }
  0xf6   :  { %v821_v28 = vpop.f32.mrb[0].mxu0  ;;  %v318_v29 = vadd.f32 %v317_v25, %v5599_v17  ;;  %v319_v32 = vpop.f32.mrb[1].mxu1 }
  0xf7   :  { %v822_v33 = vadd.f32 %v821_v28, %v5602_v20  ;;  %v823_v40 = vpop.f32.mrb[1].mxu0  ;;  %v320_v7 = vadd.f32 %v319_v32, %v5605_v21  ;;  %v321_v1 = vpop.f32.mrb[2].mxu1 }
  0xf8   :  { %v824_v9 = vadd.f32 %v823_v40, %v5608_v24  ;;  %v825_v53 = vpop.f32.mrb[2].mxu0  ;;  %v322_v52 = vadd.f32 %v321_v1, %v5599_v17  ;;  %v323_v50 = vpop.f32.mrb[3].mxu1 }
  0xf9   :  { %v826_v13 = vadd.f32 %v825_v53, %v5602_v20  ;;  %v827_v48 = vpop.f32.mrb[3].mxu0  ;;  %v5616_v46 = vpack.c.bf16 %v320_v7, %v318_v29  ;;  %v324_v25 = vadd.f32 %v323_v50, %v5605_v21 }
  0xfa   :  { %v5619_v44 = vpack.c.bf16 %v824_v9, %v822_v33  ;;  %v828_v28 = vadd.f32 %v827_v48, %v5608_v24 }
  0xfb   :  { %v5622_v43 = vpack.c.bf16 %v324_v25, %v322_v52 }
  0xfc   :  { %7133 = vst [vmem:[#allocation18_spill] sm:$0xff] %v5619_v44  ;;  %v5624_v32 = vpack.c.bf16 %v828_v28, %v826_v13 }
  0xfd   :  { %7134 = vst [vmem:[#allocation19_spill] sm:$0xff] %v5622_v43  ;;  %v327_v40 = vpop.f32.mrb[4].mxu1 }
  0xfe   :  { %7135 = vst [vmem:[#allocation20_spill] sm:$0xff] %v5624_v32  ;;  %v831_v41 = vpop.f32.mrb[4].mxu0  ;;  %v328_v1 = vadd.f32 %v327_v40, %v5599_v17  ;;  %v329_v39 = vpop.f32.mrb[5].mxu1 }
  0xff   :  { %v832_v53 = vadd.f32 %v831_v41, %v5602_v20  ;;  %v833_v37 = vpop.f32.mrb[5].mxu0  ;;  %v330_v29 = vadd.f32 %v329_v39, %v5605_v21  ;;  %v331_v7 = vpop.f32.mrb[6].mxu1 }
 0x100   :  { %v834_v50 = vadd.f32 %v833_v37, %v5608_v24  ;;  %v835_v33 = vpop.f32.mrb[6].mxu0  ;;  %v332_v48 = vadd.f32 %v331_v7, %v5599_v17  ;;  %v333_v52 = vpop.f32.mrb[7].mxu1 }
 0x101   :  { %v836_v9 = vadd.f32 %v835_v33, %v5602_v20  ;;  %v837_v13 = vpop.f32.mrb[7].mxu0  ;;  %v5632_v25 = vpack.c.bf16 %v330_v29, %v328_v1  ;;  %v334_v28 = vadd.f32 %v333_v52, %v5605_v21 }
 0x102   :  { %v5635_v40 = vpack.c.bf16 %v834_v50, %v832_v53  ;;  %v838_v41 = vadd.f32 %v837_v13, %v5608_v24 }
 0x103   :  { %7136 = vst [vmem:[#allocation21_spill] sm:$0xff] %v5632_v25  ;;  %v5638_v44 = vpack.c.bf16 %v334_v28, %v332_v48 }
 0x104   :  { %7137 = vst [vmem:[#allocation22_spill] sm:$0xff] %v5635_v40  ;;  %v5640_v39 = vpack.c.bf16 %v838_v41, %v836_v9 }
 0x105   :  { %7138 = vst [vmem:[#allocation23_spill] sm:$0xff] %v5638_v44  ;;  %v337_v37 = vpop.f32.mrb[8].mxu1 }
 0x106   :  { %7139 = vst [vmem:[#allocation24_spill] sm:$0xff] %v5640_v39  ;;  %v841_v32 = vpop.f32.mrb[8].mxu0  ;;  %v338_v7 = vadd.f32 %v337_v37, %v5599_v17  ;;  %v339_v43 = vpop.f32.mrb[9].mxu1 }
 0x107   :  { %v842_v33 = vadd.f32 %v841_v32, %v5602_v20  ;;  %v843_v35 = vpop.f32.mrb[9].mxu0  ;;  %v340_v1 = vadd.f32 %v339_v43, %v5605_v21  ;;  %v341_v29 = vpop.f32.mrb[10].mxu1 }
 0x108   :  { %v844_v53 = vadd.f32 %v843_v35, %v5608_v24  ;;  %v845_v50 = vpop.f32.mrb[10].mxu0  ;;  %v342_v52 = vadd.f32 %v341_v29, %v5599_v17  ;;  %v343_v48 = vpop.f32.mrb[11].mxu1 }
 0x109   :  { %v846_v9 = vadd.f32 %v845_v50, %v5602_v20  ;;  %v847_v13 = vpop.f32.mrb[11].mxu0  ;;  %v5648_v28 = vpack.c.bf16 %v340_v1, %v338_v7  ;;  %v344_v41 = vadd.f32 %v343_v48, %v5605_v21  ;;  %v7033_v7 = vsub.s32 2, %v5584_v8 }
 0x10a   :  { %v5651_v37 = vpack.c.bf16 %v844_v53, %v842_v33  ;;  %v848_v32 = vadd.f32 %v847_v13, %v5608_v24 }
 0x10b   :  { %7140 = vst [vmem:[#allocation25_spill] sm:$0xff] %v5648_v28  ;;  %v5654_v40 = vpack.c.bf16 %v344_v41, %v342_v52  ;;  %v93_v52 = vsub.s32 3, %v5584_v8 }
 0x10c   :  { %7141 = vst [vmem:[#allocation26_spill] sm:$0xff] %v5651_v37  ;;  %v5656_v43 = vpack.c.bf16 %v848_v32, %v846_v9 }
 0x10d   :  { %7142 = vst [vmem:[#allocation27_spill] sm:$0xff] %v5654_v40  ;;  %v347_v35 = vpop.f32.mrb[12].mxu1 }
 0x10e   :  { %7143 = vst [vmem:[#allocation28_spill] sm:$0xff] %v5656_v43  ;;  %v851_v39 = vpop.f32.mrb[12].mxu0  ;;  %v348_v29 = vadd.f32 %v347_v35, %v5599_v17  ;;  %v349_v44 = vpop.f32.mrb[13].mxu1 }
 0x10f   :  { %v852_v50 = vadd.f32 %v851_v39, %v5602_v20  ;;  %v853_v25 = vpop.f32.mrb[13].mxu0  ;;  %v350_v1 = vadd.f32 %v349_v44, %v5605_v21  ;;  %v351_v33 = vpop.f32.mrb[14].mxu1 }
 0x110   :  { %v854_v53 = vadd.f32 %v853_v25, %v5608_v24  ;;  %v855_v48 = vpop.f32.mrb[14].mxu0  ;;  %v352_v9 = vadd.f32 %v351_v33, %v5599_v17  ;;  %v353_v13 = vpop.f32.mrb[15].mxu1  ;;  %v90_v25 = vrot.slane %v5590_v12, %v7033_v7  ;;  %v94_v17 = vrot.slane %v5590_v12, %v93_v52 }
 0x111   :  { %v856_v41 = vadd.f32 %v855_v48, %v5602_v20  ;;  %v857_v32 = vpop.f32.mrb[15].mxu0  ;;  %v5666_v35 = vpack.c.bf16 %v350_v1, %v348_v29  ;;  %v354_v39 = vadd.f32 %v353_v13, %v5605_v21  ;;  %v1143_v20 = vunpack.c.l.bf16 %v5616_v46 }
 0x112   :  { %v5669_v40 = vpack.c.bf16 %v854_v53, %v852_v50  ;;  %v858_v44 = vadd.f32 %v857_v32, %v5608_v24  ;;  %v1144_v21 = vunpack.c.h.bf16 %v5616_v46 }
 0x113   :  { %7144 = vst [vmem:[#allocation29_spill] sm:$0xff] %v5666_v35  ;;  %v5675_v28 = vpack.c.bf16 %v354_v39, %v352_v9 }
 0x114   :  { %7145 = vst [vmem:[#allocation30_spill] sm:$0xff] %v5669_v40  ;;  %v5677_v37 = vpack.c.bf16 %v858_v44, %v856_v41 }
 0x115   :  { %7146 = vst [vmem:[#allocation31_spill] sm:$0xff] %v5675_v28  ;;  %v390_v29 = vpop.f32.mrb[16].mxu1 }
 0x116   :  { %v1341_v1 = vpop.f32.mrb[16].mxu0  ;;  %v391_v50 = vadd.f32 %v390_v29, %v90_v25  ;;  %v392_v24 = vpop.f32.mrb[17].mxu1 }
 0x117   :  { %v5682_v33 = vadd.f32 %v1341_v1, %v1143_v20  ;;  %v1343_v53 = vpop.f32.mrb[17].mxu0  ;;  %v393_v48 = vadd.f32 %v392_v24, %v94_v17  ;;  %v394_v32 = vpop.f32.mrb[18].mxu1 }
 0x118   :  { %v1390_v13 = vadd.f32 %v1343_v53, %v1144_v21  ;;  %v1345_v9 = vpop.f32.mrb[18].mxu0  ;;  %v395_v39 = vadd.f32 %v394_v32, %v90_v25  ;;  %v396_v41 = vpop.f32.mrb[19].mxu1 }
 0x119   :  { %v1346_v44 = vpop.f32.mrb[19].mxu0  ;;  %v5684_v7 = vpack.c.bf16 %v393_v48, %v391_v50  ;;  %v397_v12 = vadd.f32 %v396_v41, %v94_v17 }
 0x11b   :  { %v5686_v28 = vpack.c.bf16 %v397_v12, %v395_v39 }
 0x11d   :  { %7147 = vst [vmem:[#allocation32_spill] sm:$0xff] %v5686_v28  ;;  %v400_v35 = vpop.f32.mrb[20].mxu1 }
 0x11e   :  { %v401_v43 = vadd.f32 %v400_v35, %v90_v25  ;;  %v402_v46 = vpop.f32.mrb[21].mxu1 }
 0x11f   :  { %v403_v29 = vadd.f32 %v402_v46, %v94_v17  ;;  %v404_v20 = vpop.f32.mrb[22].mxu1 }
 0x120   :  { %v405_v1 = vadd.f32 %v404_v20, %v90_v25  ;;  %v406_v40 = vpop.f32.mrb[23].mxu1 }
 0x121   :  { %v5688_v34 = vpack.c.bf16 %v403_v29, %v401_v43  ;;  %v407_v21 = vadd.f32 %v406_v40, %v94_v17 }
 0x123   :  { %v5690_v24 = vpack.c.bf16 %v407_v21, %v405_v1 }
 0x125   :  { %7148 = vst [vmem:[#allocation33_spill] sm:$0xff] %v5690_v24  ;;  %v410_v53 = vpop.f32.mrb[24].mxu1 }
 0x126   :  { %v411_v32 = vadd.f32 %v410_v53, %v90_v25  ;;  %v412_v9 = vpop.f32.mrb[25].mxu1 }
 0x127   :  { %v413_v50 = vadd.f32 %v412_v9, %v94_v17  ;;  %v414_v48 = vpop.f32.mrb[26].mxu1  ;;  %v7152_v9 = vsub.s32 2, %v5584_v8 }
 0x128   :  { %v415_v41 = vadd.f32 %v414_v48, %v90_v25  ;;  %v416_v39 = vpop.f32.mrb[27].mxu1 }
 0x129   :  { %v5692_v44 = vpack.c.bf16 %v413_v50, %v411_v32  ;;  %v417_v35 = vadd.f32 %v416_v39, %v94_v17  ;;  %v618_v48 = vrot.slane %v5596_v16, %v7152_v9  ;;  %v622_v32 = vrot.slane %v5596_v16, %v93_v52 }
 0x12a   :  { %v1431_v50 = vunpack.c.l.bf16 %v5677_v37  ;;  %v1432_v39 = vunpack.c.h.bf16 %v5677_v37  ;;  %v1393_v9 = vpack.c.bf16 %v5682_v33, %v5682_v33 }
 0x12b   :  { %7149 = vst [vmem:[#allocation34_spill] sm:$0xff] %v5692_v44  ;;  %v5694_v12 = vpack.c.bf16 %v417_v35, %v415_v41  ;;  %v6169_v44 = vld [vmem:[%s7002_s5 + $0xec] ss:$16 sps:$4 sm:$0xff]  }
 0x12c   :  { %7201 = vst [vmem:[#allocation54_spill] sm:$0xff] %v6169_v44 }
 0x12d   :  { %7150 = vst [vmem:[#allocation35_spill] sm:$0xff] %v5694_v12  ;;  %v420_v46 = vpop.f32.mrb[28].mxu1 }
 0x12e   :  { %v421_v20 = vadd.f32 %v420_v46, %v90_v25  ;;  %v422_v28 = vpop.f32.mrb[29].mxu1 }
 0x12f   :  { %v423_v43 = vadd.f32 %v422_v28, %v94_v17  ;;  %v424_v29 = vpop.f32.mrb[30].mxu1 }
 0x130   :  { %v425_v40 = vadd.f32 %v424_v29, %v90_v25  ;;  %v426_v1 = vpop.f32.mrb[31].mxu1 }
 0x131   :  { %v5696_v21 = vpack.c.bf16 %v423_v43, %v421_v20  ;;  %v427_v53 = vadd.f32 %v426_v1, %v94_v17  ;;  %v1394_v43 = vpack.c.bf16 %v1390_v13, %v1390_v13 }
 0x133   :  { %7151 = vst [vmem:[#allocation36_spill] sm:$0xff] %v5696_v21  ;;  %v5701_v24 = vpack.c.bf16 %v427_v53, %v425_v40  ;;  %v4034_v21 = vmul.bf16 3216621497, %v1393_v9 }
 0x135   :  { %7153 = vst [vmem:[#allocation37_spill] sm:$0xff] %v5701_v24  ;;  %v894_v41 = vpop.f32.mrb[32].mxu1 }
 0x136   :  { %v895_v28 = vadd.f32 %v894_v41, %v618_v48  ;;  %v896_v35 = vpop.f32.mrb[33].mxu1 }
 0x137   :  { %v897_v25 = vadd.f32 %v896_v35, %v622_v32  ;;  %v898_v46 = vpop.f32.mrb[34].mxu1  ;;  %v1629_v20 = vpop.f32.mrb[20].mxu0  ;;  %v4035_v35 = vmul.bf16 3216621497, %v1394_v43 }
 0x138   :  { %v899_v17 = vadd.f32 %v898_v46, %v618_v48  ;;  %v900_v29 = vpop.f32.mrb[35].mxu1  ;;  %v5706_v8 = vadd.f32 %v1629_v20, %v1431_v50  ;;  %v1631_v1 = vpop.f32.mrb[21].mxu0 }
 0x139   :  { %v5708_v40 = vpack.c.bf16 %v897_v25, %v895_v28  ;;  %v901_v53 = vadd.f32 %v900_v29, %v622_v32  ;;  %v1678_v16 = vadd.f32 %v1631_v1, %v1432_v39  ;;  %v1633_v52 = vpop.f32.mrb[22].mxu0  ;;  %4472 = vpow.bf16 %v4035_v35 }
 0x13a   :  { %v1634_v37 = vpop.f32.mrb[23].mxu0  ;;  %4474 = vpow.bf16 %v4034_v21 }
 0x13b   :  { %7154 = vst [vmem:[#allocation38_spill] sm:$0xff] %v5708_v40  ;;  %v5712_v41 = vpack.c.bf16 %v901_v53, %v899_v17 }
 0x13d   :  { %7155 = vst [vmem:[#allocation39_spill] sm:$0xff] %v5712_v41  ;;  %v904_v24 = vpop.f32.mrb[36].mxu1 }
 0x13e   :  { %v905_v13 = vadd.f32 %v904_v24, %v618_v48  ;;  %v906_v46 = vpop.f32.mrb[37].mxu1 }
 0x13f   :  { %v907_v12 = vadd.f32 %v906_v46, %v622_v32  ;;  %v908_v50 = vpop.f32.mrb[38].mxu1 }
 0x140   :  { %v909_v20 = vadd.f32 %v908_v50, %v618_v48  ;;  %v910_v28 = vpop.f32.mrb[39].mxu1 }
 0x141   :  { %v5714_v25 = vpack.c.bf16 %v907_v12, %v905_v13  ;;  %v911_v39 = vadd.f32 %v910_v28, %v622_v32 }
 0x143   :  { %7156 = vst [vmem:[#allocation40_spill] sm:$0xff] %v5714_v25  ;;  %v5716_v29 = vpack.c.bf16 %v911_v39, %v909_v20 }
 0x144   :  { %v4473_v46 = vpop.eup %4472 }
 0x145   :  { %7157 = vst [vmem:[#allocation41_spill] sm:$0xff] %v5716_v29  ;;  %v914_v33 = vpop.f32.mrb[40].mxu1  ;;  %v4475_v50 = vpop.eup %4474  ;;  %v1409_v13 = vadd.bf16 1065369472, %v4473_v46 }
 0x146   :  { %v915_v1 = vadd.f32 %v914_v33, %v618_v48  ;;  %v916_v17 = vpop.f32.mrb[41].mxu1  ;;  %v1401_v40 = vadd.bf16 1065369472, %v4475_v50 }
 0x147   :  { %v917_v53 = vadd.f32 %v916_v17, %v622_v32  ;;  %v918_v43 = vpop.f32.mrb[42].mxu1  ;;  %4476 = vrcp.bf16 %v1409_v13 }
 0x148   :  { %v919_v52 = vadd.f32 %v918_v43, %v618_v48  ;;  %v920_v9 = vpop.f32.mrb[43].mxu1  ;;  %4478 = vrcp.bf16 %v1401_v40 }
 0x149   :  { %v5718_v24 = vpack.c.bf16 %v917_v53, %v915_v1  ;;  %v921_v37 = vadd.f32 %v920_v9, %v622_v32  ;;  %v1145_v53 = vunpack.c.l.bf16 %v5684_v7  ;;  %v1146_v9 = vunpack.c.h.bf16 %v5684_v7 }
 0x14b   :  { %7158 = vst [vmem:[#allocation42_spill] sm:$0xff] %v5718_v24  ;;  %v5720_v35 = vpack.c.bf16 %v921_v37, %v919_v52  ;;  %v6176_v24 = vld [vmem:[%s7002_s5 + $0xe8] ss:$16 sps:$4 sm:$0xff]  }
 0x14c   :  { %7202 = vst [vmem:[#allocation55_spill] sm:$0xff] %v6176_v24 }
 0x14d   :  { %v924_v12 = vpop.f32.mrb[44].mxu1 }
 0x14e   :  { %v925_v28 = vadd.f32 %v924_v12, %v618_v48  ;;  %v926_v21 = vpop.f32.mrb[45].mxu1 }
 0x14f   :  { %v927_v20 = vadd.f32 %v926_v21, %v622_v32  ;;  %v928_v39 = vpop.f32.mrb[46].mxu1  ;;  %v1682_v21 = vpack.c.bf16 %v1678_v16, %v1678_v16 }
 0x150   :  { %v929_v33 = vadd.f32 %v928_v39, %v618_v48  ;;  %v930_v41 = vpop.f32.mrb[47].mxu1 }
 0x151   :  { %v5722_v17 = vpack.c.bf16 %v927_v20, %v925_v28  ;;  %v931_v43 = vadd.f32 %v930_v41, %v622_v32  ;;  %v1681_v28 = vpack.c.bf16 %v5706_v8, %v5706_v8  ;;  %v4070_v41 = vmul.bf16 3216621497, %v1682_v21 }
 0x152   :  { %v4477_v40 = vpop.eup %4476 }
 0x153   :  { %v4170_v1 = vpack.c.bf16 %v931_v43, %v929_v33  ;;  %v4069_v13 = vmul.bf16 3216621497, %v1681_v28  ;;  %v4479_v20 = vpop.eup %4478  ;;  %v1411_v39 = vmul.bf16 1065369472, %v4477_v40 }
 0x154   :  { %v1403_v7 = vmul.bf16 1065369472, %v4479_v20 }
 0x155   :  { %v1382_v52 = vpop.f32.mrb[48].mxu1  ;;  %v1412_v33 = vunpack.c.l.bf16 %v1411_v39  ;;  %v1434_v28 = vunpack.c.h.bf16 %v4170_v1 }
 0x156   :  { %v1391_v37 = vadd.f32 %v1382_v52, %v1145_v53  ;;  %v1384_v46 = vpop.f32.mrb[49].mxu1  ;;  %v1404_v16 = vunpack.c.l.bf16 %v1403_v7 }
 0x157   :  { %v1392_v12 = vadd.f32 %v1384_v46, %v1146_v9  ;;  %v1386_v25 = vpop.f32.mrb[50].mxu1  ;;  %v1423_v52 = vmul.f32 0.0, %v1412_v33 }
 0x158   :  { %v1395_v29 = vpack.c.bf16 %v1391_v37, %v1391_v37  ;;  %v1387_v50 = vpop.f32.mrb[51].mxu1 }
 0x159   :  { %v1396_v48 = vpack.c.bf16 %v1392_v12, %v1392_v12  ;;  %v1433_v50 = vunpack.c.l.bf16 %v4170_v1 }
 0x15a   :  { %4480 = vtanh.bf16 %v1395_v29 }
 0x15b   :  { %v4036_v32 = vmul.bf16 3216621497, %v1396_v48 }
 0x15d   :  { %4482 = vpow.bf16 %v4036_v32 }
 0x15e   :  { %4484 = vpow.bf16 %v4070_v41 }
 0x15f   :  { %4486 = vpow.bf16 %v4069_v13 }
 0x165   :  { %v4481_v25 = vpop.eup %4480 }
 0x166   :  { %v1414_v43 = vunpack.c.l.bf16 %v4481_v25 }
 0x168   :  { %v4483_v53 = vpop.eup %4482  ;;  %v1424_v9 = vmul.f32 %v1414_v43, %v1404_v16 }
 0x169   :  { %v1419_v37 = vadd.bf16 1065369472, %v4483_v53  ;;  %v4485_v29 = vpop.eup %4484 }
 0x16a   :  { %v5728_v8 = vadd.f32 %v1424_v9, %v1423_v52  ;;  %v4487_v46 = vpop.eup %4486  ;;  %v1697_v12 = vadd.bf16 1065369472, %v4485_v29 }
 0x16b   :  { %4488 = vrcp.bf16 %v1419_v37  ;;  %v1689_v21 = vadd.bf16 1065369472, %v4487_v46 }
 0x16c   :  { %4490 = vtanh.f32 %v5728_v8 }
 0x16d   :  { %4492 = vrcp.bf16 %v1697_v12  ;;  %v7159_v12 = vmov 0  }
 0x16e   :  { %4494 = vrcp.bf16 %v1689_v21 }
 0x175   :  { %v1670_v48 = vpop.f32.mrb[52].mxu1 }
 0x176   :  { %v4489_v32 = vpop.eup %4488  ;;  %v1679_v41 = vadd.f32 %v1670_v48, %v1433_v50  ;;  %v1672_v40 = vpop.f32.mrb[53].mxu1 }
 0x177   :  { %v1421_v13 = vmul.bf16 1065369472, %v4489_v32  ;;  %v1680_v20 = vadd.f32 %v1672_v40, %v1434_v28  ;;  %v1674_v39 = vpop.f32.mrb[54].mxu1  ;;  %v4491_v43 = vpop.eup %4490  ;;  %v7179_v40 = vld [vmem:[#allocation14_spill] sm:$0xff] }
 0x178   :  { %v1683_v7 = vpack.c.bf16 %v1679_v41, %v1679_v41  ;;  %v1675_v33 = vpop.f32.mrb[55].mxu1  ;;  %v4493_v9 = vpop.eup %4492  ;;  %v5876_v39 = vld [vmem:[%s7002_s5 + $0xe0] ss:$16 sps:$4 sm:$0xff]  }
 0x179   :  { %v1422_v25 = vunpack.c.l.bf16 %v1421_v13  ;;  %v1684_v16 = vpack.c.bf16 %v1680_v20, %v1680_v20  ;;  %v4495_v29 = vpop.eup %4494  ;;  %v1699_v1 = vmul.bf16 1065369472, %v4493_v9  ;;  %v5869_v13 = vld [vmem:[%s7002_s5 + $0xe4] ss:$16 sps:$4 sm:$0xff]   ;;  %v7181_v20 = vld [vmem:[#allocation15_spill] sm:$0xff] }
 0x17a   :  { %4496 = vtanh.bf16 %v1683_v7  ;;  %v1691_v46 = vmul.bf16 1065369472, %v4495_v29  ;;  %7180 = vst [vmem:[#allocation14_spill] sm:$0xff] %v5869_v13  ;;  %7182 = vst [vmem:[#allocation15_spill] sm:$0xff] %v5876_v39  ;;  %v7183_v7 = vld [vmem:[#allocation16_spill] sm:$0xff] }
 0x17b   :  { %v4071_v53 = vmul.bf16 3216621497, %v1684_v16  ;;  %v1427_v52 = vmul.f32 %v4491_v43, %v1422_v25  ;;  %v1700_v21 = vunpack.c.l.bf16 %v1699_v1  ;;  %v5883_v33 = vld [vmem:[%s7003_s6 + $0x4] ss:$16 sps:$4 sm:$0xff]   ;;  %v7185_v25 = vld [vmem:[#allocation17_spill] sm:$0xff]  ;;  %v7186_v16 = vld [vmem:[#allocation19_spill] sm:$0xff] }
 0x17c   :  { %7184 = vst [vmem:[#allocation16_spill] sm:$0xff] %v5883_v33  ;;  %v1724_v43 = vunpack.c.l.bf16 %v7186_v16  ;;  %v1725_v29 = vunpack.c.h.bf16 %v7186_v16 }
 0x17d   :  { %4498 = vpow.bf16 %v4071_v53  ;;  %v1716_v37 = vpack.c.bf16 %v1427_v52, %v1427_v52  ;;  %v1711_v28 = vmul.f32 0.0, %v1700_v21  ;;  %v7187_v53 = vld [vmem:[#allocation32_spill] sm:$0xff] }
 0x17e   :  { %v1726_v52 = vunpack.c.l.bf16 %v7187_v53  ;;  %v1727_v1 = vunpack.c.h.bf16 %v7187_v53 }
 0x17f   :  { %1717 = vst [vmem:[#allocation4] sm:$0xf] %v1716_v37  ;;  %1761 = vmatmul.mubr.bf16.vlgmr.msra.gmra.mrb[24].mxu0 %v1716_v37  ;;  %1802 = vmatmul.mubr.bf16.vlgmr.msra.gmra.mrb[56].mxu1 %v1716_v37 }
 0x180   :  { %1857 = vmatpush1.bf16.msra.mxu0 %v5208_v10  ;;  %1898 = vmatpush1.bf16.msra.mxu1 %v5473_v55  ;;  %v1692_v10 = vunpack.c.l.bf16 %v1691_v46 }
 0x181   :  { %1858 = vmatprep.subr.bf16.mxu0 %v5213_v11  ;;  %1899 = vmatprep.subr.bf16.mxu1 %v5479_v56 }
 0x182   :  { %1888 = vmatprep.mubr.bf16.mxu0 %v7159_v12  ;;  %1929 = vmatprep.mubr.bf16.mxu1 %v7159_v12 }
 0x184   :  { %1859 = vmatpush1.bf16.msra.mxu0 %v5228_v14  ;;  %1900 = vmatpush1.bf16.msra.mxu1 %v5488_v57 }
 0x185   :  { %v4497_v50 = vpop.eup %4496  ;;  %1860 = vmatprep.subr.bf16.mxu0 %v5234_v15  ;;  %1901 = vmatprep.subr.bf16.mxu1 %v5495_v58 }
 0x186   :  { %v1702_v48 = vunpack.c.l.bf16 %v4497_v50 }
 0x188   :  { %v4499_v11 = vpop.eup %4498  ;;  %v1712_v32 = vmul.f32 %v1702_v48, %v1692_v10  ;;  %1861 = vmatpush1.bf16.msra.mxu0 %v5247_v18  ;;  %1902 = vmatpush1.bf16.msra.mxu1 %v5501_v59  ;;  %v5827_v59 = vld [vmem:[%s7002_s5 + $0x84] ss:$16 sps:$4 sm:$0xff]  }
 0x189   :  { %v1707_v41 = vadd.bf16 1065369472, %v4499_v11  ;;  %1862 = vmatprep.subr.bf16.mxu0 %v5253_v19  ;;  %1903 = vmatprep.subr.bf16.mxu1 %v5507_v60  ;;  %v7169_v60 = vld [vmem:[#allocation9_spill] sm:$0xff] }
 0x18a   :  { %v5745_v14 = vadd.f32 %v1712_v32, %v1711_v28 }
 0x18b   :  { %4500 = vrcp.bf16 %v1707_v41 }
 0x18c   :  { %1863 = vmatpush1.bf16.msra.mxu0 %v5267_v22  ;;  %1904 = vmatpush1.bf16.msra.mxu1 %v5513_v61  ;;  %4502 = vtanh.f32 %v5745_v14  ;;  %v5834_v61 = vld [vmem:[%s7002_s5 + $0x80] ss:$16 sps:$4 sm:$0xff]  }
 0x18d   :  { %1864 = vmatprep.subr.bf16.mxu0 %v5273_v23  ;;  %1905 = vmatprep.subr.bf16.mxu1 %v5519_v62  ;;  %7170 = vst [vmem:[#allocation9_spill] sm:$0xff] %v5834_v61  ;;  %v7171_v62 = vld [vmem:[#allocation10_spill] sm:$0xff] }
 0x190   :  { %1865 = vmatpush1.bf16.msra.mxu0 %v5285_v26  ;;  %1906 = vmatpush1.bf16.msra.mxu1 %v5525_v63  ;;  %v5841_v63 = vld [vmem:[%s7002_s5 + $0xa4] ss:$16 sps:$4 sm:$0xff]  }
 0x191   :  { %1866 = vmatprep.subr.bf16.mxu0 %v5291_v27  ;;  %1907 = vmatprep.subr.bf16.mxu1 %v5531_v0  ;;  %v5769_v27 = vld [vmem:[%s7002_s5 + $0x4] ss:$16 sps:$4 sm:$0xff]   ;;  %7172 = vst [vmem:[#allocation10_spill] sm:$0xff] %v5841_v63  ;;  %v7173_v0 = vld [vmem:[#allocation11_spill] sm:$0xff] }
 0x194   :  { %1867 = vmatpush1.bf16.msra.mxu0 %v5305_v30  ;;  %1908 = vmatpush1.bf16.msra.mxu1 %v5537_v2  ;;  %v5776_v30 = vld [vmem:[%s7002_s5] ss:$16 sps:$4 sm:$0xff]  }
 0x195   :  { %1868 = vmatprep.subr.bf16.mxu0 %v5311_v31  ;;  %1909 = vmatprep.subr.bf16.mxu1 %v5543_v3  ;;  %v5783_v31 = vld [vmem:[%s7002_s5 + $0x24] ss:$16 sps:$4 sm:$0xff]   ;;  %v5848_v2 = vld [vmem:[%s7002_s5 + $0xa0] ss:$16 sps:$4 sm:$0xff]  }
 0x196   :  { %v4501_v15 = vpop.eup %4500  ;;  %7174 = vst [vmem:[#allocation11_spill] sm:$0xff] %v5848_v2  ;;  %v7175_v3 = vld [vmem:[#allocation12_spill] sm:$0xff] }
 0x197   :  { %v1709_v18 = vmul.bf16 1065369472, %v4501_v15  ;;  %v4503_v22 = vpop.eup %4502 }
 0x198   :  { %1869 = vmatpush1.bf16.msra.mxu0 %v5323_v36  ;;  %1910 = vmatpush1.bf16.msra.mxu1 %v5549_v4  ;;  %v5792_v36 = vld [vmem:[%s7002_s5 + $0x20] ss:$16 sps:$4 sm:$0xff]   ;;  %v5855_v4 = vld [vmem:[%s7002_s5 + $0xc4] ss:$16 sps:$4 sm:$0xff]  }
 0x199   :  { %v1710_v19 = vunpack.c.l.bf16 %v1709_v18  ;;  %1870 = vmatprep.subr.bf16.mxu0 %v5329_v38  ;;  %1911 = vmatprep.subr.bf16.mxu1 %v5555_v5  ;;  %7160 = vst [vmem:[#allocation43_spill] sm:$0xff] %v5792_v36  ;;  %v5799_v38 = vld [vmem:[%s7002_s5 + $0x44] ss:$16 sps:$4 sm:$0xff]   ;;  %7176 = vst [vmem:[#allocation12_spill] sm:$0xff] %v5855_v4  ;;  %v7177_v5 = vld [vmem:[#allocation13_spill] sm:$0xff] }
 0x19a   :  { %7161 = vst [vmem:[#allocation44_spill] sm:$0xff] %v5799_v38 }
 0x19b   :  { %v1715_v23 = vmul.f32 %v4503_v22, %v1710_v19 }
 0x19c   :  { %1871 = vmatpush1.bf16.msra.mxu0 %v5345_v45  ;;  %1912 = vmatpush1.bf16.msra.mxu1 %v5561_v6  ;;  %v7163_v45 = vld [vmem:[#allocation6_spill] sm:$0xff] }
 0x19d   :  { %v1718_v26 = vpack.c.bf16 %v1715_v23, %v1715_v23  ;;  %1990 = vmatprep.subr.bf16.mxu0 %v5769_v27  ;;  %2031 = vmatprep.subr.bf16.mxu1 %v5339_v42  ;;  %v5806_v42 = vld [vmem:[%s7002_s5 + $0x40] ss:$16 sps:$4 sm:$0xff]  }
 0x19e   :  { %7162 = vst [vmem:[#allocation45_spill] sm:$0xff] %v5806_v42  ;;  %v5862_v6 = vld [vmem:[%s7002_s5 + $0xc0] ss:$16 sps:$4 sm:$0xff]  }
 0x19f   :  { %1720 = vst [vmem:[#allocation5 + $0x1c] sm:$0xf] %v1718_v26  ;;  %1889 = vmatmul.mubr.bf16.vlgmr.msra.gmra.mrb[28].mxu0 %v1718_v26  ;;  %1930 = vmatmul.mubr.bf16.vlgmr.msra.gmra.mrb[60].mxu1 %v1718_v26  ;;  %7178 = vst [vmem:[#allocation13_spill] sm:$0xff] %v5862_v6 }
 0x1a0   :  { %1991 = vmatpush1.bf16.msra.mxu0 %v5776_v30  ;;  %2032 = vmatpush1.bf16.msra.mxu1 %v5351_v47  ;;  %v5813_v47 = vld [vmem:[%s7002_s5 + $0x64] ss:$16 sps:$4 sm:$0xff]  }
 0x1a1   :  { %1992 = vmatprep.subr.bf16.mxu0 %v5783_v31  ;;  %2033 = vmatprep.subr.bf16.mxu1 %v5357_v49  ;;  %7164 = vst [vmem:[#allocation6_spill] sm:$0xff] %v5813_v47  ;;  %v7165_v49 = vld [vmem:[#allocation7_spill] sm:$0xff] }
 0x1a2   :  { %2022 = vmatprep.mubr.bf16.mxu0 %v7159_v12  ;;  %2063 = vmatprep.mubr.bf16.mxu1 %v7159_v12 }
 0x1a4   :  { %1993 = vmatpush1.bf16.msra.mxu0 %v5792_v36  ;;  %2034 = vmatpush1.bf16.msra.mxu1 %v5366_v51  ;;  %v5820_v51 = vld [vmem:[%s7002_s5 + $0x60] ss:$16 sps:$4 sm:$0xff]  }
 0x1a5   :  { %1994 = vmatprep.subr.bf16.mxu0 %v5799_v38  ;;  %2035 = vmatprep.subr.bf16.mxu1 %v5373_v54  ;;  %7166 = vst [vmem:[#allocation7_spill] sm:$0xff] %v5820_v51  ;;  %v7167_v54 = vld [vmem:[#allocation8_spill] sm:$0xff] }
 0x1a6   :  { %7168 = vst [vmem:[#allocation8_spill] sm:$0xff] %v5827_v59 }
 0x1a8   :  { %1995 = vmatpush1.bf16.msra.mxu0 %v5806_v42  ;;  %2036 = vmatpush1.bf16.msra.mxu1 %v7163_v45 }
 0x1a9   :  { %1996 = vmatprep.subr.bf16.mxu0 %v5813_v47  ;;  %2037 = vmatprep.subr.bf16.mxu1 %v7165_v49 }
 0x1ac   :  { %1997 = vmatpush1.bf16.msra.mxu0 %v5820_v51  ;;  %2038 = vmatpush1.bf16.msra.mxu1 %v7167_v54 }
 0x1ad   :  { %1998 = vmatprep.subr.bf16.mxu0 %v5827_v59  ;;  %2039 = vmatprep.subr.bf16.mxu1 %v7169_v60 }
 0x1b0   :  { %1999 = vmatpush1.bf16.msra.mxu0 %v5834_v61  ;;  %2040 = vmatpush1.bf16.msra.mxu1 %v7171_v62 }
 0x1b1   :  { %2000 = vmatprep.subr.bf16.mxu0 %v5841_v63  ;;  %2041 = vmatprep.subr.bf16.mxu1 %v7173_v0 }
 0x1b4   :  { %2001 = vmatpush1.bf16.msra.mxu0 %v5848_v2  ;;  %2042 = vmatpush1.bf16.msra.mxu1 %v7175_v3 }
 0x1b5   :  { %2002 = vmatprep.subr.bf16.mxu0 %v5855_v4  ;;  %2043 = vmatprep.subr.bf16.mxu1 %v7177_v5 }
 0x1b8   :  { %2003 = vmatpush1.bf16.msra.mxu0 %v5862_v6  ;;  %2044 = vmatpush1.bf16.msra.mxu1 %v7179_v40 }
 0x1b9   :  { %2004 = vmatprep.subr.bf16.mxu0 %v5869_v13  ;;  %2045 = vmatprep.subr.bf16.mxu1 %v7181_v20  ;;  %v7188_v20 = vld [vmem:[#allocation30_spill] sm:$0xff] }
 0x1bc   :  { %2005 = vmatpush1.bf16.msra.mxu0 %v5876_v39  ;;  %2046 = vmatpush1.bf16.msra.mxu1 %v7183_v7  ;;  %v1852_v7 = vunpack.c.l.bf16 %v7188_v20 }
 0x1bd   :  { %2118 = vmatprep.subr.bf16.mxu0 %v5883_v33  ;;  %2159 = vmatprep.subr.bf16.mxu1 %v7185_v25  ;;  %v1854_v25 = vunpack.c.l.bf16 %v5722_v17 }
 0x252   :  { %v1762_v9 = vpop.f32.mrb[24].mxu0  ;;  %v1803_v37 = vpop.f32.mrb[56].mxu1 }
 0x253   :  { %v1810_v46 = vadd.f32 %v1762_v9, %v1724_v43  ;;  %v1812_v21 = vadd.f32 %v1803_v37, %v1726_v52  ;;  %v1764_v50 = vpop.f32.mrb[25].mxu0  ;;  %v1805_v10 = vpop.f32.mrb[57].mxu1  ;;  %v1853_v52 = vunpack.c.h.bf16 %v7188_v20  ;;  %v1855_v9 = vunpack.c.h.bf16 %v5722_v17 }
 0x254   :  { %v1811_v48 = vadd.f32 %v1764_v50, %v1725_v29  ;;  %v1813_v11 = vadd.f32 %v1805_v10, %v1727_v1  ;;  %v1766_v28 = vpop.f32.mrb[26].mxu0  ;;  %v1807_v32 = vpop.f32.mrb[58].mxu1 }
 0x255   :  { %v1814_v41 = vpack.c.bf16 %v1810_v46, %v1810_v46  ;;  %v1767_v15 = vpop.f32.mrb[27].mxu0  ;;  %v1808_v18 = vpop.f32.mrb[59].mxu1  ;;  %v1816_v49 = vpack.c.bf16 %v1812_v21, %v1812_v21 }
 0x256   :  { %v1815_v19 = vpack.c.bf16 %v1811_v48, %v1811_v48  ;;  %v1817_v26 = vpack.c.bf16 %v1813_v11, %v1813_v11 }
 0x257   :  { %v4072_v22 = vmul.bf16 3216621497, %v1814_v41 }
 0x258   :  { %v4073_v23 = vmul.bf16 3216621497, %v1815_v19  ;;  %v4074_v45 = vmul.bf16 3216621497, %v1817_v26 }
 0x259   :  { %4504 = vpow.bf16 %v4072_v22 }
 0x25a   :  { %4506 = vpow.bf16 %v4073_v23 }
 0x25b   :  { %4508 = vpow.bf16 %v4074_v45 }
 0x25c   :  { %4510 = vtanh.bf16 %v1816_v49 }
 0x264   :  { %v4505_v54 = vpop.eup %4504 }
 0x265   :  { %v4507_v60 = vpop.eup %4506  ;;  %v1822_v62 = vadd.bf16 1065369472, %v4505_v54 }
 0x266   :  { %v1830_v0 = vadd.bf16 1065369472, %v4507_v60  ;;  %v4509_v3 = vpop.eup %4508 }
 0x267   :  { %4512 = vrcp.bf16 %v1822_v62  ;;  %v1840_v5 = vadd.bf16 1065369472, %v4509_v3  ;;  %v4511_v40 = vpop.eup %4510 }
 0x268   :  { %4514 = vrcp.bf16 %v1830_v0  ;;  %v1835_v15 = vunpack.c.l.bf16 %v4511_v40 }
 0x269   :  { %4516 = vrcp.bf16 %v1840_v5 }
 0x272   :  { %v4513_v16 = vpop.eup %4512  ;;  %v1890_v43 = vpop.f32.mrb[28].mxu0 }
 0x273   :  { %v1931_v53 = vpop.f32.mrb[60].mxu1  ;;  %v4515_v37 = vpop.eup %4514  ;;  %v1824_v29 = vmul.bf16 1065369472, %v4513_v16  ;;  %v1938_v1 = vadd.f32 %v1890_v43, %v1852_v7 }
 0x274   :  { %v1940_v46 = vadd.f32 %v1931_v53, %v1854_v25  ;;  %v1892_v21 = vpop.f32.mrb[29].mxu0  ;;  %v1933_v50 = vpop.f32.mrb[61].mxu1  ;;  %v1832_v10 = vmul.bf16 1065369472, %v4515_v37  ;;  %v5902_v37 = vld [vmem:[%s7003_s6] ss:$16 sps:$4 sm:$0xff]  }
 0x275   :  { %v1939_v48 = vadd.f32 %v1892_v21, %v1853_v52  ;;  %v1941_v11 = vadd.f32 %v1933_v50, %v1855_v9  ;;  %v1894_v28 = vpop.f32.mrb[30].mxu0  ;;  %v1935_v32 = vpop.f32.mrb[62].mxu1  ;;  %v1825_v41 = vunpack.c.l.bf16 %v1824_v29  ;;  %v1942_v18 = vpack.c.bf16 %v1938_v1, %v1938_v1  ;;  %v5909_v29 = vld [vmem:[%s7003_s6 + $0x24] ss:$16 sps:$4 sm:$0xff]  }
 0x276   :  { %v1895_v19 = vpop.f32.mrb[31].mxu0  ;;  %v1936_v22 = vpop.f32.mrb[63].mxu1  ;;  %v1833_v23 = vunpack.c.l.bf16 %v1832_v10  ;;  %v1944_v40 = vpack.c.bf16 %v1940_v46, %v1940_v46  ;;  %v5918_v46 = vld [vmem:[%s7003_s6 + $0x20] ss:$16 sps:$4 sm:$0xff]   ;;  %v5925_v21 = vld [vmem:[%s7003_s6 + $0x44] ss:$16 sps:$4 sm:$0xff]  }
 0x277   :  { %v1943_v26 = vpack.c.bf16 %v1939_v48, %v1939_v48  ;;  %v1845_v17 = vmul.f32 %v1835_v15, %v1825_v41  ;;  %v4075_v45 = vmul.bf16 3216621497, %v1942_v18  ;;  %v1945_v60 = vpack.c.bf16 %v1941_v11, %v1941_v11  ;;  %v4517_v3 = vpop.eup %4516  ;;  %v5932_v11 = vld [vmem:[%s7003_s6 + $0x40] ss:$16 sps:$4 sm:$0xff]   ;;  %v5944_v32 = vld [vmem:[%s7003_s6 + $0x64] ss:$16 sps:$4 sm:$0xff]  }
 0x278   :  { %v1844_v49 = vmul.f32 %v1833_v23, %v5728_v8  ;;  %v1842_v5 = vmul.bf16 1065369472, %v4517_v3  ;;  %v5950_v41 = vld [vmem:[%s7003_s6 + $0x6c] ss:$16 sps:$4 sm:$0xff]   ;;  %v5957_v22 = vld [vmem:[%s7003_s6 + $0x60] ss:$16 sps:$4 sm:$0xff]  }
 0x279   :  { %v4076_v54 = vmul.bf16 3216621497, %v1943_v26  ;;  %4518 = vpow.bf16 %v4075_v45  ;;  %v4077_v0 = vmul.bf16 3216621497, %v1945_v60  ;;  %v5963_v23 = vld [vmem:[%s7003_s6 + $0x68] ss:$16 sps:$4 sm:$0xff]  }
 0x27a   :  { %v5896_v62 = vadd.f32 %v1845_v17, %v1844_v49  ;;  %v1843_v25 = vunpack.c.l.bf16 %v1842_v5  ;;  %v5969_v26 = vld [vmem:[%s7003_s6 + $0x84] ss:$16 sps:$4 sm:$0xff]   ;;  %v5984_v45 = vld [vmem:[%s7003_s6 + $0x80] ss:$16 sps:$4 sm:$0xff]   ;;  %v5990_v49 = vld [vmem:[%s7003_s6 + $0x88] ss:$16 sps:$4 sm:$0xff]  }
 0x27b   :  { %4520 = vpow.bf16 %v4076_v54  ;;  %v5996_v54 = vld [vmem:[%s7003_s6 + $0xa4] ss:$16 sps:$4 sm:$0xff]   ;;  %v6002_v60 = vld [vmem:[%s7003_s6 + $0xac] ss:$16 sps:$4 sm:$0xff]   ;;  %v6008_v3 = vld [vmem:[%s7003_s6 + $0xa0] ss:$16 sps:$4 sm:$0xff]  }
 0x27c   :  { %4522 = vtanh.f32 %v5896_v62  ;;  %v6014_v5 = vld [vmem:[%s7003_s6 + $0xa8] ss:$16 sps:$4 sm:$0xff]  }
 0x27d   :  { %4524 = vpow.bf16 %v4077_v0 }
 0x27e   :  { %4526 = vtanh.bf16 %v1944_v40 }
 0x284   :  { %v4519_v20 = vpop.eup %4518 }
 0x285   :  { %v1950_v16 = vadd.bf16 1065369472, %v4519_v20  ;;  %v6020_v20 = vld [vmem:[%s7003_s6 + $0xc4] ss:$16 sps:$4 sm:$0xff]  }
 0x286   :  { %v4521_v7 = vpop.eup %4520 }
 0x287   :  { %v4523_v43 = vpop.eup %4522  ;;  %v1958_v8 = vadd.bf16 1065369472, %v4521_v7  ;;  %4528 = vrcp.bf16 %v1950_v16  ;;  %v6026_v7 = vld [vmem:[%s7003_s6 + $0xcc] ss:$16 sps:$4 sm:$0xff]   ;;  %v6038_v16 = vld [vmem:[%s7003_s6 + $0xc8] ss:$16 sps:$4 sm:$0xff]  }
 0x288   :  { %v1848_v53 = vmul.f32 %v4523_v43, %v1843_v25  ;;  %v4525_v9 = vpop.eup %4524  ;;  %v6032_v25 = vld [vmem:[%s7003_s6 + $0xc0] ss:$16 sps:$4 sm:$0xff]  }
 0x289   :  { %4530 = vrcp.bf16 %v1958_v8  ;;  %v1968_v1 = vadd.bf16 1065369472, %v4525_v9  ;;  %v6044_v8 = vld [vmem:[%s7003_s6 + $0xe4] ss:$16 sps:$4 sm:$0xff]  }
 0x28a   :  { %v1977_v52 = vpack.c.bf16 %v1848_v53, %v1848_v53  ;;  %v6050_v53 = vld [vmem:[%s7003_s6 + $0xec] ss:$16 sps:$4 sm:$0xff]  }
 0x28b   :  { %4532 = vrcp.bf16 %v1968_v1  ;;  %v6056_v1 = vld [vmem:[%s7003_s6 + $0xe0] ss:$16 sps:$4 sm:$0xff]  }
 0x28c   :  { %1979 = vst [vmem:[#allocation4 + $0x4] sm:$0xf] %v1977_v52  ;;  %2023 = vmatmul.mubr.bf16.vlgmr.msra.gmra.mrb[32].mxu0 %v1977_v52  ;;  %2064 = vmatmul.mubr.bf16.vlgmr.msra.gmra.mrb[64].mxu1 %v1977_v52 }
 0x28d   :  { %2119 = vmatpush1.bf16.msra.mxu0 %v5902_v37  ;;  %2160 = vmatpush1.bf16.msra.mxu1 %v5473_v55  ;;  %v4527_v55 = vpop.eup %4526 }
 0x28e   :  { %2120 = vmatprep.subr.bf16.mxu0 %v5909_v29  ;;  %2161 = vmatprep.subr.bf16.mxu1 %v5479_v56  ;;  %v1963_v28 = vunpack.c.l.bf16 %v4527_v55  ;;  %v6062_v55 = vld [vmem:[%s7003_s6 + $0xe8] ss:$16 sps:$4 sm:$0xff]  }
 0x28f   :  { %2150 = vmatprep.mubr.bf16.mxu0 %v7159_v12  ;;  %2191 = vmatprep.mubr.bf16.mxu1 %v7159_v12 }
 0x291   :  { %2121 = vmatpush1.bf16.msra.mxu0 %v5918_v46  ;;  %2162 = vmatpush1.bf16.msra.mxu1 %v5488_v57  ;;  %v5938_v57 = vld [vmem:[%s7003_s6 + $0x48] ss:$16 sps:$4 sm:$0xff]  }
 0x292   :  { %2122 = vmatprep.subr.bf16.mxu0 %v5925_v21  ;;  %2163 = vmatprep.subr.bf16.mxu1 %v5495_v58  ;;  %v4529_v56 = vpop.eup %4528 }
 0x293   :  { %v1952_v10 = vmul.bf16 1065369472, %v4529_v56 }
 0x294   :  { %v4531_v50 = vpop.eup %4530 }
 0x295   :  { %v1960_v48 = vmul.bf16 1065369472, %v4531_v50  ;;  %2123 = vmatpush1.bf16.msra.mxu0 %v5932_v11  ;;  %2164 = vmatpush1.bf16.msra.mxu1 %v5938_v57  ;;  %v1953_v58 = vunpack.c.l.bf16 %v1952_v10  ;;  %v6069_v50 = vld [vmem:[%s7002_s5 + $0xc] ss:$16 sps:$4 sm:$0xff]   ;;  %v6076_v10 = vld [vmem:[%s7002_s5 + $0x8] ss:$16 sps:$4 sm:$0xff]  }
 0x296   :  { %2124 = vmatprep.subr.bf16.mxu0 %v5944_v32  ;;  %2165 = vmatprep.subr.bf16.mxu1 %v5950_v41  ;;  %v4533_v0 = vpop.eup %4532 }
 0x297   :  { %v1961_v15 = vunpack.c.l.bf16 %v1960_v48  ;;  %v1973_v18 = vmul.f32 %v1963_v28, %v1953_v58  ;;  %v1970_v40 = vmul.bf16 1065369472, %v4533_v0  ;;  %v6083_v48 = vld [vmem:[%s7002_s5 + $0x2c] ss:$16 sps:$4 sm:$0xff]   ;;  %v6092_v58 = vld [vmem:[%s7002_s5 + $0x28] ss:$16 sps:$4 sm:$0xff]  }
 0x298   :  { %7189 = vst [vmem:[#allocation17_spill] sm:$0xff] %v6083_v48  ;;  %7190 = vst [vmem:[#allocation19_spill] sm:$0xff] %v6092_v58  ;;  %v6099_v28 = vld [vmem:[%s7002_s5 + $0x4c] ss:$16 sps:$4 sm:$0xff]  }
 0x299   :  { %v1972_v19 = vmul.f32 %v1961_v15, %v5745_v14  ;;  %2125 = vmatpush1.bf16.msra.mxu0 %v5957_v22  ;;  %2166 = vmatpush1.bf16.msra.mxu1 %v5963_v23  ;;  %v5975_v14 = vld [vmem:[%s7003_s6 + $0x8c] ss:$16 sps:$4 sm:$0xff]   ;;  %v1971_v43 = vunpack.c.l.bf16 %v1970_v40  ;;  %7191 = vst [vmem:[#allocation32_spill] sm:$0xff] %v6099_v28  ;;  %v6106_v15 = vld [vmem:[%s7002_s5 + $0x48] ss:$16 sps:$4 sm:$0xff]  }
 0x29a   :  { %2126 = vmatprep.subr.bf16.mxu0 %v5969_v26  ;;  %2167 = vmatprep.subr.bf16.mxu1 %v5975_v14  ;;  %7192 = vst [vmem:[#allocation30_spill] sm:$0xff] %v6106_v15  ;;  %v6127_v0 = vld [vmem:[%s7002_s5 + $0x8c] ss:$16 sps:$4 sm:$0xff]   ;;  %v6134_v40 = vld [vmem:[%s7002_s5 + $0x88] ss:$16 sps:$4 sm:$0xff]  }
 0x29b   :  { %v5978_v17 = vadd.f32 %v1973_v18, %v1972_v19  ;;  %v6113_v18 = vld [vmem:[%s7002_s5 + $0x6c] ss:$16 sps:$4 sm:$0xff]   ;;  %v6120_v19 = vld [vmem:[%s7002_s5 + $0x68] ss:$16 sps:$4 sm:$0xff]   ;;  %7195 = vst [vmem:[#allocation48_spill] sm:$0xff] %v6127_v0  ;;  %7196 = vst [vmem:[#allocation49_spill] sm:$0xff] %v6134_v40 }
 0x29c   :  { %7193 = vst [vmem:[#allocation46_spill] sm:$0xff] %v6113_v18  ;;  %7194 = vst [vmem:[#allocation47_spill] sm:$0xff] %v6120_v19 }
 0x29d   :  { %4534 = vtanh.f32 %v5978_v17  ;;  %2127 = vmatpush1.bf16.msra.mxu0 %v5984_v45  ;;  %2168 = vmatpush1.bf16.msra.mxu1 %v5990_v49 }
 0x29e   :  { %2128 = vmatprep.subr.bf16.mxu0 %v5996_v54  ;;  %2169 = vmatprep.subr.bf16.mxu1 %v6002_v60 }
 0x2a1   :  { %2129 = vmatpush1.bf16.msra.mxu0 %v6008_v3  ;;  %2170 = vmatpush1.bf16.msra.mxu1 %v6014_v5 }
 0x2a2   :  { %2130 = vmatprep.subr.bf16.mxu0 %v6020_v20  ;;  %2171 = vmatprep.subr.bf16.mxu1 %v6026_v7 }
 0x2a5   :  { %2131 = vmatpush1.bf16.msra.mxu0 %v6032_v25  ;;  %2172 = vmatpush1.bf16.msra.mxu1 %v6038_v16 }
 0x2a6   :  { %2132 = vmatprep.subr.bf16.mxu0 %v6044_v8  ;;  %2173 = vmatprep.subr.bf16.mxu1 %v6050_v53 }
 0x2a7   :  { %v4535_v52 = vpop.eup %4534 }
 0x2a8   :  { %v1976_v9 = vmul.f32 %v4535_v52, %v1971_v43  ;;  %v6141_v43 = vld [vmem:[%s7002_s5 + $0xac] ss:$16 sps:$4 sm:$0xff]   ;;  %v6148_v52 = vld [vmem:[%s7002_s5 + $0xa8] ss:$16 sps:$4 sm:$0xff]  }
 0x2a9   :  { %2133 = vmatpush1.bf16.msra.mxu0 %v6056_v1  ;;  %2174 = vmatpush1.bf16.msra.mxu1 %v6062_v55  ;;  %7197 = vst [vmem:[#allocation50_spill] sm:$0xff] %v6141_v43  ;;  %7198 = vst [vmem:[#allocation51_spill] sm:$0xff] %v6148_v52 }
 0x2aa   :  { %v1980_v56 = vpack.c.bf16 %v1976_v9, %v1976_v9  ;;  %2252 = vmatprep.subr.bf16.mxu0 %v5769_v27  ;;  %2293 = vmatprep.subr.bf16.mxu1 %v6069_v50  ;;  %v6155_v9 = vld [vmem:[%s7002_s5 + $0xcc] ss:$16 sps:$4 sm:$0xff]  }
 0x2ab   :  { %7199 = vst [vmem:[#allocation52_spill] sm:$0xff] %v6155_v9 }
 0x2ac   :  { %1982 = vst [vmem:[#allocation5 + $0x18] sm:$0xf] %v1980_v56  ;;  %2151 = vmatmul.mubr.bf16.vlgmr.msra.gmra.mrb[36].mxu0 %v1980_v56  ;;  %2192 = vmatmul.mubr.bf16.vlgmr.msra.gmra.mrb[68].mxu1 %v1980_v56  ;;  %v6162_v56 = vld [vmem:[%s7002_s5 + $0xc8] ss:$16 sps:$4 sm:$0xff]  }
 0x2ad   :  { %2253 = vmatpush1.bf16.msra.mxu0 %v5776_v30  ;;  %2294 = vmatpush1.bf16.msra.mxu1 %v6076_v10  ;;  %7200 = vst [vmem:[#allocation53_spill] sm:$0xff] %v6162_v56 }
 0x2ae   :  { %2254 = vmatprep.subr.bf16.mxu0 %v5783_v31  ;;  %2295 = vmatprep.subr.bf16.mxu1 %v6083_v48 }
 0x2af   :  { %2284 = vmatprep.mubr.bf16.mxu0 %v7159_v12  ;;  %2325 = vmatprep.mubr.bf16.mxu1 %v7159_v12 }
 0x2b1   :  { %2255 = vmatpush1.bf16.msra.mxu0 %v5792_v36  ;;  %2296 = vmatpush1.bf16.msra.mxu1 %v6092_v58 }
 0x2b2   :  { %2256 = vmatprep.subr.bf16.mxu0 %v5799_v38  ;;  %2297 = vmatprep.subr.bf16.mxu1 %v6099_v28 }
 0x2b5   :  { %2257 = vmatpush1.bf16.msra.mxu0 %v5806_v42  ;;  %2298 = vmatpush1.bf16.msra.mxu1 %v6106_v15 }
 0x2b6   :  { %2258 = vmatprep.subr.bf16.mxu0 %v5813_v47  ;;  %2299 = vmatprep.subr.bf16.mxu1 %v6113_v18 }
 0x2b9   :  { %2259 = vmatpush1.bf16.msra.mxu0 %v5820_v51  ;;  %2300 = vmatpush1.bf16.msra.mxu1 %v6120_v19 }
 0x2ba   :  { %2260 = vmatprep.subr.bf16.mxu0 %v5827_v59  ;;  %2301 = vmatprep.subr.bf16.mxu1 %v6127_v0 }
 0x2bd   :  { %2261 = vmatpush1.bf16.msra.mxu0 %v5834_v61  ;;  %2302 = vmatpush1.bf16.msra.mxu1 %v6134_v40 }
 0x2be   :  { %2262 = vmatprep.subr.bf16.mxu0 %v5841_v63  ;;  %2303 = vmatprep.subr.bf16.mxu1 %v6141_v43 }
 0x2c1   :  { %2263 = vmatpush1.bf16.msra.mxu0 %v5848_v2  ;;  %2304 = vmatpush1.bf16.msra.mxu1 %v6148_v52  ;;  %v1989_v52 = vunpack.c.h.bf16 %v5688_v34 }
 0x2c2   :  { %2264 = vmatprep.subr.bf16.mxu0 %v5855_v4  ;;  %2305 = vmatprep.subr.bf16.mxu1 %v6155_v9 }
 0x2c5   :  { %2265 = vmatpush1.bf16.msra.mxu0 %v5862_v6  ;;  %2306 = vmatpush1.bf16.msra.mxu1 %v6162_v56  ;;  %v7204_v56 = vld [vmem:[#allocation21_spill] sm:$0xff] }
 0x2c6   :  { %2266 = vmatprep.subr.bf16.mxu0 %v5869_v13  ;;  %2307 = vmatprep.subr.bf16.mxu1 %v6169_v44  ;;  %v6183_v13 = vld [vmem:[%s7003_s6 + $0xc] ss:$16 sps:$4 sm:$0xff]   ;;  %v1986_v44 = vunpack.c.l.bf16 %v7204_v56  ;;  %v1987_v4 = vunpack.c.h.bf16 %v7204_v56 }
 0x2c7   :  { %7203 = vst [vmem:[#allocation56_spill] sm:$0xff] %v6183_v13 }
 0x2c9   :  { %2267 = vmatpush1.bf16.msra.mxu0 %v5876_v39  ;;  %2308 = vmatpush1.bf16.msra.mxu1 %v6176_v24  ;;  %v1988_v39 = vunpack.c.l.bf16 %v5688_v34 }
 0x2ca   :  { %2380 = vmatprep.subr.bf16.mxu0 %v5883_v33  ;;  %2421 = vmatprep.subr.bf16.mxu1 %v6183_v13 }
 0x35f   :  { %v2024_v6 = vpop.f32.mrb[32].mxu0  ;;  %v2065_v9 = vpop.f32.mrb[64].mxu1 }
 0x360   :  { %v2072_v24 = vadd.f32 %v2024_v6, %v1986_v44  ;;  %v2074_v2 = vadd.f32 %v2065_v9, %v1988_v39  ;;  %v2026_v33 = vpop.f32.mrb[33].mxu0  ;;  %v2067_v43 = vpop.f32.mrb[65].mxu1 }
 0x361   :  { %v2073_v63 = vadd.f32 %v2026_v33, %v1987_v4  ;;  %v2075_v40 = vadd.f32 %v2067_v43, %v1989_v52  ;;  %v2028_v61 = vpop.f32.mrb[34].mxu0  ;;  %v2069_v0 = vpop.f32.mrb[66].mxu1  ;;  %v7205_v33 = vld [vmem:[#allocation28_spill] sm:$0xff] }
 0x362   :  { %v2076_v59 = vpack.c.bf16 %v2072_v24, %v2072_v24  ;;  %v2029_v13 = vpop.f32.mrb[35].mxu0  ;;  %v2070_v19 = vpop.f32.mrb[67].mxu1  ;;  %v2078_v34 = vpack.c.bf16 %v2074_v2, %v2074_v2  ;;  %v2117_v2 = vunpack.c.h.bf16 %v5720_v35 }
 0x363   :  { %v2077_v51 = vpack.c.bf16 %v2073_v63, %v2073_v63  ;;  %v2079_v15 = vpack.c.bf16 %v2075_v40, %v2075_v40  ;;  %v2114_v63 = vunpack.c.l.bf16 %v7205_v33 }
 0x364   :  { %v4078_v18 = vmul.bf16 3216621497, %v2076_v59 }
 0x365   :  { %v4079_v47 = vmul.bf16 3216621497, %v2077_v51  ;;  %v4080_v56 = vmul.bf16 3216621497, %v2079_v15  ;;  %v2116_v51 = vunpack.c.l.bf16 %v5720_v35  ;;  %v2115_v15 = vunpack.c.h.bf16 %v7205_v33 }
 0x366   :  { %4536 = vpow.bf16 %v4078_v18 }
 0x367   :  { %4538 = vpow.bf16 %v4079_v47 }
 0x368   :  { %4540 = vpow.bf16 %v4080_v56 }
 0x369   :  { %4542 = vtanh.bf16 %v2078_v34 }
 0x371   :  { %v4537_v44 = vpop.eup %4536 }
 0x372   :  { %v4539_v6 = vpop.eup %4538  ;;  %v2084_v39 = vadd.bf16 1065369472, %v4537_v44 }
 0x373   :  { %v2092_v4 = vadd.bf16 1065369472, %v4539_v6  ;;  %v4541_v61 = vpop.eup %4540 }
 0x374   :  { %4544 = vrcp.bf16 %v2084_v39  ;;  %v2102_v24 = vadd.bf16 1065369472, %v4541_v61  ;;  %v4543_v13 = vpop.eup %4542 }
 0x375   :  { %4546 = vrcp.bf16 %v2092_v4  ;;  %v2097_v61 = vunpack.c.l.bf16 %v4543_v13 }
 0x376   :  { %4548 = vrcp.bf16 %v2102_v24 }
 0x37f   :  { %v4545_v59 = vpop.eup %4544  ;;  %v2152_v18 = vpop.f32.mrb[36].mxu0 }
 0x380   :  { %v2193_v47 = vpop.f32.mrb[68].mxu1  ;;  %v4547_v19 = vpop.eup %4546  ;;  %v2086_v0 = vmul.bf16 1065369472, %v4545_v59  ;;  %v2200_v40 = vadd.f32 %v2152_v18, %v2114_v63 }
 0x381   :  { %v2202_v43 = vadd.f32 %v2193_v47, %v2116_v51  ;;  %v2154_v52 = vpop.f32.mrb[37].mxu0  ;;  %v2195_v9 = vpop.f32.mrb[69].mxu1  ;;  %v2094_v56 = vmul.bf16 1065369472, %v4547_v19 }
 0x382   :  { %v2201_v34 = vadd.f32 %v2154_v52, %v2115_v15  ;;  %v2203_v44 = vadd.f32 %v2195_v9, %v2117_v2  ;;  %v2156_v6 = vpop.f32.mrb[38].mxu0  ;;  %v2197_v39 = vpop.f32.mrb[70].mxu1  ;;  %v2087_v4 = vunpack.c.l.bf16 %v2086_v0  ;;  %v2204_v42 = vpack.c.bf16 %v2200_v40, %v2200_v40  ;;  %v6202_v40 = vld [vmem:[%s7003_s6 + $0x8] ss:$16 sps:$4 sm:$0xff]  }
 0x383   :  { %v2157_v28 = vpop.f32.mrb[39].mxu0  ;;  %v2198_v38 = vpop.f32.mrb[71].mxu1  ;;  %v2095_v33 = vunpack.c.l.bf16 %v2094_v56  ;;  %v6218_v9 = vld [vmem:[%s7003_s6 + $0x28] ss:$16 sps:$4 sm:$0xff]  }
 0x384   :  { %v2205_v58 = vpack.c.bf16 %v2201_v34, %v2201_v34  ;;  %v2107_v35 = vmul.f32 %v2097_v61, %v2087_v4  ;;  %v4081_v36 = vmul.bf16 3216621497, %v2204_v42  ;;  %v2207_v51 = vpack.c.bf16 %v2203_v44, %v2203_v44  ;;  %v4549_v47 = vpop.eup %4548  ;;  %v6225_v34 = vld [vmem:[%s7003_s6 + $0x4c] ss:$16 sps:$4 sm:$0xff]  }
 0x385   :  { %v2106_v24 = vmul.f32 %v2095_v33, %v5896_v62  ;;  %v2104_v13 = vmul.bf16 1065369472, %v4549_v47  ;;  %v2206_v28 = vpack.c.bf16 %v2202_v43, %v2202_v43  ;;  %v6209_v43 = vld [vmem:[%s7003_s6 + $0x2c] ss:$16 sps:$4 sm:$0xff]  }
 0x386   :  { %v4082_v63 = vmul.bf16 3216621497, %v2205_v58  ;;  %4550 = vpow.bf16 %v4081_v36  ;;  %v4083_v18 = vmul.bf16 3216621497, %v2207_v51 }
 0x387   :  { %v6195_v59 = vadd.f32 %v2107_v35, %v2106_v24  ;;  %v2105_v2 = vunpack.c.l.bf16 %v2104_v13 }
 0x388   :  { %4552 = vpow.bf16 %v4082_v63 }
 0x389   :  { %4554 = vtanh.f32 %v6195_v59 }
 0x38a   :  { %4556 = vpow.bf16 %v4083_v18 }
 0x38b   :  { %4558 = vtanh.bf16 %v2206_v28 }
 0x391   :  { %v4551_v38 = vpop.eup %4550 }
 0x392   :  { %v2212_v19 = vadd.bf16 1065369472, %v4551_v38 }
 0x393   :  { %v4553_v15 = vpop.eup %4552 }
 0x394   :  { %v4555_v42 = vpop.eup %4554  ;;  %v2220_v62 = vadd.bf16 1065369472, %v4553_v15  ;;  %4560 = vrcp.bf16 %v2212_v19  ;;  %v7206_v15 = vld [vmem:[#allocation43_spill] sm:$0xff]  ;;  %v7209_v19 = vld [vmem:[#allocation32_spill] sm:$0xff] }
 0x395   :  { %v2110_v36 = vmul.f32 %v4555_v42, %v2105_v2  ;;  %v4557_v0 = vpop.eup %4556  ;;  %v7208_v2 = vld [vmem:[#allocation44_spill] sm:$0xff]  ;;  %v7210_v42 = vld [vmem:[#allocation45_spill] sm:$0xff] }
 0x396   :  { %4562 = vrcp.bf16 %v2220_v62  ;;  %v2230_v52 = vadd.bf16 1065369472, %v4557_v0  ;;  %v4559_v56 = vpop.eup %4558  ;;  %v7212_v62 = vld [vmem:[#allocation6_spill] sm:$0xff]  ;;  %v7216_v0 = vld [vmem:[#allocation8_spill] sm:$0xff] }
 0x397   :  { %v2239_v58 = vpack.c.bf16 %v2110_v36, %v2110_v36  ;;  %v2225_v33 = vunpack.c.l.bf16 %v4559_v56  ;;  %v7214_v36 = vld [vmem:[#allocation7_spill] sm:$0xff]  ;;  %v7218_v56 = vld [vmem:[#allocation9_spill] sm:$0xff] }
 0x398   :  { %4564 = vrcp.bf16 %v2230_v52  ;;  %v7217_v52 = vld [vmem:[#allocation48_spill] sm:$0xff] }
 0x399   :  { %2241 = vst [vmem:[#allocation4 + $0x8] sm:$0xf] %v2239_v58  ;;  %2285 = vmatmul.mubr.bf16.vlgmr.msra.gmra.mrb[40].mxu0 %v2239_v58  ;;  %2326 = vmatmul.mubr.bf16.vlgmr.msra.gmra.mrb[72].mxu1 %v2239_v58  ;;  %v7215_v58 = vld [vmem:[#allocation47_spill] sm:$0xff] }
 0x39a   :  { %2381 = vmatpush1.bf16.msra.mxu0 %v5902_v37  ;;  %2422 = vmatpush1.bf16.msra.mxu1 %v6202_v40 }
 0x39b   :  { %2382 = vmatprep.subr.bf16.mxu0 %v5909_v29  ;;  %2423 = vmatprep.subr.bf16.mxu1 %v6209_v43 }
 0x39c   :  { %2412 = vmatprep.mubr.bf16.mxu0 %v7159_v12  ;;  %2453 = vmatprep.mubr.bf16.mxu1 %v7159_v12 }
 0x39e   :  { %2383 = vmatpush1.bf16.msra.mxu0 %v5918_v46  ;;  %2424 = vmatpush1.bf16.msra.mxu1 %v6218_v9 }
 0x39f   :  { %2384 = vmatprep.subr.bf16.mxu0 %v5925_v21  ;;  %2425 = vmatprep.subr.bf16.mxu1 %v6225_v34  ;;  %v4561_v44 = vpop.eup %4560 }
 0x3a0   :  { %v2214_v39 = vmul.bf16 1065369472, %v4561_v44  ;;  %v7219_v44 = vld [vmem:[#allocation49_spill] sm:$0xff] }
 0x3a1   :  { %v4563_v6 = vpop.eup %4562 }
 0x3a2   :  { %v2222_v4 = vmul.bf16 1065369472, %v4563_v6  ;;  %2385 = vmatpush1.bf16.msra.mxu0 %v5932_v11  ;;  %2426 = vmatpush1.bf16.msra.mxu1 %v5938_v57  ;;  %v2215_v61 = vunpack.c.l.bf16 %v2214_v39  ;;  %v7220_v6 = vld [vmem:[#allocation10_spill] sm:$0xff] }
 0x3a3   :  { %2386 = vmatprep.subr.bf16.mxu0 %v5944_v32  ;;  %2427 = vmatprep.subr.bf16.mxu1 %v5950_v41  ;;  %v7221_v39 = vld [vmem:[#allocation50_spill] sm:$0xff] }
 0x3a4   :  { %v2223_v35 = vunpack.c.l.bf16 %v2222_v4  ;;  %v2235_v24 = vmul.f32 %v2225_v33, %v2215_v61  ;;  %v7222_v4 = vld [vmem:[#allocation11_spill] sm:$0xff]  ;;  %v7224_v33 = vld [vmem:[#allocation12_spill] sm:$0xff] }
 0x3a5   :  { %v7223_v61 = vld [vmem:[#allocation51_spill] sm:$0xff] }
 0x3a6   :  { %v2234_v63 = vmul.f32 %v2223_v35, %v5978_v17  ;;  %2387 = vmatpush1.bf16.msra.mxu0 %v5957_v22  ;;  %2428 = vmatpush1.bf16.msra.mxu1 %v5963_v23  ;;  %v4565_v17 = vpop.eup %4564  ;;  %v7225_v35 = vld [vmem:[#allocation52_spill] sm:$0xff] }
 0x3a7   :  { %2388 = vmatprep.subr.bf16.mxu0 %v5969_v26  ;;  %2429 = vmatprep.subr.bf16.mxu1 %v5975_v14  ;;  %v2232_v18 = vmul.bf16 1065369472, %v4565_v17  ;;  %v7228_v17 = vld [vmem:[#allocation14_spill] sm:$0xff] }
 0x3a8   :  { %v6237_v51 = vadd.f32 %v2235_v24, %v2234_v63  ;;  %v7226_v24 = vld [vmem:[#allocation13_spill] sm:$0xff] }
 0x3a9   :  { %v2233_v47 = vunpack.c.l.bf16 %v2232_v18  ;;  %v7227_v63 = vld [vmem:[#allocation53_spill] sm:$0xff]  ;;  %v7229_v18 = vld [vmem:[#allocation54_spill] sm:$0xff] }
 0x3aa   :  { %4566 = vtanh.f32 %v6237_v51  ;;  %2389 = vmatpush1.bf16.msra.mxu0 %v5984_v45  ;;  %2430 = vmatpush1.bf16.msra.mxu1 %v5990_v49 }
 0x3ab   :  { %2390 = vmatprep.subr.bf16.mxu0 %v5996_v54  ;;  %2431 = vmatprep.subr.bf16.mxu1 %v6002_v60 }
 0x3ae   :  { %2391 = vmatpush1.bf16.msra.mxu0 %v6008_v3  ;;  %2432 = vmatpush1.bf16.msra.mxu1 %v6014_v5 }
 0x3af   :  { %2392 = vmatprep.subr.bf16.mxu0 %v6020_v20  ;;  %2433 = vmatprep.subr.bf16.mxu1 %v6026_v7 }
 0x3b2   :  { %2393 = vmatpush1.bf16.msra.mxu0 %v6032_v25  ;;  %2434 = vmatpush1.bf16.msra.mxu1 %v6038_v16 }
 0x3b3   :  { %2394 = vmatprep.subr.bf16.mxu0 %v6044_v8  ;;  %2435 = vmatprep.subr.bf16.mxu1 %v6050_v53 }
 0x3b4   :  { %v4567_v13 = vpop.eup %4566 }
 0x3b5   :  { %v2238_v28 = vmul.f32 %v4567_v13, %v2233_v47  ;;  %v7230_v47 = vld [vmem:[#allocation15_spill] sm:$0xff] }
 0x3b6   :  { %2395 = vmatpush1.bf16.msra.mxu0 %v6056_v1  ;;  %2436 = vmatpush1.bf16.msra.mxu1 %v6062_v55  ;;  %v7231_v13 = vld [vmem:[#allocation55_spill] sm:$0xff] }
 0x3b7   :  { %v2242_v38 = vpack.c.bf16 %v2238_v28, %v2238_v28  ;;  %2514 = vmatprep.subr.bf16.mxu0 %v5769_v27  ;;  %2555 = vmatprep.subr.bf16.mxu1 %v6069_v50  ;;  %v7207_v27 = vld [vmem:[#allocation19_spill] sm:$0xff]  ;;  %v7232_v28 = vld [vmem:[#allocation16_spill] sm:$0xff] }
 0x3b9   :  { %2244 = vst [vmem:[#allocation5 + $0x14] sm:$0xf] %v2242_v38  ;;  %2413 = vmatmul.mubr.bf16.vlgmr.msra.gmra.mrb[44].mxu0 %v2242_v38  ;;  %2454 = vmatmul.mubr.bf16.vlgmr.msra.gmra.mrb[76].mxu1 %v2242_v38  ;;  %v7233_v38 = vld [vmem:[#allocation56_spill] sm:$0xff] }
 0x3ba   :  { %2515 = vmatpush1.bf16.msra.mxu0 %v5776_v30  ;;  %2556 = vmatpush1.bf16.msra.mxu1 %v6076_v10  ;;  %v7211_v30 = vld [vmem:[#allocation30_spill] sm:$0xff] }
 0x3bb   :  { %2516 = vmatprep.subr.bf16.mxu0 %v5783_v31  ;;  %2557 = vmatprep.subr.bf16.mxu1 %v6083_v48  ;;  %v7213_v31 = vld [vmem:[#allocation46_spill] sm:$0xff] }
 0x3bc   :  { %2546 = vmatprep.mubr.bf16.mxu0 %v7159_v12  ;;  %2587 = vmatprep.mubr.bf16.mxu1 %v7159_v12 }
 0x3be   :  { %2517 = vmatpush1.bf16.msra.mxu0 %v7206_v15  ;;  %2558 = vmatpush1.bf16.msra.mxu1 %v7207_v27  ;;  %v7234_v15 = vld [vmem:[#allocation23_spill] sm:$0xff] }
 0x3bf   :  { %2518 = vmatprep.subr.bf16.mxu0 %v7208_v2  ;;  %2559 = vmatprep.subr.bf16.mxu1 %v7209_v19  ;;  %v2248_v2 = vunpack.c.l.bf16 %v7234_v15 }
 0x3c2   :  { %2519 = vmatpush1.bf16.msra.mxu0 %v7210_v42  ;;  %2560 = vmatpush1.bf16.msra.mxu1 %v7211_v30  ;;  %v7235_v42 = vld [vmem:[#allocation33_spill] sm:$0xff] }
 0x3c3   :  { %2520 = vmatprep.subr.bf16.mxu0 %v7212_v62  ;;  %2561 = vmatprep.subr.bf16.mxu1 %v7213_v31  ;;  %v2250_v62 = vunpack.c.l.bf16 %v7235_v42 }
 0x3c6   :  { %2521 = vmatpush1.bf16.msra.mxu0 %v7214_v36  ;;  %2562 = vmatpush1.bf16.msra.mxu1 %v7215_v58 }
 0x3c7   :  { %2522 = vmatprep.subr.bf16.mxu0 %v7216_v0  ;;  %2563 = vmatprep.subr.bf16.mxu1 %v7217_v52 }
 0x3ca   :  { %2523 = vmatpush1.bf16.msra.mxu0 %v7218_v56  ;;  %2564 = vmatpush1.bf16.msra.mxu1 %v7219_v44  ;;  %v2249_v56 = vunpack.c.h.bf16 %v7234_v15 }
 0x3cb   :  { %2524 = vmatprep.subr.bf16.mxu0 %v7220_v6  ;;  %2565 = vmatprep.subr.bf16.mxu1 %v7221_v39  ;;  %v2251_v6 = vunpack.c.h.bf16 %v7235_v42 }
 0x3ce   :  { %2525 = vmatpush1.bf16.msra.mxu0 %v7222_v4  ;;  %2566 = vmatpush1.bf16.msra.mxu1 %v7223_v61 }
 0x3cf   :  { %2526 = vmatprep.subr.bf16.mxu0 %v7224_v33  ;;  %2567 = vmatprep.subr.bf16.mxu1 %v7225_v35 }
 0x3d2   :  { %2527 = vmatpush1.bf16.msra.mxu0 %v7226_v24  ;;  %2568 = vmatpush1.bf16.msra.mxu1 %v7227_v63 }
 0x3d3   :  { %2528 = vmatprep.subr.bf16.mxu0 %v7228_v17  ;;  %2569 = vmatprep.subr.bf16.mxu1 %v7229_v18 }
 0x3d6   :  { %2529 = vmatpush1.bf16.msra.mxu0 %v7230_v47  ;;  %2570 = vmatpush1.bf16.msra.mxu1 %v7231_v13 }
 0x3d7   :  { %2642 = vmatprep.subr.bf16.mxu0 %v7232_v28  ;;  %2683 = vmatprep.subr.bf16.mxu1 %v7233_v38 }
 0x46c   :  { %v2286_v36 = vpop.f32.mrb[40].mxu0  ;;  %v2327_v0 = vpop.f32.mrb[72].mxu1 }
 0x46d   :  { %v2334_v4 = vadd.f32 %v2286_v36, %v2248_v2  ;;  %v2336_v33 = vadd.f32 %v2327_v0, %v2250_v62  ;;  %v2288_v24 = vpop.f32.mrb[41].mxu0  ;;  %v2329_v17 = vpop.f32.mrb[73].mxu1 }
 0x46e   :  { %v2335_v47 = vadd.f32 %v2288_v24, %v2249_v56  ;;  %v2337_v13 = vadd.f32 %v2329_v17, %v2251_v6  ;;  %v2290_v18 = vpop.f32.mrb[42].mxu0  ;;  %v2331_v28 = vpop.f32.mrb[74].mxu1 }
 0x46f   :  { %v2338_v63 = vpack.c.bf16 %v2334_v4, %v2334_v4  ;;  %v2291_v38 = vpop.f32.mrb[43].mxu0  ;;  %v2332_v35 = vpop.f32.mrb[75].mxu1  ;;  %v2340_v42 = vpack.c.bf16 %v2336_v33, %v2336_v33 }
 0x470   :  { %v2339_v61 = vpack.c.bf16 %v2335_v47, %v2335_v47  ;;  %v2341_v52 = vpack.c.bf16 %v2337_v13, %v2337_v13  ;;  %v7236_v35 = vld [vmem:[#allocation26_spill] sm:$0xff] }
 0x471   :  { %v4084_v39 = vmul.bf16 3216621497, %v2338_v63  ;;  %v2376_v6 = vunpack.c.l.bf16 %v7236_v35  ;;  %v7237_v63 = vld [vmem:[#allocation42_spill] sm:$0xff] }
 0x472   :  { %v4085_v44 = vmul.bf16 3216621497, %v2339_v61  ;;  %v4086_v15 = vmul.bf16 3216621497, %v2341_v52  ;;  %v2378_v61 = vunpack.c.l.bf16 %v7237_v63  ;;  %v2377_v52 = vunpack.c.h.bf16 %v7236_v35 }
 0x473   :  { %4568 = vpow.bf16 %v4084_v39  ;;  %v2379_v4 = vunpack.c.h.bf16 %v7237_v63 }
 0x474   :  { %4570 = vpow.bf16 %v4085_v44 }
 0x475   :  { %4572 = vpow.bf16 %v4086_v15 }
 0x476   :  { %4574 = vtanh.bf16 %v2340_v42 }
 0x47e   :  { %v4569_v2 = vpop.eup %4568 }
 0x47f   :  { %v4571_v62 = vpop.eup %4570  ;;  %v2346_v36 = vadd.bf16 1065369472, %v4569_v2 }
 0x480   :  { %v2354_v0 = vadd.bf16 1065369472, %v4571_v62  ;;  %v4573_v18 = vpop.eup %4572 }
 0x481   :  { %4576 = vrcp.bf16 %v2346_v36  ;;  %v2364_v56 = vadd.bf16 1065369472, %v4573_v18  ;;  %v4575_v38 = vpop.eup %4574 }
 0x482   :  { %4578 = vrcp.bf16 %v2354_v0  ;;  %v2359_v58 = vunpack.c.l.bf16 %v4575_v38 }
 0x483   :  { %4580 = vrcp.bf16 %v2364_v56 }
 0x48c   :  { %v4577_v39 = vpop.eup %4576  ;;  %v2414_v13 = vpop.f32.mrb[44].mxu0 }
 0x48d   :  { %v2455_v44 = vpop.f32.mrb[76].mxu1  ;;  %v4579_v33 = vpop.eup %4578  ;;  %v2348_v24 = vmul.bf16 1065369472, %v4577_v39  ;;  %v2462_v17 = vadd.f32 %v2414_v13, %v2376_v6 }
 0x48e   :  { %v2464_v47 = vadd.f32 %v2455_v44, %v2378_v61  ;;  %v2416_v28 = vpop.f32.mrb[45].mxu0  ;;  %v2457_v15 = vpop.f32.mrb[77].mxu1  ;;  %v2356_v42 = vmul.bf16 1065369472, %v4579_v33 }
 0x48f   :  { %v2463_v2 = vadd.f32 %v2416_v28, %v2377_v52  ;;  %v2465_v62 = vadd.f32 %v2457_v15, %v2379_v4  ;;  %v2418_v36 = vpop.f32.mrb[46].mxu0  ;;  %v2459_v0 = vpop.f32.mrb[78].mxu1  ;;  %v2349_v18 = vunpack.c.l.bf16 %v2348_v24  ;;  %v2466_v31 = vpack.c.bf16 %v2462_v17, %v2462_v17 }
 0x490   :  { %v2419_v30 = vpop.f32.mrb[47].mxu0  ;;  %v2460_v19 = vpop.f32.mrb[79].mxu1  ;;  %v2357_v35 = vunpack.c.l.bf16 %v2356_v42  ;;  %v7254_v36 = vld [vmem:[#allocation50_spill] sm:$0xff] }
 0x491   :  { %v2467_v27 = vpack.c.bf16 %v2463_v2, %v2463_v2  ;;  %v2369_v63 = vmul.f32 %v2359_v58, %v2349_v18  ;;  %v4087_v48 = vmul.bf16 3216621497, %v2466_v31  ;;  %v2469_v61 = vpack.c.bf16 %v2465_v62, %v2465_v62  ;;  %v4581_v44 = vpop.eup %4580  ;;  %v6413_v62 = vld [vmem:[%s7002_s5 + $0xa4] ss:$16 sps:$4 sm:$0xff]   ;;  %v6420_v0 = vld [vmem:[%s7002_s5 + $0xa0] ss:$16 sps:$4 sm:$0xff]  }
 0x492   :  { %v2368_v56 = vmul.f32 %v2357_v35, %v6195_v59  ;;  %v2366_v38 = vmul.bf16 1065369472, %v4581_v44  ;;  %v2468_v30 = vpack.c.bf16 %v2464_v47, %v2464_v47  ;;  %7253 = vst [vmem:[#allocation8_spill] sm:$0xff] %v6413_v62  ;;  %7255 = vst [vmem:[#allocation9_spill] sm:$0xff] %v6420_v0  ;;  %v7256_v18 = vld [vmem:[#allocation51_spill] sm:$0xff] }
 0x493   :  { %v4088_v6 = vmul.bf16 3216621497, %v2467_v27  ;;  %4582 = vpow.bf16 %v4087_v48  ;;  %v4089_v13 = vmul.bf16 3216621497, %v2469_v61  ;;  %v6427_v35 = vld [vmem:[%s7002_s5 + $0xc4] ss:$16 sps:$4 sm:$0xff]  }
 0x494   :  { %v6299_v39 = vadd.f32 %v2369_v63, %v2368_v56  ;;  %v2367_v4 = vunpack.c.l.bf16 %v2366_v38  ;;  %7257 = vst [vmem:[#allocation10_spill] sm:$0xff] %v6427_v35  ;;  %v7258_v63 = vld [vmem:[#allocation52_spill] sm:$0xff]  ;;  %v7264_v38 = vld [vmem:[#allocation55_spill] sm:$0xff] }
 0x495   :  { %4584 = vpow.bf16 %v4088_v6  ;;  %v6434_v56 = vld [vmem:[%s7002_s5 + $0xc0] ss:$16 sps:$4 sm:$0xff]   ;;  %v7260_v6 = vld [vmem:[#allocation53_spill] sm:$0xff]  ;;  %v6441_v61 = vld [vmem:[%s7002_s5 + $0xe4] ss:$16 sps:$4 sm:$0xff]  }
 0x496   :  { %4586 = vtanh.f32 %v6299_v39  ;;  %7259 = vst [vmem:[#allocation11_spill] sm:$0xff] %v6434_v56  ;;  %7261 = vst [vmem:[#allocation12_spill] sm:$0xff] %v6441_v61  ;;  %v6448_v44 = vld [vmem:[%s7002_s5 + $0xe0] ss:$16 sps:$4 sm:$0xff]  }
 0x497   :  { %4588 = vpow.bf16 %v4089_v13  ;;  %v7262_v13 = vld [vmem:[#allocation54_spill] sm:$0xff]  ;;  %7263 = vst [vmem:[#allocation13_spill] sm:$0xff] %v6448_v44 }
 0x498   :  { %4590 = vtanh.bf16 %v2468_v30  ;;  %v6455_v30 = vld [vmem:[%s7003_s6 + $0x4] ss:$16 sps:$4 sm:$0xff]  }
 0x499   :  { %7265 = vst [vmem:[#allocation14_spill] sm:$0xff] %v6455_v30 }
 0x49e   :  { %v4583_v19 = vpop.eup %4582 }
 0x49f   :  { %v2474_v58 = vadd.bf16 1065369472, %v4583_v19  ;;  %v7266_v19 = vld [vmem:[#allocation56_spill] sm:$0xff] }
 0x4a0   :  { %v4585_v52 = vpop.eup %4584 }
 0x4a1   :  { %v4587_v31 = vpop.eup %4586  ;;  %v2482_v59 = vadd.bf16 1065369472, %v4585_v52  ;;  %4592 = vrcp.bf16 %v2474_v58  ;;  %v7267_v52 = vld [vmem:[#allocation25_spill] sm:$0xff]  ;;  %v7268_v58 = vld [vmem:[#allocation34_spill] sm:$0xff] }
 0x4a2   :  { %v2372_v48 = vmul.f32 %v4587_v31, %v2367_v4  ;;  %v4589_v33 = vpop.eup %4588  ;;  %v2510_v4 = vunpack.c.l.bf16 %v7267_v52  ;;  %v2512_v31 = vunpack.c.l.bf16 %v7268_v58 }
 0x4a3   :  { %4594 = vrcp.bf16 %v2482_v59  ;;  %v2492_v24 = vadd.bf16 1065369472, %v4589_v33  ;;  %v4591_v17 = vpop.eup %4590  ;;  %v2513_v33 = vunpack.c.h.bf16 %v7268_v58 }
 0x4a4   :  { %v2501_v27 = vpack.c.bf16 %v2372_v48, %v2372_v48  ;;  %v2487_v42 = vunpack.c.l.bf16 %v4591_v17 }
 0x4a5   :  { %4596 = vrcp.bf16 %v2492_v24 }
 0x4a6   :  { %2503 = vst [vmem:[#allocation4 + $0xc] sm:$0xf] %v2501_v27  ;;  %2547 = vmatmul.mubr.bf16.vlgmr.msra.gmra.mrb[48].mxu0 %v2501_v27  ;;  %2588 = vmatmul.mubr.bf16.vlgmr.msra.gmra.mrb[80].mxu1 %v2501_v27  ;;  %v2511_v27 = vunpack.c.h.bf16 %v7267_v52 }
 0x4a7   :  { %2643 = vmatpush1.bf16.msra.mxu0 %v5902_v37  ;;  %2684 = vmatpush1.bf16.msra.mxu1 %v6202_v40 }
 0x4a8   :  { %2644 = vmatprep.subr.bf16.mxu0 %v5909_v29  ;;  %2685 = vmatprep.subr.bf16.mxu1 %v6209_v43 }
 0x4a9   :  { %2674 = vmatprep.mubr.bf16.mxu0 %v7159_v12  ;;  %2715 = vmatprep.mubr.bf16.mxu1 %v7159_v12 }
 0x4ab   :  { %2645 = vmatpush1.bf16.msra.mxu0 %v5918_v46  ;;  %2686 = vmatpush1.bf16.msra.mxu1 %v6218_v9 }
 0x4ac   :  { %2646 = vmatprep.subr.bf16.mxu0 %v5925_v21  ;;  %2687 = vmatprep.subr.bf16.mxu1 %v6225_v34  ;;  %v4593_v37 = vpop.eup %4592 }
 0x4ad   :  { %v2476_v28 = vmul.bf16 1065369472, %v4593_v37 }
 0x4ae   :  { %v4595_v47 = vpop.eup %4594 }
 0x4af   :  { %v2484_v29 = vmul.bf16 1065369472, %v4595_v47  ;;  %2647 = vmatpush1.bf16.msra.mxu0 %v5932_v11  ;;  %2688 = vmatpush1.bf16.msra.mxu1 %v5938_v57  ;;  %v2477_v15 = vunpack.c.l.bf16 %v2476_v28 }
 0x4b0   :  { %2648 = vmatprep.subr.bf16.mxu0 %v5944_v32  ;;  %2689 = vmatprep.subr.bf16.mxu1 %v5950_v41  ;;  %v4597_v57 = vpop.eup %4596 }
 0x4b1   :  { %v2485_v46 = vunpack.c.l.bf16 %v2484_v29  ;;  %v2497_v2 = vmul.f32 %v2487_v42, %v2477_v15  ;;  %v2494_v32 = vmul.bf16 1065369472, %v4597_v57 }
 0x4b3   :  { %v2496_v21 = vmul.f32 %v2485_v46, %v6237_v51  ;;  %2649 = vmatpush1.bf16.msra.mxu0 %v5957_v22  ;;  %2690 = vmatpush1.bf16.msra.mxu1 %v5963_v23  ;;  %v2495_v41 = vunpack.c.l.bf16 %v2494_v32  ;;  %v7252_v51 = vld [vmem:[#allocation49_spill] sm:$0xff] }
 0x4b4   :  { %2650 = vmatprep.subr.bf16.mxu0 %v5969_v26  ;;  %2691 = vmatprep.subr.bf16.mxu1 %v5975_v14  ;;  %v6341_v14 = vld [vmem:[%s7002_s5 + $0x4] ss:$16 sps:$4 sm:$0xff]  }
 0x4b5   :  { %v6321_v11 = vadd.f32 %v2497_v2, %v2496_v21 }
 0x4b7   :  { %4598 = vtanh.f32 %v6321_v11  ;;  %2651 = vmatpush1.bf16.msra.mxu0 %v5984_v45  ;;  %2692 = vmatpush1.bf16.msra.mxu1 %v5990_v49  ;;  %v6348_v45 = vld [vmem:[%s7002_s5] ss:$16 sps:$4 sm:$0xff]   ;;  %v6355_v49 = vld [vmem:[%s7002_s5 + $0x24] ss:$16 sps:$4 sm:$0xff]  }
 0x4b8   :  { %2652 = vmatprep.subr.bf16.mxu0 %v5996_v54  ;;  %2693 = vmatprep.subr.bf16.mxu1 %v6002_v60  ;;  %v7238_v54 = vld [vmem:[#allocation17_spill] sm:$0xff]  ;;  %v6364_v60 = vld [vmem:[%s7002_s5 + $0x20] ss:$16 sps:$4 sm:$0xff]  }
 0x4b9   :  { %7239 = vst [vmem:[#allocation21_spill] sm:$0xff] %v6364_v60 }
 0x4bb   :  { %2653 = vmatpush1.bf16.msra.mxu0 %v6008_v3  ;;  %2694 = vmatpush1.bf16.msra.mxu1 %v6014_v5  ;;  %v7240_v3 = vld [vmem:[#allocation19_spill] sm:$0xff]  ;;  %v6371_v5 = vld [vmem:[%s7002_s5 + $0x44] ss:$16 sps:$4 sm:$0xff]  }
 0x4bc   :  { %2654 = vmatprep.subr.bf16.mxu0 %v6020_v20  ;;  %2695 = vmatprep.subr.bf16.mxu1 %v6026_v7  ;;  %7241 = vst [vmem:[#allocation28_spill] sm:$0xff] %v6371_v5  ;;  %v7242_v20 = vld [vmem:[#allocation32_spill] sm:$0xff] }
 0x4bd   :  { %v6378_v7 = vld [vmem:[%s7002_s5 + $0x40] ss:$16 sps:$4 sm:$0xff]  }
 0x4be   :  { %7243 = vst [vmem:[#allocation43_spill] sm:$0xff] %v6378_v7 }
 0x4bf   :  { %2655 = vmatpush1.bf16.msra.mxu0 %v6032_v25  ;;  %2696 = vmatpush1.bf16.msra.mxu1 %v6038_v16  ;;  %v7244_v25 = vld [vmem:[#allocation30_spill] sm:$0xff] }
 0x4c0   :  { %2656 = vmatprep.subr.bf16.mxu0 %v6044_v8  ;;  %2697 = vmatprep.subr.bf16.mxu1 %v6050_v53  ;;  %v6385_v16 = vld [vmem:[%s7002_s5 + $0x64] ss:$16 sps:$4 sm:$0xff]   ;;  %v6392_v53 = vld [vmem:[%s7002_s5 + $0x60] ss:$16 sps:$4 sm:$0xff]  }
 0x4c1   :  { %v4599_v22 = vpop.eup %4598  ;;  %7245 = vst [vmem:[#allocation44_spill] sm:$0xff] %v6385_v16  ;;  %v7246_v8 = vld [vmem:[#allocation46_spill] sm:$0xff]  ;;  %7247 = vst [vmem:[#allocation45_spill] sm:$0xff] %v6392_v53 }
 0x4c2   :  { %v2500_v23 = vmul.f32 %v4599_v22, %v2495_v41 }
 0x4c3   :  { %2657 = vmatpush1.bf16.msra.mxu0 %v6056_v1  ;;  %2698 = vmatpush1.bf16.msra.mxu1 %v6062_v55  ;;  %v7248_v1 = vld [vmem:[#allocation47_spill] sm:$0xff]  ;;  %v6399_v55 = vld [vmem:[%s7002_s5 + $0x84] ss:$16 sps:$4 sm:$0xff]  }
 0x4c4   :  { %v2504_v26 = vpack.c.bf16 %v2500_v23, %v2500_v23  ;;  %2776 = vmatprep.subr.bf16.mxu0 %v6341_v14  ;;  %2817 = vmatprep.subr.bf16.mxu1 %v6069_v50  ;;  %7249 = vst [vmem:[#allocation6_spill] sm:$0xff] %v6399_v55  ;;  %v7250_v50 = vld [vmem:[#allocation48_spill] sm:$0xff] }
 0x4c6   :  { %2506 = vst [vmem:[#allocation5 + $0x10] sm:$0xf] %v2504_v26  ;;  %2675 = vmatmul.mubr.bf16.vlgmr.msra.gmra.mrb[52].mxu0 %v2504_v26  ;;  %2716 = vmatmul.mubr.bf16.vlgmr.msra.gmra.mrb[84].mxu1 %v2504_v26 }
 0x4c7   :  { %2777 = vmatpush1.bf16.msra.mxu0 %v6348_v45  ;;  %2818 = vmatpush1.bf16.msra.mxu1 %v6076_v10  ;;  %v6406_v10 = vld [vmem:[%s7002_s5 + $0x80] ss:$16 sps:$4 sm:$0xff]  }
 0x4c8   :  { %2778 = vmatprep.subr.bf16.mxu0 %v6355_v49  ;;  %2819 = vmatprep.subr.bf16.mxu1 %v7238_v54  ;;  %7251 = vst [vmem:[#allocation7_spill] sm:$0xff] %v6406_v10 }
 0x4c9   :  { %2808 = vmatprep.mubr.bf16.mxu0 %v7159_v12  ;;  %2849 = vmatprep.mubr.bf16.mxu1 %v7159_v12 }
 0x4cb   :  { %2779 = vmatpush1.bf16.msra.mxu0 %v6364_v60  ;;  %2820 = vmatpush1.bf16.msra.mxu1 %v7240_v3 }
 0x4cc   :  { %2780 = vmatprep.subr.bf16.mxu0 %v6371_v5  ;;  %2821 = vmatprep.subr.bf16.mxu1 %v7242_v20 }
 0x4cf   :  { %2781 = vmatpush1.bf16.msra.mxu0 %v6378_v7  ;;  %2822 = vmatpush1.bf16.msra.mxu1 %v7244_v25 }
 0x4d0   :  { %2782 = vmatprep.subr.bf16.mxu0 %v6385_v16  ;;  %2823 = vmatprep.subr.bf16.mxu1 %v7246_v8 }
 0x4d3   :  { %2783 = vmatpush1.bf16.msra.mxu0 %v6392_v53  ;;  %2824 = vmatpush1.bf16.msra.mxu1 %v7248_v1 }
 0x4d4   :  { %2784 = vmatprep.subr.bf16.mxu0 %v6399_v55  ;;  %2825 = vmatprep.subr.bf16.mxu1 %v7250_v50 }
 0x4d7   :  { %2785 = vmatpush1.bf16.msra.mxu0 %v6406_v10  ;;  %2826 = vmatpush1.bf16.msra.mxu1 %v7252_v51  ;;  %v7269_v51 = vld [vmem:[#allocation24_spill] sm:$0xff] }
 0x4d8   :  { %2786 = vmatprep.subr.bf16.mxu0 %v6413_v62  ;;  %2827 = vmatprep.subr.bf16.mxu1 %v7254_v36  ;;  %v2638_v36 = vunpack.c.l.bf16 %v7269_v51 }
 0x4db   :  { %2787 = vmatpush1.bf16.msra.mxu0 %v6420_v0  ;;  %2828 = vmatpush1.bf16.msra.mxu1 %v7256_v18  ;;  %v7270_v18 = vld [vmem:[#allocation41_spill] sm:$0xff] }
 0x4dc   :  { %2788 = vmatprep.subr.bf16.mxu0 %v6427_v35  ;;  %2829 = vmatprep.subr.bf16.mxu1 %v7258_v63  ;;  %v2640_v63 = vunpack.c.l.bf16 %v7270_v18  ;;  %v2641_v52 = vunpack.c.h.bf16 %v7270_v18 }
 0x4df   :  { %2789 = vmatpush1.bf16.msra.mxu0 %v6434_v56  ;;  %2830 = vmatpush1.bf16.msra.mxu1 %v7260_v6 }
 0x4e0   :  { %2790 = vmatprep.subr.bf16.mxu0 %v6441_v61  ;;  %2831 = vmatprep.subr.bf16.mxu1 %v7262_v13 }
 0x4e3   :  { %2791 = vmatpush1.bf16.msra.mxu0 %v6448_v44  ;;  %2832 = vmatpush1.bf16.msra.mxu1 %v7264_v38 }
 0x4e4   :  { %2904 = vmatprep.subr.bf16.mxu0 %v6455_v30  ;;  %2945 = vmatprep.subr.bf16.mxu1 %v7266_v19  ;;  %v2639_v19 = vunpack.c.h.bf16 %v7269_v51 }
 0x579   :  { %v2548_v59 = vpop.f32.mrb[48].mxu0  ;;  %v2589_v48 = vpop.f32.mrb[80].mxu1 }
 0x57a   :  { %v2596_v24 = vadd.f32 %v2548_v59, %v2510_v4  ;;  %v2598_v17 = vadd.f32 %v2589_v48, %v2512_v31  ;;  %v2550_v37 = vpop.f32.mrb[49].mxu0  ;;  %v2591_v47 = vpop.f32.mrb[81].mxu1 }
 0x57b   :  { %v2597_v28 = vadd.f32 %v2550_v37, %v2511_v27  ;;  %v2599_v29 = vadd.f32 %v2591_v47, %v2513_v33  ;;  %v2552_v15 = vpop.f32.mrb[50].mxu0  ;;  %v2593_v42 = vpop.f32.mrb[82].mxu1 }
 0x57c   :  { %v2600_v46 = vpack.c.bf16 %v2596_v24, %v2596_v24  ;;  %v2553_v2 = vpop.f32.mrb[51].mxu0  ;;  %v2594_v21 = vpop.f32.mrb[83].mxu1  ;;  %v2602_v26 = vpack.c.bf16 %v2598_v17, %v2598_v17 }
 0x57d   :  { %v2601_v57 = vpack.c.bf16 %v2597_v28, %v2597_v28  ;;  %v2603_v22 = vpack.c.bf16 %v2599_v29, %v2599_v29 }
 0x57e   :  { %v4090_v32 = vmul.bf16 3216621497, %v2600_v46 }
 0x57f   :  { %v4091_v41 = vmul.bf16 3216621497, %v2601_v57  ;;  %v4092_v23 = vmul.bf16 3216621497, %v2603_v22 }
 0x580   :  { %4600 = vpow.bf16 %v4090_v32 }
 0x581   :  { %4602 = vpow.bf16 %v4091_v41 }
 0x582   :  { %4604 = vpow.bf16 %v4092_v23 }
 0x583   :  { %4606 = vtanh.bf16 %v2602_v26 }
 0x58b   :  { %v4601_v54 = vpop.eup %4600 }
 0x58c   :  { %v4603_v3 = vpop.eup %4602  ;;  %v2608_v20 = vadd.bf16 1065369472, %v4601_v54 }
 0x58d   :  { %v2616_v25 = vadd.bf16 1065369472, %v4603_v3  ;;  %v4605_v8 = vpop.eup %4604 }
 0x58e   :  { %4608 = vrcp.bf16 %v2608_v20  ;;  %v2626_v1 = vadd.bf16 1065369472, %v4605_v8  ;;  %v4607_v50 = vpop.eup %4606 }
 0x58f   :  { %4610 = vrcp.bf16 %v2616_v25  ;;  %v2621_v29 = vunpack.c.l.bf16 %v4607_v50 }
 0x590   :  { %4612 = vrcp.bf16 %v2626_v1 }
 0x599   :  { %v4609_v6 = vpop.eup %4608  ;;  %v2676_v13 = vpop.f32.mrb[52].mxu0 }
 0x59a   :  { %v2717_v38 = vpop.f32.mrb[84].mxu1  ;;  %v4611_v4 = vpop.eup %4610  ;;  %v2610_v58 = vmul.bf16 1065369472, %v4609_v6  ;;  %v2724_v31 = vadd.f32 %v2676_v13, %v2638_v36  ;;  %v6474_v13 = vld [vmem:[%s7003_s6] ss:$16 sps:$4 sm:$0xff]  }
 0x59b   :  { %v2726_v59 = vadd.f32 %v2717_v38, %v2640_v63  ;;  %v2678_v48 = vpop.f32.mrb[53].mxu0  ;;  %v2719_v27 = vpop.f32.mrb[85].mxu1  ;;  %v2618_v33 = vmul.bf16 1065369472, %v4611_v4  ;;  %v6481_v38 = vld [vmem:[%s7003_s6 + $0x24] ss:$16 sps:$4 sm:$0xff]  }
 0x59c   :  { %v2725_v24 = vadd.f32 %v2678_v48, %v2639_v19  ;;  %v2727_v17 = vadd.f32 %v2719_v27, %v2641_v52  ;;  %v2680_v37 = vpop.f32.mrb[54].mxu0  ;;  %v2721_v47 = vpop.f32.mrb[86].mxu1  ;;  %v2611_v28 = vunpack.c.l.bf16 %v2610_v58  ;;  %v2728_v15 = vpack.c.bf16 %v2724_v31, %v2724_v31  ;;  %v6490_v52 = vld [vmem:[%s7003_s6 + $0x20] ss:$16 sps:$4 sm:$0xff]   ;;  %v6497_v4 = vld [vmem:[%s7003_s6 + $0x44] ss:$16 sps:$4 sm:$0xff]  }
 0x59d   :  { %v2681_v42 = vpop.f32.mrb[55].mxu0  ;;  %v2722_v46 = vpop.f32.mrb[87].mxu1  ;;  %v2619_v2 = vunpack.c.l.bf16 %v2618_v33  ;;  %v2730_v25 = vpack.c.bf16 %v2726_v59, %v2726_v59  ;;  %v6504_v48 = vld [vmem:[%s7003_s6 + $0x40] ss:$16 sps:$4 sm:$0xff]   ;;  %v6516_v33 = vld [vmem:[%s7003_s6 + $0x64] ss:$16 sps:$4 sm:$0xff]  }
 0x59e   :  { %v2729_v21 = vpack.c.bf16 %v2725_v24, %v2725_v24  ;;  %v2631_v57 = vmul.f32 %v2621_v29, %v2611_v28  ;;  %v4093_v32 = vmul.bf16 3216621497, %v2728_v15  ;;  %v2731_v23 = vpack.c.bf16 %v2727_v17, %v2727_v17  ;;  %v4613_v3 = vpop.eup %4612  ;;  %v6522_v24 = vld [vmem:[%s7003_s6 + $0x6c] ss:$16 sps:$4 sm:$0xff]   ;;  %v6529_v28 = vld [vmem:[%s7003_s6 + $0x60] ss:$16 sps:$4 sm:$0xff]  }
 0x59f   :  { %v2630_v41 = vmul.f32 %v2619_v2, %v6299_v39  ;;  %v2628_v20 = vmul.bf16 1065369472, %v4613_v3  ;;  %v6535_v29 = vld [vmem:[%s7003_s6 + $0x68] ss:$16 sps:$4 sm:$0xff]   ;;  %v6541_v15 = vld [vmem:[%s7003_s6 + $0x84] ss:$16 sps:$4 sm:$0xff]  }
 0x5a0   :  { %v4094_v22 = vmul.bf16 3216621497, %v2729_v21  ;;  %4614 = vpow.bf16 %v4093_v32  ;;  %v4095_v54 = vmul.bf16 3216621497, %v2731_v23  ;;  %v6556_v46 = vld [vmem:[%s7003_s6 + $0x80] ss:$16 sps:$4 sm:$0xff]  }
 0x5a1   :  { %v6468_v26 = vadd.f32 %v2631_v57, %v2630_v41  ;;  %v2629_v50 = vunpack.c.l.bf16 %v2628_v20  ;;  %v6562_v2 = vld [vmem:[%s7003_s6 + $0x88] ss:$16 sps:$4 sm:$0xff]   ;;  %v6568_v21 = vld [vmem:[%s7003_s6 + $0xa4] ss:$16 sps:$4 sm:$0xff]   ;;  %v6574_v57 = vld [vmem:[%s7003_s6 + $0xac] ss:$16 sps:$4 sm:$0xff]  }
 0x5a2   :  { %4616 = vpow.bf16 %v4094_v22  ;;  %v6580_v41 = vld [vmem:[%s7003_s6 + $0xa0] ss:$16 sps:$4 sm:$0xff]   ;;  %v6586_v22 = vld [vmem:[%s7003_s6 + $0xa8] ss:$16 sps:$4 sm:$0xff]   ;;  %v6598_v3 = vld [vmem:[%s7003_s6 + $0xcc] ss:$16 sps:$4 sm:$0xff]  }
 0x5a3   :  { %4618 = vtanh.f32 %v6468_v26  ;;  %v6604_v20 = vld [vmem:[%s7003_s6 + $0xc0] ss:$16 sps:$4 sm:$0xff]  }
 0x5a4   :  { %4620 = vpow.bf16 %v4095_v54  ;;  %v6592_v54 = vld [vmem:[%s7003_s6 + $0xc4] ss:$16 sps:$4 sm:$0xff]  }
 0x5a5   :  { %4622 = vtanh.bf16 %v2730_v25  ;;  %v6610_v25 = vld [vmem:[%s7003_s6 + $0xc8] ss:$16 sps:$4 sm:$0xff]  }
 0x5ab   :  { %v4615_v8 = vpop.eup %4614 }
 0x5ac   :  { %v2736_v51 = vadd.bf16 1065369472, %v4615_v8 }
 0x5ad   :  { %v4617_v1 = vpop.eup %4616 }
 0x5ae   :  { %v4619_v36 = vpop.eup %4618  ;;  %v2744_v39 = vadd.bf16 1065369472, %v4617_v1  ;;  %4624 = vrcp.bf16 %v2736_v51  ;;  %v6616_v1 = vld [vmem:[%s7003_s6 + $0xe4] ss:$16 sps:$4 sm:$0xff]  }
 0x5af   :  { %v2634_v18 = vmul.f32 %v4619_v36, %v2629_v50  ;;  %v4621_v6 = vpop.eup %4620  ;;  %v6622_v50 = vld [vmem:[%s7003_s6 + $0xec] ss:$16 sps:$4 sm:$0xff]  }
 0x5b0   :  { %4626 = vrcp.bf16 %v2744_v39  ;;  %v2754_v19 = vadd.bf16 1065369472, %v4621_v6  ;;  %v6628_v39 = vld [vmem:[%s7003_s6 + $0xe0] ss:$16 sps:$4 sm:$0xff]   ;;  %v6641_v6 = vld [vmem:[%s7002_s5 + $0xc] ss:$16 sps:$4 sm:$0xff]  }
 0x5b1   :  { %v2763_v63 = vpack.c.bf16 %v2634_v18, %v2634_v18  ;;  %v6634_v18 = vld [vmem:[%s7003_s6 + $0xe8] ss:$16 sps:$4 sm:$0xff]  }
 0x5b2   :  { %4628 = vrcp.bf16 %v2754_v19  ;;  %v6648_v19 = vld [vmem:[%s7002_s5 + $0x8] ss:$16 sps:$4 sm:$0xff]  }
 0x5b3   :  { %2765 = vst [vmem:[#allocation4 + $0x10] sm:$0xf] %v2763_v63  ;;  %2809 = vmatmul.mubr.bf16.vlgmr.msra.gmra.mrb[56].mxu0 %v2763_v63  ;;  %2850 = vmatmul.mubr.bf16.vlgmr.msra.gmra.mrb[88].mxu1 %v2763_v63 }
 0x5b4   :  { %2905 = vmatpush1.bf16.msra.mxu0 %v6474_v13  ;;  %2946 = vmatpush1.bf16.msra.mxu1 %v6202_v40  ;;  %v4623_v40 = vpop.eup %4622 }
 0x5b5   :  { %2906 = vmatprep.subr.bf16.mxu0 %v6481_v38  ;;  %2947 = vmatprep.subr.bf16.mxu1 %v6209_v43  ;;  %v2749_v27 = vunpack.c.l.bf16 %v4623_v40  ;;  %v6655_v40 = vld [vmem:[%s7002_s5 + $0x2c] ss:$16 sps:$4 sm:$0xff]  }
 0x5b6   :  { %2936 = vmatprep.mubr.bf16.mxu0 %v7159_v12  ;;  %2977 = vmatprep.mubr.bf16.mxu1 %v7159_v12 }
 0x5b8   :  { %2907 = vmatpush1.bf16.msra.mxu0 %v6490_v52  ;;  %2948 = vmatpush1.bf16.msra.mxu1 %v6218_v9  ;;  %v6510_v9 = vld [vmem:[%s7003_s6 + $0x48] ss:$16 sps:$4 sm:$0xff]  }
 0x5b9   :  { %2908 = vmatprep.subr.bf16.mxu0 %v6497_v4  ;;  %2949 = vmatprep.subr.bf16.mxu1 %v6225_v34  ;;  %v4625_v43 = vpop.eup %4624 }
 0x5ba   :  { %v2738_v31 = vmul.bf16 1065369472, %v4625_v43  ;;  %v6664_v43 = vld [vmem:[%s7002_s5 + $0x28] ss:$16 sps:$4 sm:$0xff]  }
 0x5bb   :  { %v4627_v58 = vpop.eup %4626  ;;  %7271 = vst [vmem:[#allocation15_spill] sm:$0xff] %v6664_v43 }
 0x5bc   :  { %v2746_v59 = vmul.bf16 1065369472, %v4627_v58  ;;  %2909 = vmatpush1.bf16.msra.mxu0 %v6504_v48  ;;  %2950 = vmatpush1.bf16.msra.mxu1 %v6510_v9  ;;  %v2739_v34 = vunpack.c.l.bf16 %v2738_v31  ;;  %v6671_v58 = vld [vmem:[%s7002_s5 + $0x4c] ss:$16 sps:$4 sm:$0xff]   ;;  %v6678_v31 = vld [vmem:[%s7002_s5 + $0x48] ss:$16 sps:$4 sm:$0xff]  }
 0x5bd   :  { %2910 = vmatprep.subr.bf16.mxu0 %v6516_v33  ;;  %2951 = vmatprep.subr.bf16.mxu1 %v6522_v24  ;;  %v4629_v32 = vpop.eup %4628  ;;  %7272 = vst [vmem:[#allocation16_spill] sm:$0xff] %v6671_v58  ;;  %7273 = vst [vmem:[#allocation23_spill] sm:$0xff] %v6678_v31 }
 0x5be   :  { %v2747_v17 = vunpack.c.l.bf16 %v2746_v59  ;;  %v2759_v37 = vmul.f32 %v2749_v27, %v2739_v34  ;;  %v2756_v23 = vmul.bf16 1065369472, %v4629_v32  ;;  %v6685_v59 = vld [vmem:[%s7002_s5 + $0x6c] ss:$16 sps:$4 sm:$0xff]   ;;  %v6692_v34 = vld [vmem:[%s7002_s5 + $0x68] ss:$16 sps:$4 sm:$0xff]  }
 0x5bf   :  { %7274 = vst [vmem:[#allocation33_spill] sm:$0xff] %v6685_v59  ;;  %7275 = vst [vmem:[#allocation26_spill] sm:$0xff] %v6692_v34  ;;  %v6699_v27 = vld [vmem:[%s7002_s5 + $0x8c] ss:$16 sps:$4 sm:$0xff]  }
 0x5c0   :  { %v2758_v47 = vmul.f32 %v2747_v17, %v6321_v11  ;;  %2911 = vmatpush1.bf16.msra.mxu0 %v6529_v28  ;;  %2952 = vmatpush1.bf16.msra.mxu1 %v6535_v29  ;;  %v6547_v11 = vld [vmem:[%s7003_s6 + $0x8c] ss:$16 sps:$4 sm:$0xff]   ;;  %v2757_v8 = vunpack.c.l.bf16 %v2756_v23  ;;  %7276 = vst [vmem:[#allocation42_spill] sm:$0xff] %v6699_v27  ;;  %v6706_v17 = vld [vmem:[%s7002_s5 + $0x88] ss:$16 sps:$4 sm:$0xff]  }
 0x5c1   :  { %2912 = vmatprep.subr.bf16.mxu0 %v6541_v15  ;;  %2953 = vmatprep.subr.bf16.mxu1 %v6547_v11  ;;  %7277 = vst [vmem:[#allocation17_spill] sm:$0xff] %v6706_v17  ;;  %v6727_v32 = vld [vmem:[%s7002_s5 + $0xcc] ss:$16 sps:$4 sm:$0xff]   ;;  %v6734_v23 = vld [vmem:[%s7002_s5 + $0xc8] ss:$16 sps:$4 sm:$0xff]  }
 0x5c2   :  { %v6550_v42 = vadd.f32 %v2759_v37, %v2758_v47  ;;  %v6713_v37 = vld [vmem:[%s7002_s5 + $0xac] ss:$16 sps:$4 sm:$0xff]   ;;  %v6720_v47 = vld [vmem:[%s7002_s5 + $0xa8] ss:$16 sps:$4 sm:$0xff]   ;;  %7280 = vst [vmem:[#allocation30_spill] sm:$0xff] %v6727_v32  ;;  %7281 = vst [vmem:[#allocation46_spill] sm:$0xff] %v6734_v23 }
 0x5c3   :  { %7278 = vst [vmem:[#allocation19_spill] sm:$0xff] %v6713_v37  ;;  %7279 = vst [vmem:[#allocation32_spill] sm:$0xff] %v6720_v47 }
 0x5c4   :  { %4630 = vtanh.f32 %v6550_v42  ;;  %2913 = vmatpush1.bf16.msra.mxu0 %v6556_v46  ;;  %2954 = vmatpush1.bf16.msra.mxu1 %v6562_v2 }
 0x5c5   :  { %2914 = vmatprep.subr.bf16.mxu0 %v6568_v21  ;;  %2955 = vmatprep.subr.bf16.mxu1 %v6574_v57 }
 0x5c8   :  { %2915 = vmatpush1.bf16.msra.mxu0 %v6580_v41  ;;  %2956 = vmatpush1.bf16.msra.mxu1 %v6586_v22 }
 0x5c9   :  { %2916 = vmatprep.subr.bf16.mxu0 %v6592_v54  ;;  %2957 = vmatprep.subr.bf16.mxu1 %v6598_v3 }
 0x5cc   :  { %2917 = vmatpush1.bf16.msra.mxu0 %v6604_v20  ;;  %2958 = vmatpush1.bf16.msra.mxu1 %v6610_v25 }
 0x5cd   :  { %2918 = vmatprep.subr.bf16.mxu0 %v6616_v1  ;;  %2959 = vmatprep.subr.bf16.mxu1 %v6622_v50 }
 0x5ce   :  { %v4631_v51 = vpop.eup %4630 }
 0x5cf   :  { %v2762_v36 = vmul.f32 %v4631_v51, %v2757_v8  ;;  %v6741_v8 = vld [vmem:[%s7002_s5 + $0xec] ss:$16 sps:$4 sm:$0xff]   ;;  %v6748_v51 = vld [vmem:[%s7002_s5 + $0xe8] ss:$16 sps:$4 sm:$0xff]  }
 0x5d0   :  { %2919 = vmatpush1.bf16.msra.mxu0 %v6628_v39  ;;  %2960 = vmatpush1.bf16.msra.mxu1 %v6634_v18  ;;  %7282 = vst [vmem:[#allocation47_spill] sm:$0xff] %v6741_v8  ;;  %7283 = vst [vmem:[#allocation48_spill] sm:$0xff] %v6748_v51 }
 0x5d1   :  { %v2766_v63 = vpack.c.bf16 %v2762_v36, %v2762_v36  ;;  %3038 = vmatprep.subr.bf16.mxu0 %v6341_v14  ;;  %3079 = vmatprep.subr.bf16.mxu1 %v6641_v6  ;;  %v6755_v36 = vld [vmem:[%s7003_s6 + $0xc] ss:$16 sps:$4 sm:$0xff]  }
 0x5d2   :  { %7284 = vst [vmem:[#allocation49_spill] sm:$0xff] %v6755_v36 }
 0x5d3   :  { %2768 = vst [vmem:[#allocation5 + $0xc] sm:$0xf] %v2766_v63  ;;  %2937 = vmatmul.mubr.bf16.vlgmr.msra.gmra.mrb[60].mxu0 %v2766_v63  ;;  %2978 = vmatmul.mubr.bf16.vlgmr.msra.gmra.mrb[92].mxu1 %v2766_v63  ;;  %v7285_v63 = vld [vmem:[#allocation27_spill] sm:$0xff] }
 0x5d4   :  { %3039 = vmatpush1.bf16.msra.mxu0 %v6348_v45  ;;  %3080 = vmatpush1.bf16.msra.mxu1 %v6648_v19 }
 0x5d5   :  { %3040 = vmatprep.subr.bf16.mxu0 %v6355_v49  ;;  %3081 = vmatprep.subr.bf16.mxu1 %v6655_v40 }
 0x5d6   :  { %3070 = vmatprep.mubr.bf16.mxu0 %v7159_v12  ;;  %3111 = vmatprep.mubr.bf16.mxu1 %v7159_v12 }
 0x5d8   :  { %3041 = vmatpush1.bf16.msra.mxu0 %v6364_v60  ;;  %3082 = vmatpush1.bf16.msra.mxu1 %v6664_v43 }
 0x5d9   :  { %3042 = vmatprep.subr.bf16.mxu0 %v6371_v5  ;;  %3083 = vmatprep.subr.bf16.mxu1 %v6671_v58 }
 0x5dc   :  { %3043 = vmatpush1.bf16.msra.mxu0 %v6378_v7  ;;  %3084 = vmatpush1.bf16.msra.mxu1 %v6678_v31 }
 0x5dd   :  { %3044 = vmatprep.subr.bf16.mxu0 %v6385_v16  ;;  %3085 = vmatprep.subr.bf16.mxu1 %v6685_v59 }
 0x5e0   :  { %3045 = vmatpush1.bf16.msra.mxu0 %v6392_v53  ;;  %3086 = vmatpush1.bf16.msra.mxu1 %v6692_v34 }
 0x5e1   :  { %3046 = vmatprep.subr.bf16.mxu0 %v6399_v55  ;;  %3087 = vmatprep.subr.bf16.mxu1 %v6699_v27 }
 0x5e4   :  { %3047 = vmatpush1.bf16.msra.mxu0 %v6406_v10  ;;  %3088 = vmatpush1.bf16.msra.mxu1 %v6706_v17 }
 0x5e5   :  { %3048 = vmatprep.subr.bf16.mxu0 %v6413_v62  ;;  %3089 = vmatprep.subr.bf16.mxu1 %v6713_v37 }
 0x5e8   :  { %3049 = vmatpush1.bf16.msra.mxu0 %v6420_v0  ;;  %3090 = vmatpush1.bf16.msra.mxu1 %v6720_v47 }
 0x5e9   :  { %3050 = vmatprep.subr.bf16.mxu0 %v6427_v35  ;;  %3091 = vmatprep.subr.bf16.mxu1 %v6727_v32  ;;  %v2773_v32 = vunpack.c.h.bf16 %v7285_v63 }
 0x5ec   :  { %3051 = vmatpush1.bf16.msra.mxu0 %v6434_v56  ;;  %3092 = vmatpush1.bf16.msra.mxu1 %v6734_v23 }
 0x5ed   :  { %3052 = vmatprep.subr.bf16.mxu0 %v6441_v61  ;;  %3093 = vmatprep.subr.bf16.mxu1 %v6741_v8  ;;  %v2772_v8 = vunpack.c.l.bf16 %v7285_v63  ;;  %v7286_v61 = vld [vmem:[#allocation35_spill] sm:$0xff] }
 0x5ee   :  { %v2775_v35 = vunpack.c.h.bf16 %v7286_v61 }
 0x5f0   :  { %3053 = vmatpush1.bf16.msra.mxu0 %v6448_v44  ;;  %3094 = vmatpush1.bf16.msra.mxu1 %v6748_v51  ;;  %v2774_v44 = vunpack.c.l.bf16 %v7286_v61 }
 0x5f1   :  { %3166 = vmatprep.subr.bf16.mxu0 %v6455_v30  ;;  %3207 = vmatprep.subr.bf16.mxu1 %v6755_v36 }
 0x686   :  { %v2810_v23 = vpop.f32.mrb[56].mxu0  ;;  %v2851_v56 = vpop.f32.mrb[88].mxu1 }
 0x687   :  { %v2858_v51 = vadd.f32 %v2810_v23, %v2772_v8  ;;  %v2860_v47 = vadd.f32 %v2851_v56, %v2774_v44  ;;  %v2812_v30 = vpop.f32.mrb[57].mxu0  ;;  %v2853_v0 = vpop.f32.mrb[89].mxu1 }
 0x688   :  { %v2859_v37 = vadd.f32 %v2812_v30, %v2773_v32  ;;  %v2861_v62 = vadd.f32 %v2853_v0, %v2775_v35  ;;  %v2814_v17 = vpop.f32.mrb[58].mxu0  ;;  %v2855_v10 = vpop.f32.mrb[90].mxu1 }
 0x689   :  { %v2862_v27 = vpack.c.bf16 %v2858_v51, %v2858_v51  ;;  %v2815_v36 = vpop.f32.mrb[59].mxu0  ;;  %v2856_v55 = vpop.f32.mrb[91].mxu1  ;;  %v2864_v61 = vpack.c.bf16 %v2860_v47, %v2860_v47 }
 0x68a   :  { %v2863_v34 = vpack.c.bf16 %v2859_v37, %v2859_v37  ;;  %v2865_v16 = vpack.c.bf16 %v2861_v62, %v2861_v62  ;;  %v7287_v55 = vld [vmem:[#allocation22_spill] sm:$0xff] }
 0x68b   :  { %v4096_v53 = vmul.bf16 3216621497, %v2862_v27  ;;  %v2900_v17 = vunpack.c.l.bf16 %v7287_v55  ;;  %v7288_v27 = vld [vmem:[#allocation40_spill] sm:$0xff] }
 0x68c   :  { %v4097_v59 = vmul.bf16 3216621497, %v2863_v34  ;;  %v4098_v63 = vmul.bf16 3216621497, %v2865_v16  ;;  %v2902_v34 = vunpack.c.l.bf16 %v7288_v27  ;;  %v2901_v16 = vunpack.c.h.bf16 %v7287_v55 }
 0x68d   :  { %4632 = vpow.bf16 %v4096_v53  ;;  %v2903_v37 = vunpack.c.h.bf16 %v7288_v27 }
 0x68e   :  { %4634 = vpow.bf16 %v4097_v59 }
 0x68f   :  { %4636 = vpow.bf16 %v4098_v63 }
 0x690   :  { %4638 = vtanh.bf16 %v2864_v61 }
 0x698   :  { %v4633_v23 = vpop.eup %4632 }
 0x699   :  { %v4635_v56 = vpop.eup %4634  ;;  %v2870_v44 = vadd.bf16 1065369472, %v4633_v23 }
 0x69a   :  { %v2878_v30 = vadd.bf16 1065369472, %v4635_v56  ;;  %v4637_v10 = vpop.eup %4636 }
 0x69b   :  { %4640 = vrcp.bf16 %v2870_v44  ;;  %v2888_v0 = vadd.bf16 1065369472, %v4637_v10  ;;  %v4639_v35 = vpop.eup %4638 }
 0x69c   :  { %4642 = vrcp.bf16 %v2878_v30  ;;  %v2883_v31 = vunpack.c.l.bf16 %v4639_v35 }
 0x69d   :  { %4644 = vrcp.bf16 %v2888_v0 }
 0x6a6   :  { %v4641_v53 = vpop.eup %4640  ;;  %v2938_v62 = vpop.f32.mrb[60].mxu0 }
 0x6a7   :  { %v2979_v59 = vpop.f32.mrb[92].mxu1  ;;  %v4643_v47 = vpop.eup %4642  ;;  %v2872_v32 = vmul.bf16 1065369472, %v4641_v53  ;;  %v2986_v8 = vadd.f32 %v2938_v62, %v2900_v17 }
 0x6a8   :  { %v2988_v51 = vadd.f32 %v2979_v59, %v2902_v34  ;;  %v2940_v36 = vpop.f32.mrb[61].mxu0  ;;  %v2981_v63 = vpop.f32.mrb[93].mxu1  ;;  %v2880_v61 = vmul.bf16 1065369472, %v4643_v47 }
 0x6a9   :  { %v2987_v23 = vadd.f32 %v2940_v36, %v2901_v16  ;;  %v2989_v56 = vadd.f32 %v2981_v63, %v2903_v37  ;;  %v2942_v44 = vpop.f32.mrb[62].mxu0  ;;  %v2983_v30 = vpop.f32.mrb[94].mxu1  ;;  %v2873_v10 = vunpack.c.l.bf16 %v2872_v32  ;;  %v2990_v7 = vpack.c.bf16 %v2986_v8, %v2986_v8  ;;  %v6774_v32 = vld [vmem:[%s7003_s6 + $0x8] ss:$16 sps:$4 sm:$0xff]   ;;  %v6781_v8 = vld [vmem:[%s7003_s6 + $0x2c] ss:$16 sps:$4 sm:$0xff]  }
 0x6aa   :  { %v2943_v58 = vpop.f32.mrb[63].mxu0  ;;  %v2984_v5 = vpop.f32.mrb[95].mxu1  ;;  %v2881_v55 = vunpack.c.l.bf16 %v2880_v61  ;;  %v6790_v36 = vld [vmem:[%s7003_s6 + $0x28] ss:$16 sps:$4 sm:$0xff]   ;;  %v6797_v61 = vld [vmem:[%s7003_s6 + $0x4c] ss:$16 sps:$4 sm:$0xff]  }
 0x6ab   :  { %v2991_v43 = vpack.c.bf16 %v2987_v23, %v2987_v23  ;;  %v2893_v27 = vmul.f32 %v2883_v31, %v2873_v10  ;;  %v4099_v60 = vmul.bf16 3216621497, %v2990_v7  ;;  %v2993_v34 = vpack.c.bf16 %v2989_v56, %v2989_v56  ;;  %v4645_v59 = vpop.eup %4644 }
 0x6ac   :  { %v2892_v0 = vmul.f32 %v2881_v55, %v6468_v26  ;;  %v2890_v35 = vmul.bf16 1065369472, %v4645_v59  ;;  %v2992_v58 = vpack.c.bf16 %v2988_v51, %v2988_v51 }
 0x6ad   :  { %v4100_v17 = vmul.bf16 3216621497, %v2991_v43  ;;  %4646 = vpow.bf16 %v4099_v60  ;;  %v4101_v62 = vmul.bf16 3216621497, %v2993_v34 }
 0x6ae   :  { %v6767_v53 = vadd.f32 %v2893_v27, %v2892_v0  ;;  %v2891_v37 = vunpack.c.l.bf16 %v2890_v35 }
 0x6af   :  { %4648 = vpow.bf16 %v4100_v17 }
 0x6b0   :  { %4650 = vtanh.f32 %v6767_v53 }
 0x6b1   :  { %4652 = vpow.bf16 %v4101_v62 }
 0x6b2   :  { %4654 = vtanh.bf16 %v2992_v58 }
 0x6b8   :  { %v4647_v5 = vpop.eup %4646 }
 0x6b9   :  { %v2998_v31 = vadd.bf16 1065369472, %v4647_v5 }
 0x6ba   :  { %v4649_v16 = vpop.eup %4648 }
 0x6bb   :  { %v4651_v7 = vpop.eup %4650  ;;  %v3006_v26 = vadd.bf16 1065369472, %v4649_v16  ;;  %4656 = vrcp.bf16 %v2998_v31  ;;  %v7289_v16 = vld [vmem:[#allocation21_spill] sm:$0xff]  ;;  %v7293_v31 = vld [vmem:[#allocation43_spill] sm:$0xff] }
 0x6bc   :  { %v2896_v60 = vmul.f32 %v4651_v7, %v2891_v37  ;;  %v4653_v47 = vpop.eup %4652  ;;  %v7292_v37 = vld [vmem:[#allocation16_spill] sm:$0xff]  ;;  %v7298_v7 = vld [vmem:[#allocation26_spill] sm:$0xff] }
 0x6bd   :  { %4658 = vrcp.bf16 %v3006_v26  ;;  %v3016_v51 = vadd.bf16 1065369472, %v4653_v47  ;;  %v4655_v63 = vpop.eup %4654  ;;  %v7299_v26 = vld [vmem:[#allocation6_spill] sm:$0xff]  ;;  %v7302_v47 = vld [vmem:[#allocation17_spill] sm:$0xff] }
 0x6be   :  { %v3025_v43 = vpack.c.bf16 %v2896_v60, %v2896_v60  ;;  %v3011_v55 = vunpack.c.l.bf16 %v4655_v63  ;;  %v7300_v60 = vld [vmem:[#allocation42_spill] sm:$0xff]  ;;  %v7304_v63 = vld [vmem:[#allocation19_spill] sm:$0xff] }
 0x6bf   :  { %4660 = vrcp.bf16 %v3016_v51  ;;  %v7303_v51 = vld [vmem:[#allocation8_spill] sm:$0xff] }
 0x6c0   :  { %3027 = vst [vmem:[#allocation4 + $0x14] sm:$0xf] %v3025_v43  ;;  %3071 = vmatmul.mubr.bf16.vlgmr.msra.gmra.mrb[64].mxu0 %v3025_v43  ;;  %3112 = vmatmul.mubr.bf16.vlgmr.msra.gmra.mrb[96].mxu1 %v3025_v43  ;;  %v7301_v43 = vld [vmem:[#allocation7_spill] sm:$0xff] }
 0x6c1   :  { %3167 = vmatpush1.bf16.msra.mxu0 %v6474_v13  ;;  %3208 = vmatpush1.bf16.msra.mxu1 %v6774_v32 }
 0x6c2   :  { %3168 = vmatprep.subr.bf16.mxu0 %v6481_v38  ;;  %3209 = vmatprep.subr.bf16.mxu1 %v6781_v8 }
 0x6c3   :  { %3198 = vmatprep.mubr.bf16.mxu0 %v7159_v12  ;;  %3239 = vmatprep.mubr.bf16.mxu1 %v7159_v12 }
 0x6c5   :  { %3169 = vmatpush1.bf16.msra.mxu0 %v6490_v52  ;;  %3210 = vmatpush1.bf16.msra.mxu1 %v6790_v36 }
 0x6c6   :  { %3170 = vmatprep.subr.bf16.mxu0 %v6497_v4  ;;  %3211 = vmatprep.subr.bf16.mxu1 %v6797_v61  ;;  %v4657_v23 = vpop.eup %4656 }
 0x6c7   :  { %v3000_v44 = vmul.bf16 1065369472, %v4657_v23  ;;  %v7305_v23 = vld [vmem:[#allocation9_spill] sm:$0xff] }
 0x6c8   :  { %v4659_v56 = vpop.eup %4658 }
 0x6c9   :  { %v3008_v30 = vmul.bf16 1065369472, %v4659_v56  ;;  %3171 = vmatpush1.bf16.msra.mxu0 %v6504_v48  ;;  %3212 = vmatpush1.bf16.msra.mxu1 %v6510_v9  ;;  %v3001_v10 = vunpack.c.l.bf16 %v3000_v44  ;;  %v7306_v56 = vld [vmem:[#allocation32_spill] sm:$0xff]  ;;  %v7307_v44 = vld [vmem:[#allocation10_spill] sm:$0xff] }
 0x6ca   :  { %3172 = vmatprep.subr.bf16.mxu0 %v6516_v33  ;;  %3213 = vmatprep.subr.bf16.mxu1 %v6522_v24 }
 0x6cb   :  { %v3009_v27 = vunpack.c.l.bf16 %v3008_v30  ;;  %v3021_v0 = vmul.f32 %v3011_v55, %v3001_v10  ;;  %v7308_v30 = vld [vmem:[#allocation30_spill] sm:$0xff]  ;;  %v7309_v10 = vld [vmem:[#allocation11_spill] sm:$0xff] }
 0x6cc   :  { %v7310_v55 = vld [vmem:[#allocation46_spill] sm:$0xff] }
 0x6cd   :  { %v3020_v17 = vmul.f32 %v3009_v27, %v6550_v42  ;;  %3173 = vmatpush1.bf16.msra.mxu0 %v6529_v28  ;;  %3214 = vmatpush1.bf16.msra.mxu1 %v6535_v29  ;;  %v4661_v42 = vpop.eup %4660  ;;  %v7311_v27 = vld [vmem:[#allocation12_spill] sm:$0xff] }
 0x6ce   :  { %3174 = vmatprep.subr.bf16.mxu0 %v6541_v15  ;;  %3215 = vmatprep.subr.bf16.mxu1 %v6547_v11  ;;  %v3018_v62 = vmul.bf16 1065369472, %v4661_v42  ;;  %v7314_v42 = vld [vmem:[#allocation48_spill] sm:$0xff] }
 0x6cf   :  { %v6809_v34 = vadd.f32 %v3021_v0, %v3020_v17  ;;  %v7312_v0 = vld [vmem:[#allocation47_spill] sm:$0xff]  ;;  %v7313_v17 = vld [vmem:[#allocation13_spill] sm:$0xff] }
 0x6d0   :  { %v3019_v59 = vunpack.c.l.bf16 %v3018_v62  ;;  %v7315_v62 = vld [vmem:[#allocation14_spill] sm:$0xff] }
 0x6d1   :  { %4662 = vtanh.f32 %v6809_v34  ;;  %3175 = vmatpush1.bf16.msra.mxu0 %v6556_v46  ;;  %3216 = vmatpush1.bf16.msra.mxu1 %v6562_v2 }
 0x6d2   :  { %3176 = vmatprep.subr.bf16.mxu0 %v6568_v21  ;;  %3217 = vmatprep.subr.bf16.mxu1 %v6574_v57 }
 0x6d5   :  { %3177 = vmatpush1.bf16.msra.mxu0 %v6580_v41  ;;  %3218 = vmatpush1.bf16.msra.mxu1 %v6586_v22 }
 0x6d6   :  { %3178 = vmatprep.subr.bf16.mxu0 %v6592_v54  ;;  %3219 = vmatprep.subr.bf16.mxu1 %v6598_v3 }
 0x6d9   :  { %3179 = vmatpush1.bf16.msra.mxu0 %v6604_v20  ;;  %3220 = vmatpush1.bf16.msra.mxu1 %v6610_v25 }
 0x6da   :  { %3180 = vmatprep.subr.bf16.mxu0 %v6616_v1  ;;  %3221 = vmatprep.subr.bf16.mxu1 %v6622_v50 }
 0x6db   :  { %v4663_v35 = vpop.eup %4662 }
 0x6dc   :  { %v3024_v58 = vmul.f32 %v4663_v35, %v3019_v59  ;;  %v7316_v59 = vld [vmem:[#allocation49_spill] sm:$0xff] }
 0x6dd   :  { %3181 = vmatpush1.bf16.msra.mxu0 %v6628_v39  ;;  %3222 = vmatpush1.bf16.msra.mxu1 %v6634_v18  ;;  %v7317_v35 = vld [vmem:[#allocation29_spill] sm:$0xff] }
 0x6de   :  { %v3028_v5 = vpack.c.bf16 %v3024_v58, %v3024_v58  ;;  %3300 = vmatprep.subr.bf16.mxu0 %v6341_v14  ;;  %3341 = vmatprep.subr.bf16.mxu1 %v6641_v6  ;;  %v7290_v14 = vld [vmem:[#allocation15_spill] sm:$0xff]  ;;  %v7291_v6 = vld [vmem:[#allocation28_spill] sm:$0xff]  ;;  %v3034_v58 = vunpack.c.l.bf16 %v7317_v35 }
 0x6e0   :  { %3030 = vst [vmem:[#allocation5 + $0x8] sm:$0xf] %v3028_v5  ;;  %3199 = vmatmul.mubr.bf16.vlgmr.msra.gmra.mrb[68].mxu0 %v3028_v5  ;;  %3240 = vmatmul.mubr.bf16.vlgmr.msra.gmra.mrb[100].mxu1 %v3028_v5  ;;  %v7318_v5 = vld [vmem:[#allocation36_spill] sm:$0xff] }
 0x6e1   :  { %3301 = vmatpush1.bf16.msra.mxu0 %v6348_v45  ;;  %3342 = vmatpush1.bf16.msra.mxu1 %v6648_v19  ;;  %v7294_v45 = vld [vmem:[#allocation23_spill] sm:$0xff]  ;;  %v7295_v19 = vld [vmem:[#allocation44_spill] sm:$0xff] }
 0x6e2   :  { %3302 = vmatprep.subr.bf16.mxu0 %v6355_v49  ;;  %3343 = vmatprep.subr.bf16.mxu1 %v6655_v40  ;;  %v7296_v49 = vld [vmem:[#allocation33_spill] sm:$0xff] }
 0x6e3   :  { %3332 = vmatprep.mubr.bf16.mxu0 %v7159_v12  ;;  %3373 = vmatprep.mubr.bf16.mxu1 %v7159_v12  ;;  %v7297_v40 = vld [vmem:[#allocation45_spill] sm:$0xff] }
 0x6e5   :  { %3303 = vmatpush1.bf16.msra.mxu0 %v7289_v16  ;;  %3344 = vmatpush1.bf16.msra.mxu1 %v7290_v14  ;;  %v3036_v16 = vunpack.c.l.bf16 %v7318_v5 }
 0x6e6   :  { %3304 = vmatprep.subr.bf16.mxu0 %v7291_v6  ;;  %3345 = vmatprep.subr.bf16.mxu1 %v7292_v37  ;;  %v3035_v37 = vunpack.c.h.bf16 %v7317_v35 }
 0x6e9   :  { %3305 = vmatpush1.bf16.msra.mxu0 %v7293_v31  ;;  %3346 = vmatpush1.bf16.msra.mxu1 %v7294_v45  ;;  %v3037_v31 = vunpack.c.h.bf16 %v7318_v5 }
 0x6ea   :  { %3306 = vmatprep.subr.bf16.mxu0 %v7295_v19  ;;  %3347 = vmatprep.subr.bf16.mxu1 %v7296_v49 }
 0x6ed   :  { %3307 = vmatpush1.bf16.msra.mxu0 %v7297_v40  ;;  %3348 = vmatpush1.bf16.msra.mxu1 %v7298_v7 }
 0x6ee   :  { %3308 = vmatprep.subr.bf16.mxu0 %v7299_v26  ;;  %3349 = vmatprep.subr.bf16.mxu1 %v7300_v60 }
 0x6f1   :  { %3309 = vmatpush1.bf16.msra.mxu0 %v7301_v43  ;;  %3350 = vmatpush1.bf16.msra.mxu1 %v7302_v47 }
 0x6f2   :  { %3310 = vmatprep.subr.bf16.mxu0 %v7303_v51  ;;  %3351 = vmatprep.subr.bf16.mxu1 %v7304_v63 }
 0x6f5   :  { %3311 = vmatpush1.bf16.msra.mxu0 %v7305_v23  ;;  %3352 = vmatpush1.bf16.msra.mxu1 %v7306_v56 }
 0x6f6   :  { %3312 = vmatprep.subr.bf16.mxu0 %v7307_v44  ;;  %3353 = vmatprep.subr.bf16.mxu1 %v7308_v30 }
 0x6f9   :  { %3313 = vmatpush1.bf16.msra.mxu0 %v7309_v10  ;;  %3354 = vmatpush1.bf16.msra.mxu1 %v7310_v55 }
 0x6fa   :  { %3314 = vmatprep.subr.bf16.mxu0 %v7311_v27  ;;  %3355 = vmatprep.subr.bf16.mxu1 %v7312_v0 }
 0x6fd   :  { %3315 = vmatpush1.bf16.msra.mxu0 %v7313_v17  ;;  %3356 = vmatpush1.bf16.msra.mxu1 %v7314_v42 }
 0x6fe   :  { %3427 = vmatprep.subr.bf16.mxu0 %v7315_v62  ;;  %3468 = vmatprep.subr.bf16.mxu1 %v7316_v59 }
 0x793   :  { %v3072_v14 = vpop.f32.mrb[64].mxu0  ;;  %v3113_v6 = vpop.f32.mrb[96].mxu1 }
 0x794   :  { %v3120_v45 = vadd.f32 %v3072_v14, %v3034_v58  ;;  %v3122_v19 = vadd.f32 %v3113_v6, %v3036_v16  ;;  %v3074_v49 = vpop.f32.mrb[65].mxu0  ;;  %v3115_v40 = vpop.f32.mrb[97].mxu1  ;;  %v7319_v58 = vld [vmem:[#allocation20_spill] sm:$0xff]  ;;  %v7320_v16 = vld [vmem:[#allocation39_spill] sm:$0xff] }
 0x795   :  { %v3121_v7 = vadd.f32 %v3074_v49, %v3035_v37  ;;  %v3123_v26 = vadd.f32 %v3115_v40, %v3037_v31  ;;  %v3076_v60 = vpop.f32.mrb[66].mxu0  ;;  %v3117_v43 = vpop.f32.mrb[98].mxu1  ;;  %v3162_v5 = vunpack.c.l.bf16 %v7319_v58  ;;  %v3164_v14 = vunpack.c.l.bf16 %v7320_v16 }
 0x796   :  { %v3124_v47 = vpack.c.bf16 %v3120_v45, %v3120_v45  ;;  %v3077_v51 = vpop.f32.mrb[67].mxu0  ;;  %v3118_v63 = vpop.f32.mrb[99].mxu1  ;;  %v3126_v55 = vpack.c.bf16 %v3122_v19, %v3122_v19  ;;  %v3163_v45 = vunpack.c.h.bf16 %v7319_v58  ;;  %v3165_v19 = vunpack.c.h.bf16 %v7320_v16 }
 0x797   :  { %v3125_v23 = vpack.c.bf16 %v3121_v7, %v3121_v7  ;;  %v3127_v30 = vpack.c.bf16 %v3123_v26, %v3123_v26 }
 0x798   :  { %v4102_v56 = vmul.bf16 3216621497, %v3124_v47 }
 0x799   :  { %v4103_v44 = vmul.bf16 3216621497, %v3125_v23  ;;  %v4104_v10 = vmul.bf16 3216621497, %v3127_v30 }
 0x79a   :  { %4664 = vpow.bf16 %v4102_v56 }
 0x79b   :  { %4666 = vpow.bf16 %v4103_v44 }
 0x79c   :  { %4668 = vpow.bf16 %v4104_v10 }
 0x79d   :  { %4670 = vtanh.bf16 %v3126_v55 }
 0x7a5   :  { %v4665_v27 = vpop.eup %4664 }
 0x7a6   :  { %v4667_v0 = vpop.eup %4666  ;;  %v3132_v17 = vadd.bf16 1065369472, %v4665_v27 }
 0x7a7   :  { %v3140_v42 = vadd.bf16 1065369472, %v4667_v0  ;;  %v4669_v62 = vpop.eup %4668 }
 0x7a8   :  { %4672 = vrcp.bf16 %v3132_v17  ;;  %v3150_v59 = vadd.bf16 1065369472, %v4669_v62  ;;  %v4671_v35 = vpop.eup %4670 }
 0x7a9   :  { %4674 = vrcp.bf16 %v3140_v42  ;;  %v3145_v30 = vunpack.c.l.bf16 %v4671_v35 }
 0x7aa   :  { %4676 = vrcp.bf16 %v3150_v59 }
 0x7b3   :  { %v4673_v6 = vpop.eup %4672  ;;  %v3200_v37 = vpop.f32.mrb[68].mxu0 }
 0x7b4   :  { %v3241_v31 = vpop.f32.mrb[100].mxu1  ;;  %v4675_v49 = vpop.eup %4674  ;;  %v3134_v40 = vmul.bf16 1065369472, %v4673_v6  ;;  %v3248_v7 = vadd.f32 %v3200_v37, %v3162_v5 }
 0x7b5   :  { %v3250_v26 = vadd.f32 %v3241_v31, %v3164_v14  ;;  %v3202_v60 = vpop.f32.mrb[69].mxu0  ;;  %v3243_v43 = vpop.f32.mrb[101].mxu1  ;;  %v3142_v47 = vmul.bf16 1065369472, %v4675_v49 }
 0x7b6   :  { %v3249_v51 = vadd.f32 %v3202_v60, %v3163_v45  ;;  %v3251_v63 = vadd.f32 %v3243_v43, %v3165_v19  ;;  %v3204_v23 = vpop.f32.mrb[70].mxu0  ;;  %v3245_v56 = vpop.f32.mrb[102].mxu1  ;;  %v3135_v44 = vunpack.c.l.bf16 %v3134_v40  ;;  %v3252_v10 = vpack.c.bf16 %v3248_v7, %v3248_v7 }
 0x7b7   :  { %v3205_v55 = vpop.f32.mrb[71].mxu0  ;;  %v3246_v27 = vpop.f32.mrb[103].mxu1  ;;  %v3143_v0 = vunpack.c.l.bf16 %v3142_v47  ;;  %v3254_v37 = vpack.c.bf16 %v3250_v26, %v3250_v26 }
 0x7b8   :  { %v3253_v17 = vpack.c.bf16 %v3249_v51, %v3249_v51  ;;  %v3155_v42 = vmul.f32 %v3145_v30, %v3135_v44  ;;  %v4105_v62 = vmul.bf16 3216621497, %v3252_v10  ;;  %v3255_v5 = vpack.c.bf16 %v3251_v63, %v3251_v63  ;;  %v4677_v6 = vpop.eup %4676 }
 0x7b9   :  { %v3154_v59 = vmul.f32 %v3143_v0, %v6767_v53  ;;  %v3152_v35 = vmul.bf16 1065369472, %v4677_v6 }
 0x7ba   :  { %v4106_v58 = vmul.bf16 3216621497, %v3253_v17  ;;  %4678 = vpow.bf16 %v4105_v62  ;;  %v4107_v14 = vmul.bf16 3216621497, %v3255_v5 }
 0x7bb   :  { %v6871_v16 = vadd.f32 %v3155_v42, %v3154_v59  ;;  %v3153_v19 = vunpack.c.l.bf16 %v3152_v35 }
 0x7bc   :  { %4680 = vpow.bf16 %v4106_v58 }
 0x7bd   :  { %4682 = vtanh.f32 %v6871_v16 }
 0x7be   :  { %4684 = vpow.bf16 %v4107_v14 }
 0x7bf   :  { %4686 = vtanh.bf16 %v3254_v37 }
 0x7c5   :  { %v4679_v31 = vpop.eup %4678 }
 0x7c6   :  { %v3260_v49 = vadd.bf16 1065369472, %v4679_v31 }
 0x7c7   :  { %v4681_v45 = vpop.eup %4680 }
 0x7c8   :  { %v4683_v40 = vpop.eup %4682  ;;  %v3268_v53 = vadd.bf16 1065369472, %v4681_v45  ;;  %4688 = vrcp.bf16 %v3260_v49 }
 0x7c9   :  { %v3158_v7 = vmul.f32 %v4683_v40, %v3153_v19  ;;  %v4685_v43 = vpop.eup %4684 }
 0x7ca   :  { %4690 = vrcp.bf16 %v3268_v53  ;;  %v3278_v26 = vadd.bf16 1065369472, %v4685_v43  ;;  %v4687_v47 = vpop.eup %4686  ;;  %v7323_v53 = vld [vmem:[#allocation18_spill] sm:$0xff] }
 0x7cb   :  { %v3287_v60 = vpack.c.bf16 %v3158_v7, %v3158_v7  ;;  %v3423_v7 = vunpack.c.l.bf16 %v7323_v53 }
 0x7cc   :  { %4692 = vrcp.bf16 %v3278_v26 }
 0x7cd   :  { %3289 = vst [vmem:[#allocation4 + $0x18] sm:$0xf] %v3287_v60  ;;  %3333 = vmatmul.mubr.bf16.vlgmr.msra.gmra.mrb[72].mxu0 %v3287_v60  ;;  %3374 = vmatmul.mubr.bf16.vlgmr.msra.gmra.mrb[104].mxu1 %v3287_v60  ;;  %v7324_v60 = vld [vmem:[#allocation38_spill] sm:$0xff] }
 0x7ce   :  { %3428 = vmatpush1.bf16.msra.mxu0 %v6474_v13  ;;  %3469 = vmatpush1.bf16.msra.mxu1 %v6774_v32  ;;  %v3425_v43 = vunpack.c.l.bf16 %v7324_v60 }
 0x7cf   :  { %3429 = vmatprep.subr.bf16.mxu0 %v6481_v38  ;;  %3470 = vmatprep.subr.bf16.mxu1 %v6781_v8  ;;  %v3273_v8 = vunpack.c.l.bf16 %v4687_v47 }
 0x7d0   :  { %3459 = vmatprep.mubr.bf16.mxu0 %v7159_v12  ;;  %3500 = vmatprep.mubr.bf16.mxu1 %v7159_v12 }
 0x7d2   :  { %3430 = vmatpush1.bf16.msra.mxu0 %v6490_v52  ;;  %3471 = vmatpush1.bf16.msra.mxu1 %v6790_v36 }
 0x7d3   :  { %3431 = vmatprep.subr.bf16.mxu0 %v6497_v4  ;;  %3472 = vmatprep.subr.bf16.mxu1 %v6797_v61  ;;  %v4689_v13 = vpop.eup %4688 }
 0x7d4   :  { %v3262_v51 = vmul.bf16 1065369472, %v4689_v13 }
 0x7d5   :  { %v4691_v32 = vpop.eup %4690 }
 0x7d6   :  { %v3270_v38 = vmul.bf16 1065369472, %v4691_v32  ;;  %3432 = vmatpush1.bf16.msra.mxu0 %v6504_v48  ;;  %3473 = vmatpush1.bf16.msra.mxu1 %v6510_v9  ;;  %v3263_v12 = vunpack.c.l.bf16 %v3262_v51  ;;  %v3424_v32 = vunpack.c.h.bf16 %v7323_v53  ;;  %v3426_v51 = vunpack.c.h.bf16 %v7324_v60 }
 0x7d7   :  { %3433 = vmatprep.subr.bf16.mxu0 %v6516_v33  ;;  %3474 = vmatprep.subr.bf16.mxu1 %v6522_v24  ;;  %v4693_v9 = vpop.eup %4692 }
 0x7d8   :  { %v3271_v52 = vunpack.c.l.bf16 %v3270_v38  ;;  %v3283_v36 = vmul.f32 %v3273_v8, %v3263_v12  ;;  %v3280_v33 = vmul.bf16 1065369472, %v4693_v9 }
 0x7da   :  { %v3282_v4 = vmul.f32 %v3271_v52, %v6809_v34  ;;  %3434 = vmatpush1.bf16.msra.mxu0 %v6529_v28  ;;  %3475 = vmatpush1.bf16.msra.mxu1 %v6535_v29  ;;  %v3281_v24 = vunpack.c.l.bf16 %v3280_v33 }
 0x7db   :  { %3435 = vmatprep.subr.bf16.mxu0 %v6541_v15  ;;  %3476 = vmatprep.subr.bf16.mxu1 %v6547_v11  ;;  %v4448_v11 = vld [vmem:[%s7006_s8] sm:$0xff]  }
 0x7dc   :  { %v6893_v48 = vadd.f32 %v3283_v36, %v3282_v4 }
 0x7de   :  { %4694 = vtanh.f32 %v6893_v48  ;;  %3436 = vmatpush1.bf16.msra.mxu0 %v6556_v46  ;;  %3477 = vmatpush1.bf16.msra.mxu1 %v6562_v2  ;;  %v4449_v46 = vld [vmem:[%s7006_s8 + $0x8] sm:$0xff]   ;;  %v4450_v2 = vld [vmem:[%s7006_s8 + $0x10] sm:$0xff]  }
 0x7df   :  { %3437 = vmatprep.subr.bf16.mxu0 %v6568_v21  ;;  %3478 = vmatprep.subr.bf16.mxu1 %v6574_v57  ;;  %v4451_v21 = vld [vmem:[%s7006_s8 + $0x18] sm:$0xff]   ;;  %v4452_v57 = vld [vmem:[%s7006_s8 + $0x20] sm:$0xff]  }
 0x7e2   :  { %3438 = vmatpush1.bf16.msra.mxu0 %v6580_v41  ;;  %3479 = vmatpush1.bf16.msra.mxu1 %v6586_v22  ;;  %v4453_v41 = vld [vmem:[%s7006_s8 + $0x28] sm:$0xff]   ;;  %v4454_v22 = vld [vmem:[%s7006_s8 + $0x30] sm:$0xff]  }
 0x7e3   :  { %3439 = vmatprep.subr.bf16.mxu0 %v6592_v54  ;;  %3480 = vmatprep.subr.bf16.mxu1 %v6598_v3  ;;  %v4455_v54 = vld [vmem:[%s7006_s8 + $0x38] sm:$0xff]   ;;  %v6937_v3 = vld [vmem:[%s7007_s7] sm:$0xff]  }
 0x7e6   :  { %3440 = vmatpush1.bf16.msra.mxu0 %v6604_v20  ;;  %3481 = vmatpush1.bf16.msra.mxu1 %v6610_v25  ;;  %v7321_v20 = vld [vmem:[#allocation31_spill] sm:$0xff] }
 0x7e7   :  { %3441 = vmatprep.subr.bf16.mxu0 %v6616_v1  ;;  %3482 = vmatprep.subr.bf16.mxu1 %v6622_v50  ;;  %v3296_v25 = vunpack.c.l.bf16 %v7321_v20  ;;  %v7322_v1 = vld [vmem:[#allocation37_spill] sm:$0xff]  ;;  %v3297_v61 = vunpack.c.h.bf16 %v7321_v20 }
 0x7e8   :  { %v4695_v28 = vpop.eup %4694  ;;  %v3298_v50 = vunpack.c.l.bf16 %v7322_v1  ;;  %v3299_v34 = vunpack.c.h.bf16 %v7322_v1 }
 0x7e9   :  { %v3286_v29 = vmul.f32 %v4695_v28, %v3281_v24 }
 0x7ea   :  { %3442 = vmatpush1.bf16.msra.mxu0 %v6628_v39  ;;  %3483 = vmatpush1.bf16.msra.mxu1 %v6634_v18 }
 0x7eb   :  { %v3290_v15 = vpack.c.bf16 %v3286_v29, %v3286_v29  ;;  %4195 = vmatprep.subr.bf16.mxu0 %v4448_v11 }
 0x7ed   :  { %3292 = vst [vmem:[#allocation5 + $0x4] sm:$0xf] %v3290_v15  ;;  %3460 = vmatmul.mubr.bf16.vlgmr.msra.gmra.mrb[76].mxu0 %v3290_v15  ;;  %3501 = vmatmul.mubr.bf16.vlgmr.msra.gmra.mrb[108].mxu1 %v3290_v15 }
 0x7ee   :  { %4196 = vmatpush3.bf16.msra.mxu0 %v4448_v11 }
 0x7ef   :  { %4197 = vmatprep.subr.bf16.mxu0 %v4449_v46 }
 0x7f2   :  { %4198 = vmatpush3.bf16.msra.mxu0 %v4449_v46 }
 0x7f3   :  { %4199 = vmatprep.subr.bf16.mxu0 %v4450_v2 }
 0x7f6   :  { %4200 = vmatpush3.bf16.msra.mxu0 %v4450_v2 }
 0x7f7   :  { %4201 = vmatprep.subr.bf16.mxu0 %v4451_v21 }
 0x7fa   :  { %4202 = vmatpush3.bf16.msra.mxu0 %v4451_v21 }
 0x7fb   :  { %4203 = vmatprep.subr.bf16.mxu0 %v4452_v57 }
 0x7fe   :  { %4204 = vmatpush3.bf16.msra.mxu0 %v4452_v57 }
 0x7ff   :  { %4205 = vmatprep.subr.bf16.mxu0 %v4453_v41 }
 0x802   :  { %4206 = vmatpush3.bf16.msra.mxu0 %v4453_v41 }
 0x803   :  { %4207 = vmatprep.subr.bf16.mxu0 %v4454_v22 }
 0x806   :  { %4208 = vmatpush3.bf16.msra.mxu0 %v4454_v22 }
 0x807   :  { %4209 = vmatprep.subr.bf16.mxu0 %v4455_v54 }
 0x80a   :  { %4210 = vmatpush3.bf16.msra.mxu0 %v4455_v54 }
 0x80b   :  { %4219 = vmatprep.subr.bf16.mxu0 %v6937_v3 }
 0x8a0   :  { %v3334_v39 = vpop.f32.mrb[72].mxu0  ;;  %v3375_v18 = vpop.f32.mrb[104].mxu1 }
 0x8a1   :  { %v3382_v63 = vadd.f32 %v3334_v39, %v3296_v25  ;;  %v3384_v23 = vadd.f32 %v3375_v18, %v3298_v50  ;;  %v3336_v56 = vpop.f32.mrb[73].mxu0  ;;  %v3377_v44 = vpop.f32.mrb[105].mxu1 }
 0x8a2   :  { %v3383_v30 = vadd.f32 %v3336_v56, %v3297_v61  ;;  %v3385_v10 = vadd.f32 %v3377_v44, %v3299_v34  ;;  %v3338_v55 = vpop.f32.mrb[74].mxu0  ;;  %v3379_v27 = vpop.f32.mrb[106].mxu1 }
 0x8a3   :  { %v3386_v0 = vpack.c.bf16 %v3382_v63, %v3382_v63  ;;  %v3339_v17 = vpop.f32.mrb[75].mxu0  ;;  %v3380_v42 = vpop.f32.mrb[107].mxu1  ;;  %v3388_v6 = vpack.c.bf16 %v3384_v23, %v3384_v23 }
 0x8a4   :  { %v3387_v62 = vpack.c.bf16 %v3383_v30, %v3383_v30  ;;  %v3389_v5 = vpack.c.bf16 %v3385_v10, %v3385_v10 }
 0x8a5   :  { %v4108_v59 = vmul.bf16 3216621497, %v3386_v0 }
 0x8a6   :  { %v4109_v58 = vmul.bf16 3216621497, %v3387_v62  ;;  %v4110_v14 = vmul.bf16 3216621497, %v3389_v5 }
 0x8a7   :  { %4696 = vpow.bf16 %v4108_v59 }
 0x8a8   :  { %4698 = vpow.bf16 %v4109_v58 }
 0x8a9   :  { %4700 = vpow.bf16 %v4110_v14 }
 0x8aa   :  { %4702 = vtanh.bf16 %v3388_v6 }
 0x8b2   :  { %v4697_v35 = vpop.eup %4696 }
 0x8b3   :  { %v4699_v37 = vpop.eup %4698  ;;  %v3394_v31 = vadd.bf16 1065369472, %v4697_v35 }
 0x8b4   :  { %v3402_v45 = vadd.bf16 1065369472, %v4699_v37  ;;  %v4701_v19 = vpop.eup %4700 }
 0x8b5   :  { %4704 = vrcp.bf16 %v3394_v31  ;;  %v3412_v49 = vadd.bf16 1065369472, %v4701_v19  ;;  %v4703_v40 = vpop.eup %4702 }
 0x8b6   :  { %4706 = vrcp.bf16 %v3402_v45  ;;  %v3407_v11 = vunpack.c.l.bf16 %v4703_v40 }
 0x8b7   :  { %4708 = vrcp.bf16 %v3412_v49 }
 0x8c0   :  { %v4705_v26 = vpop.eup %4704  ;;  %v3461_v47 = vpop.f32.mrb[76].mxu0 }
 0x8c1   :  { %v3502_v13 = vpop.f32.mrb[108].mxu1  ;;  %v4707_v38 = vpop.eup %4706  ;;  %v3396_v12 = vmul.bf16 1065369472, %v4705_v26  ;;  %v3509_v8 = vadd.f32 %v3461_v47, %v3423_v7  ;;  %v4460_v26 = vld [vmem:[%s7007_s7 + $0x8] sm:$0xff]   ;;  %v4459_v47 = vld [vmem:[#allocation5 + $0x10] sm:$0xff]  }
 0x8c2   :  { %v3511_v52 = vadd.f32 %v3502_v13, %v3425_v43  ;;  %v3463_v36 = vpop.f32.mrb[77].mxu0  ;;  %v3504_v4 = vpop.f32.mrb[109].mxu1  ;;  %v3404_v9 = vmul.bf16 1065369472, %v4707_v38  ;;  %v4458_v43 = vld [vmem:[#allocation5 + $0x8] sm:$0xff]   ;;  %v4462_v13 = vld [vmem:[#allocation5 + $0x18] sm:$0xff]  }
 0x8c3   :  { %v3510_v33 = vadd.f32 %v3463_v36, %v3424_v32  ;;  %v3512_v24 = vadd.f32 %v3504_v4, %v3426_v51  ;;  %v3465_v28 = vpop.f32.mrb[78].mxu0  ;;  %v3506_v29 = vpop.f32.mrb[110].mxu1  ;;  %v3397_v15 = vunpack.c.l.bf16 %v3396_v12  ;;  %v3513_v46 = vpack.c.bf16 %v3509_v8, %v3509_v8  ;;  %v4464_v32 = vld [vmem:[%s7007_s7 + $0x18] sm:$0xff]   ;;  %v4463_v51 = vld [vmem:[#allocation4] sm:$0xff]   ;;  %v4466_v38 = vld [vmem:[%s7007_s7 + $0x28] sm:$0xff]  }
 0x8c4   :  { %v3466_v2 = vpop.f32.mrb[79].mxu0  ;;  %v3507_v21 = vpop.f32.mrb[111].mxu1  ;;  %v3405_v57 = vunpack.c.l.bf16 %v3404_v9  ;;  %v3515_v34 = vpack.c.bf16 %v3511_v52, %v3511_v52  ;;  %v4467_v12 = vld [vmem:[%s7007_s7 + $0x30] sm:$0xff]   ;;  %v4468_v8 = vld [vmem:[%s7007_s7 + $0x38] sm:$0xff]   ;;  %v4469_v52 = vld [vmem:[#allocation4 + $0x8] sm:$0xff]  }
 0x8c5   :  { %v3514_v41 = vpack.c.bf16 %v3510_v33, %v3510_v33  ;;  %v3417_v22 = vmul.f32 %v3407_v11, %v3397_v15  ;;  %v4111_v54 = vmul.bf16 3216621497, %v3513_v46  ;;  %v3516_v1 = vpack.c.bf16 %v3512_v24, %v3512_v24  ;;  %v4709_v18 = vpop.eup %4708  ;;  %v4470_v36 = vld [vmem:[#allocation4 + $0x10] sm:$0xff]   ;;  %v4138_v9 = vld [vmem:[%s7008_s9] ss:$0 sm:$0xff] }
 0x8c6   :  { %v3416_v20 = vmul.f32 %v3405_v57, %v6871_v16  ;;  %v3414_v61 = vmul.bf16 1065369472, %v4709_v18 }
 0x8c7   :  { %v4112_v25 = vmul.bf16 3216621497, %v3514_v41  ;;  %4710 = vpow.bf16 %v4111_v54  ;;  %v4113_v39 = vmul.bf16 3216621497, %v3516_v1 }
 0x8c8   :  { %v3418_v50 = vadd.f32 %v3417_v22, %v3416_v20  ;;  %v3415_v56 = vunpack.c.l.bf16 %v3414_v61 }
 0x8c9   :  { %4712 = vpow.bf16 %v4112_v25 }
 0x8ca   :  { %4714 = vtanh.f32 %v3418_v50 }
 0x8cb   :  { %4716 = vpow.bf16 %v4113_v39 }
 0x8cc   :  { %4718 = vtanh.bf16 %v3515_v34 }
 0x8d2   :  { %v4711_v63 = vpop.eup %4710 }
 0x8d3   :  { %v3521_v44 = vadd.bf16 1065369472, %v4711_v63 }
 0x8d4   :  { %v4713_v23 = vpop.eup %4712 }
 0x8d5   :  { %v4715_v30 = vpop.eup %4714  ;;  %v3529_v10 = vadd.bf16 1065369472, %v4713_v23  ;;  %4720 = vrcp.bf16 %v3521_v44 }
 0x8d6   :  { %v3420_v55 = vmul.f32 %v4715_v30, %v3415_v56  ;;  %v4717_v27 = vpop.eup %4716 }
 0x8d7   :  { %4722 = vrcp.bf16 %v3529_v10  ;;  %v3539_v0 = vadd.bf16 1065369472, %v4717_v27  ;;  %v4719_v17 = vpop.eup %4718 }
 0x8d8   :  { %v3548_v16 = vpack.c.bf16 %v3420_v55, %v3420_v55  ;;  %v3534_v14 = vunpack.c.l.bf16 %v4719_v17 }
 0x8d9   :  { %4724 = vrcp.bf16 %v3539_v0 }
 0x8da   :  { %3550 = vst [vmem:[#allocation4 + $0x1c] sm:$0xf] %v3548_v16 }
 0x8e0   :  { %v4721_v42 = vpop.eup %4720 }
 0x8e1   :  { %v3523_v59 = vmul.bf16 1065369472, %v4721_v42  ;;  %v4471_v4 = vld [vmem:[#allocation4 + $0x18] sm:$0xff]  }
 0x8e2   :  { %v4723_v62 = vpop.eup %4722 }
 0x8e3   :  { %v3531_v58 = vmul.bf16 1065369472, %v4723_v62  ;;  %v3524_v5 = vunpack.c.l.bf16 %v3523_v59 }
 0x8e4   :  { %v4725_v45 = vpop.eup %4724 }
 0x8e5   :  { %v3532_v6 = vunpack.c.l.bf16 %v3531_v58  ;;  %v3544_v35 = vmul.f32 %v3534_v14, %v3524_v5  ;;  %v3541_v19 = vmul.bf16 1065369472, %v4725_v45 }
 0x8e7   :  { %v3543_v37 = vmul.f32 %v3532_v6, %v6893_v48  ;;  %v3542_v49 = vunpack.c.l.bf16 %v3541_v19  ;;  %v4461_v48 = vld [vmem:[%s7007_s7 + $0x10] sm:$0xff]  }
 0x8e9   :  { %v3545_v31 = vadd.f32 %v3544_v35, %v3543_v37 }
 0x8eb   :  { %4726 = vtanh.f32 %v3545_v31 }
 0x8f5   :  { %v4727_v40 = vpop.eup %4726 }
 0x8f6   :  { %v3547_v53 = vmul.f32 %v4727_v40, %v3542_v49 }
 0x8f8   :  { %v3551_v7 = vpack.c.bf16 %v3547_v53, %v3547_v53 }
 0x8fa   :  { %3552 = vst [vmem:[#allocation5] sm:$0xf] %v3551_v7 }
 0x901   :  { %v4456_v60 = vld [vmem:[#allocation5] sm:$0xff]  }
 0x902   :  { %4211 = vmatprep.mubr.bf16.mxu0 %v4456_v60 }
 0x903   :  { %4212 = vmatmul.mubr.bf16.vlgmr.msra.gmra.mrb[80].mxu0 %v4458_v43 }
 0x904   :  { %4220 = vmatpush3.bf16.msra.mxu0 %v6937_v3  ;;  %4215 = vmatprep.mubr.bf16.mxu0 %v4459_v47  ;;  %v4465_v3 = vld [vmem:[%s7007_s7 + $0x20] sm:$0xff]  }
 0x905   :  { %4221 = vmatprep.subr.bf16.mxu0 %v4460_v26 }
 0x908   :  { %4222 = vmatpush3.bf16.msra.mxu0 %v4460_v26 }
 0x909   :  { %4223 = vmatprep.subr.bf16.mxu0 %v4461_v48 }
 0x90b   :  { %4216 = vmatmul.mubr.bf16.gmra.mrb[84].mxu0 %v4462_v13 }
 0x90c   :  { %4224 = vmatpush3.bf16.msra.mxu0 %v4461_v48  ;;  %4235 = vmatprep.mubr.bf16.mxu0 %v4463_v51 }
 0x90d   :  { %4225 = vmatprep.subr.bf16.mxu0 %v4464_v32 }
 0x910   :  { %4226 = vmatpush3.bf16.msra.mxu0 %v4464_v32 }
 0x911   :  { %4227 = vmatprep.subr.bf16.mxu0 %v4465_v3 }
 0x914   :  { %4228 = vmatpush3.bf16.msra.mxu0 %v4465_v3 }
 0x915   :  { %4229 = vmatprep.subr.bf16.mxu0 %v4466_v38 }
 0x918   :  { %4230 = vmatpush3.bf16.msra.mxu0 %v4466_v38 }
 0x919   :  { %4231 = vmatprep.subr.bf16.mxu0 %v4467_v12 }
 0x91c   :  { %4232 = vmatpush3.bf16.msra.mxu0 %v4467_v12 }
 0x91d   :  { %4233 = vmatprep.subr.bf16.mxu0 %v4468_v8 }
 0x920   :  { %4234 = vmatpush3.bf16.msra.mxu0 %v4468_v8 }
 0x923   :  { %4236 = vmatmul.mubr.bf16.vlgmr.msra.gmra.mrb[80].mxu0 %v4469_v52 }
 0x924   :  { %4239 = vmatprep.mubr.bf16.mxu0 %v4470_v36 }
 0x92b   :  { %4240 = vmatmul.mubr.bf16.gmra.mrb[84].mxu0 %v4471_v4 }
 0x9f6   :  { %v4237_v33 = vpop.f32.mrb[80].mxu0 }
 0x9f7   :  { %v3884_v24 = vadd.f32 %v4237_v33, %v4138_v9  ;;  %v3844_v28 = vpop.f32.mrb[81].mxu0 }
 0x9f8   :  { %v3882_v29 = vadd.f32 %v4138_v9, %v3844_v28  ;;  %v4238_v15 = vpop.f32.mrb[82].mxu0 }
 0x9f9   :  { %3892 = vst [vmem:[%s7009_s10 + $0x10] sm:$0xff] %v3884_v24  ;;  %v3885_v11 = vadd.f32 %v4238_v15, %v4138_v9  ;;  %v3847_v46 = vpop.f32.mrb[83].mxu0 }
 0x9fa   :  { %3890 = vst [vmem:[%s7009_s10] sm:$0xff] %v3882_v29  ;;  %v3883_v2 = vadd.f32 %v4138_v9, %v3847_v46 }
 0x9fb   :  { %3893 = vst [vmem:[%s7009_s10 + $0x18] sm:$0xff] %v3885_v11 }
 0x9fc   :  { %3891 = vst [vmem:[%s7009_s10 + $0x8] sm:$0xff] %v3883_v2 }
 0x9fe   :  { %v4241_v21 = vpop.f32.mrb[84].mxu0 }
 0x9ff   :  { %v3888_v57 = vadd.f32 %v4241_v21, %v4138_v9  ;;  %v3860_v41 = vpop.f32.mrb[85].mxu0 }
 0xa00   :  { %v3886_v22 = vadd.f32 %v4138_v9, %v3860_v41  ;;  %v4242_v54 = vpop.f32.mrb[86].mxu0 }
 0xa01   :  { %3896 = vst [vmem:[%s7009_s10 + $0x30] sm:$0xff] %v3888_v57  ;;  %v3889_v20 = vadd.f32 %v4242_v54, %v4138_v9  ;;  %v3863_v25 = vpop.f32.mrb[87].mxu0 }
 0xa02   :  { %3894 = vst [vmem:[%s7009_s10 + $0x20] sm:$0xff] %v3886_v22  ;;  %v3887_v1 = vadd.f32 %v4138_v9, %v3863_v25 }
 0xa03   :  { %3897 = vst [vmem:[%s7009_s10 + $0x38] sm:$0xff] %v3889_v20 }
 0xa04   :  { %3895 = vst [vmem:[%s7009_s10 + $0x28] sm:$0xff] %v3887_v1 }

</bundles_post_ra>
